<compile_context>
chip_gen: v6e
topology: v6e:2x2x1
jax: 0.10.0
libtpu: 0.0.40
codegen_flags: <defaults>
</compile_context>

<pallas_src>
import functools
import math

import numpy as np
import jax
import jax.numpy as jnp
from jax.experimental import pallas as pl
from jax.experimental.pallas import tpu as pltpu

BN_EPS = 1e-5


# ----------------------------------------------------------------------------
# Fused forward kernel: one grid step == one batch element, channels-last.
# ----------------------------------------------------------------------------
def _gnn_kernel(*refs, n_layers, n_heads, feat_dim):
    it = iter(refs)
    x_ref = next(it)
    conv_init = [(next(it), next(it)) for _ in range(3)]
    layers = [tuple(next(it) for _ in range(8)) for _ in range(n_layers)]
    conv_desc = [(next(it), next(it)) for _ in range(2)]
    conv_off = [(next(it), next(it)) for _ in range(3)]
    desc_ref = next(it)
    off_ref = next(it)

    def mm(x, w_ref, s_ref, act=None):
        # fused 1x1 conv: matmul + (bias / folded-BN) shift + activation
        y = jnp.dot(x, w_ref[...], preferred_element_type=jnp.float32) + s_ref[...]
        if act == "relu":
            y = jnp.maximum(y, 0.0)
        elif act == "hardtanh":
            y = jnp.clip(y, -1.0, 1.0)
        return y

    F = feat_dim
    D = F // n_heads

    # ---- conv_init ----
    x = x_ref[0].astype(jnp.float32)                     # (N, first_dim + 2)
    x = mm(x, *conv_init[0], act="relu")
    x = mm(x, *conv_init[1], act="relu")
    x = mm(x, *conv_init[2])                             # (N, F)

    # ---- attentional propagation layers (attention + MLP + residual fused) ----
    for (wqkv, sqkv, wm, smg, w0, s0, w1, s1) in layers:
        qkv = mm(x, wqkv, sqkv)                          # (N, 3F), head-grouped cols
        heads = []
        for h in range(n_heads):                         # static loop, tiny H
            g = h * D
            q = qkv[:, g:g + D]                          # (N, D), pre-scaled by 1/sqrt(D)
            k = qkv[:, F + g:F + g + D]
            v = qkv[:, 2 * F + g:2 * F + g + D]
            s = jax.lax.dot_general(q, k, (((1,), (1,)), ((), ())),
                                    preferred_element_type=jnp.float32)  # (N, N)
            s = s - jnp.max(s, axis=-1, keepdims=True)
            p = jnp.exp(s)
            p = p * pl.reciprocal(jnp.sum(p, axis=-1, keepdims=True), approx=True)
            heads.append(jnp.dot(p, v, preferred_element_type=jnp.float32))
        attn = jnp.concatenate(heads, axis=-1)           # (N, F), grouped layout
        msg = mm(attn, wm, smg)                          # merge projection (N, F)
        cat = jnp.concatenate([x, msg], axis=-1)         # (N, 2F)
        hid = mm(cat, w0, s0, act="relu")                # MLP layer 0 (+folded BN)
        x = x + mm(hid, w1, s1)                          # MLP layer 1 + residual

    # ---- conv_desc head: write NCW (F, N) directly ----
    d = mm(x, *conv_desc[0], act="relu")
    d = mm(d, *conv_desc[1], act="relu")
    desc_ref[0] = d.T.astype(desc_ref.dtype)

    # ---- conv_offset head: (N, 2), Hardtanh ----
    o = mm(x, *conv_off[0], act="relu")
    o = mm(o, *conv_off[1], act="relu")
    o = mm(o, *conv_off[2], act="hardtanh")
    off_ref[0] = o.astype(off_ref.dtype)


# ----------------------------------------------------------------------------
# Trace-time weight preprocessing (all folds are free under jit)
# ----------------------------------------------------------------------------
def _fold_conv(w, b, bn=None):
    """Conv1d(k=1) [+ eval BatchNorm] -> (w_k:(Cin,Cout), shift:(1,Cout)) in f32."""
    wk = w.T.astype(jnp.float32)
    shift = b.astype(jnp.float32)
    if bn is not None:
        gamma, beta, mean, var = bn
        s = gamma / jnp.sqrt(var + BN_EPS)
        wk = wk * s[None, :]
        shift = b * s + beta - mean * s
    return wk, shift.reshape(1, -1).astype(jnp.float32)


def _head_perm(F, H):
    # grouped channel g = h*D + d  <-  PyTorch channel o = d*H + h
    D = F // H
    return np.array([(g % D) * H + (g // D) for g in range(F)], dtype=np.int32)


def attentional_gnn_forward(feat_ncw, graph_ncw, params, n_heads=4):
    # PyTorch-style NCW concat (dim=1), then channels-last for the kernel.
    x = jnp.concatenate([feat_ncw, graph_ncw], axis=1).transpose(0, 2, 1)
    x = x.astype(jnp.float32)
    B, N, Cin0 = x.shape
    F = params["conv_init"]["w1"].shape[0]
    D = F // n_heads
    perm = _head_perm(F, n_heads)
    inv_sqrt_d = 1.0 / math.sqrt(D)

    ops = [x]
    specs = [pl.BlockSpec((1, N, Cin0), lambda b: (b, 0, 0))]

    def add(w, s):
        ops.append(w)
        specs.append(pl.BlockSpec(w.shape, lambda b: (0, 0)))
        ops.append(s)
        specs.append(pl.BlockSpec(s.shape, lambda b: (0, 0)))

    ci = params["conv_init"]
    add(*_fold_conv(ci["w0"], ci["b0"], ci["bn0"]))
    add(*_fold_conv(ci["w1"], ci["b1"], ci["bn1"]))
    add(*_fold_conv(ci["w2"], ci["b2"]))

    for lp in params["layers"]:
        a = lp["attn"]
        wq, sq = _fold_conv(a["wq"], a["bq"])
        wk, sk = _fold_conv(a["wk"], a["bk"])
        wv, sv = _fold_conv(a["wv"], a["bv"])
        # regroup head channels contiguously; fold 1/sqrt(D) into Q
        wq = wq[:, perm] * inv_sqrt_d
        sq = sq[:, perm] * inv_sqrt_d
        wk = wk[:, perm]; sk = sk[:, perm]
        wv = wv[:, perm]; sv = sv[:, perm]
        add(jnp.concatenate([wq, wk, wv], axis=1),
            jnp.concatenate([sq, sk, sv], axis=1))          # fused QKV projection
        wm, smg = _fold_conv(a["wm"], a["bm"])
        add(wm[perm, :], smg)                               # merge: permute Cin rows
        add(*_fold_conv(lp["mlp_w0"], lp["mlp_b0"], lp["mlp_bn0"]))
        add(*_fold_conv(lp["mlp_w1"], lp["mlp_b1"]))

    cd = params["conv_desc"]
    add(*_fold_conv(cd["w0"], cd["b0"], cd["bn0"]))
    add(*_fold_conv(cd["w1"], cd["b1"], cd["bn1"]))

    co = params["conv_offset"]
    add(*_fold_conv(co["w0"], co["b0"], co["bn0"]))
    add(*_fold_conv(co["w1"], co["b1"], co["bn1"]))
    add(*_fold_conv(co["w2"], co["b2"]))

    desc, offset = pl.pallas_call(
        functools.partial(_gnn_kernel, n_layers=len(params["layers"]),
                          n_heads=n_heads, feat_dim=F),
        out_shape=(jax.ShapeDtypeStruct((B, F, N), jnp.float32),   # desc  (B, F, N)
                   jax.ShapeDtypeStruct((B, N, 2), jnp.float32)),  # offset (B, N, 2)
        grid=(B,),
        in_specs=specs,
        out_specs=(pl.BlockSpec((1, F, N), lambda b: (b, 0, 0)),
                   pl.BlockSpec((1, N, 2), lambda b: (b, 0, 0))),
        compiler_params=pltpu.CompilerParams(dimension_semantics=("parallel",)),
    )(*ops)
    return desc, offset


# ----------------------------------------------------------------------------
# Pure-JAX reference (mirrors the PyTorch module op-by-op) for validation
# ----------------------------------------------------------------------------
def _reference_forward(feat_ncw, graph_ncw, params, n_heads=4):
    def conv(x, w, b):
        return jnp.einsum("bnc,oc->bno", x, w) + b

    def bn(x, stats):
        gamma, beta, mean, var = stats
        return (x - mean) / jnp.sqrt(var + BN_EPS) * gamma + beta

    relu = lambda t: jnp.maximum(t, 0.0)

    x = jnp.concatenate([feat_ncw, graph_ncw], axis=1).transpose(0, 2, 1)
    ci = params["conv_init"]
    x = relu(bn(conv(x, ci["w0"], ci["b0"]), ci["bn0"]))
    x = relu(bn(conv(x, ci["w1"], ci["b1"]), ci["bn1"]))
    x = conv(x, ci["w2"], ci["b2"])

    B, N, F = x.shape
    H = n_heads
    D = F // H
    for lp in params["layers"]:
        a = lp["attn"]
        q = conv(x, a["wq"], a["bq"]).reshape(B, N, D, H)
        k = conv(x, a["wk"], a["bk"]).reshape(B, N, D, H)
        v = conv(x, a["wv"], a["bv"]).reshape(B, N, D, H)
        s = jnp.einsum("bndh,bmdh->bhnm", q, k) / math.sqrt(D)
        p = jax.nn.softmax(s, axis=-1)
        attn = jnp.einsum("bhnm,bmdh->bndh", p, v).reshape(B, N, F)
        msg = conv(attn, a["wm"], a["bm"])
        cat = jnp.concatenate([x, msg], axis=-1)
        h1 = relu(bn(conv(cat, lp["mlp_w0"], lp["mlp_b0"]), lp["mlp_bn0"]))
        x = x + conv(h1, lp["mlp_w1"], lp["mlp_b1"])

    cd = params["conv_desc"]
    d = relu(bn(conv(x, cd["w0"], cd["b0"]), cd["bn0"]))
    d = relu(bn(conv(d, cd["w1"], cd["b1"]), cd["bn1"]))
    co = params["conv_offset"]
    o = relu(bn(conv(x, co["w0"], co["b0"]), co["bn0"]))
    o = relu(bn(conv(o, co["w1"], co["b1"]), co["bn1"]))
    o = jnp.clip(conv(o, co["w2"], co["b2"]), -1.0, 1.0)
    return d.transpose(0, 2, 1), o


# ----------------------------------------------------------------------------
# Deterministic parameter init (shapes per module __init__)
# ----------------------------------------------------------------------------
def _init_conv(key, cin, cout, zero_bias=False):
    kw, kb = jax.random.split(key)
    bound = 1.0 / np.sqrt(cin)
    w = jax.random.uniform(kw, (cout, cin), jnp.float32, -bound, bound)
    if zero_bias:
        b = jnp.zeros((cout,), jnp.float32)
    else:
        b = jax.random.uniform(kb, (cout,), jnp.float32, -bound, bound)
    return w, b


def _init_bn(key, c):
    kg, kb, km, kv = jax.random.split(key, 4)
    gamma = 1.0 + 0.1 * jax.random.normal(kg, (c,), jnp.float32)
    beta = 0.1 * jax.random.normal(kb, (c,), jnp.float32)
    mean = 0.1 * jax.random.normal(km, (c,), jnp.float32)
    var = 1.0 + 0.1 * jnp.abs(jax.random.normal(kv, (c,), jnp.float32))
    return gamma, beta, mean, var


def init_params(key, feature_dim, num_layers, first_dim):
    kiter = iter(jax.random.split(key, 256))
    nk = lambda: next(kiter)
    F = feature_dim
    p = {}

    w0, b0 = _init_conv(nk(), first_dim + 2, F); bn0 = _init_bn(nk(), F)
    w1, b1 = _init_conv(nk(), F, F); bn1 = _init_bn(nk(), F)
    w2, b2 = _init_conv(nk(), F, F)
    p["conv_init"] = dict(w0=w0, b0=b0, bn0=bn0, w1=w1, b1=b1, bn1=bn1, w2=w2, b2=b2)

    layers = []
    for _ in range(num_layers):
        lp = {}
        wq, bq = _init_conv(nk(), F, F)
        wk, bk = _init_conv(nk(), F, F)
        wv, bv = _init_conv(nk(), F, F)
        wm, bm = _init_conv(nk(), F, F)
        lp["attn"] = dict(wq=wq, bq=bq, wk=wk, bk=bk, wv=wv, bv=bv, wm=wm, bm=bm)
        mw0, mb0 = _init_conv(nk(), 2 * F, 2 * F)
        mbn0 = _init_bn(nk(), 2 * F)
        mw1, mb1 = _init_conv(nk(), 2 * F, F, zero_bias=True)  # nn.init.constant_(bias, 0.0)
        lp.update(mlp_w0=mw0, mlp_b0=mb0, mlp_bn0=mbn0, mlp_w1=mw1, mlp_b1=mb1)
        layers.append(lp)
    p["layers"] = layers

    dw0, db0 = _init_conv(nk(), F, F); dbn0 = _init_bn(nk(), F)
    dw1, db1 = _init_conv(nk(), F, F); dbn1 = _init_bn(nk(), F)
    p["conv_desc"] = dict(w0=dw0, b0=db0, bn0=dbn0, w1=dw1, b1=db1, bn1=dbn1)

    ow0, ob0 = _init_conv(nk(), F, F); obn0 = _init_bn(nk(), F)
    ow1, ob1 = _init_conv(nk(), F, F); obn1 = _init_bn(nk(), F)
    ow2, ob2 = _init_conv(nk(), F, 2)
    p["conv_offset"] = dict(w0=ow0, b0=ob0, bn0=obn0, w1=ow1, b1=ob1, bn1=obn1,
                            w2=ow2, b2=ob2)
    return p


if __name__ == "__main__":
    FEATURE_DIM = 32
    NUM_LAYERS = 2
    FIRST_DIM = 6
    N_HEADS = 4
    B, N = 2, 64

    key = jax.random.PRNGKey(0)
    kp, kf, kg = jax.random.split(key, 3)
    params = init_params(kp, FEATURE_DIM, NUM_LAYERS, FIRST_DIM)

    # PyTorch-style NCW inputs: feat (B, first_dim, N), graph (B, 2, N)
    feat = jax.random.normal(kf, (B, FIRST_DIM, N), jnp.float32)
    graph = jax.random.normal(kg, (B, 2, N), jnp.float32)

    fwd = jax.jit(lambda f_, g_: attentional_gnn_forward(f_, g_, params, n_heads=N_HEADS))
    desc, offset = fwd(feat, graph)
    jax.block_until_ready((desc, offset))

    assert desc.shape == (B, FEATURE_DIM, N), desc.shape
    assert offset.shape == (B, N, 2), offset.shape
    assert bool(jnp.all(jnp.isfinite(desc))) and bool(jnp.all(jnp.isfinite(offset)))
    assert bool(jnp.all(offset >= -1.0)) and bool(jnp.all(offset <= 1.0))  # Hardtanh range

    # Validate against a pure-JAX op-by-op reference (loose tol: MXU rounding +
    # approx reciprocal in the softmax normalization).
    ref_desc, ref_off = _reference_forward(feat, graph, params, n_heads=N_HEADS)
    d_err = float(jnp.max(jnp.abs(desc - ref_desc)))
    o_err = float(jnp.max(jnp.abs(offset - ref_off)))
    assert d_err < 2e-2 and o_err < 2e-2, (d_err, o_err)

    print("KERNEL_OK")
</pallas_src>

<mosaic_0001>
module attributes {stable_mosaic.version = 11 : i64} {
  func.func @_gnn_kernel(%arg0: i32, %arg1: memref<1x64x8xf32, #tpu.memory_space<vmem>>, %arg2: memref<8x32xf32, #tpu.memory_space<vmem>>, %arg3: memref<1x32xf32, #tpu.memory_space<vmem>>, %arg4: memref<32x32xf32, #tpu.memory_space<vmem>>, %arg5: memref<1x32xf32, #tpu.memory_space<vmem>>, %arg6: memref<32x32xf32, #tpu.memory_space<vmem>>, %arg7: memref<1x32xf32, #tpu.memory_space<vmem>>, %arg8: memref<32x96xf32, #tpu.memory_space<vmem>>, %arg9: memref<1x96xf32, #tpu.memory_space<vmem>>, %arg10: memref<32x32xf32, #tpu.memory_space<vmem>>, %arg11: memref<1x32xf32, #tpu.memory_space<vmem>>, %arg12: memref<64x64xf32, #tpu.memory_space<vmem>>, %arg13: memref<1x64xf32, #tpu.memory_space<vmem>>, %arg14: memref<64x32xf32, #tpu.memory_space<vmem>>, %arg15: memref<1x32xf32, #tpu.memory_space<vmem>>, %arg16: memref<32x96xf32, #tpu.memory_space<vmem>>, %arg17: memref<1x96xf32, #tpu.memory_space<vmem>>, %arg18: memref<32x32xf32, #tpu.memory_space<vmem>>, %arg19: memref<1x32xf32, #tpu.memory_space<vmem>>, %arg20: memref<64x64xf32, #tpu.memory_space<vmem>>, %arg21: memref<1x64xf32, #tpu.memory_space<vmem>>, %arg22: memref<64x32xf32, #tpu.memory_space<vmem>>, %arg23: memref<1x32xf32, #tpu.memory_space<vmem>>, %arg24: memref<32x32xf32, #tpu.memory_space<vmem>>, %arg25: memref<1x32xf32, #tpu.memory_space<vmem>>, %arg26: memref<32x32xf32, #tpu.memory_space<vmem>>, %arg27: memref<1x32xf32, #tpu.memory_space<vmem>>, %arg28: memref<32x32xf32, #tpu.memory_space<vmem>>, %arg29: memref<1x32xf32, #tpu.memory_space<vmem>>, %arg30: memref<32x32xf32, #tpu.memory_space<vmem>>, %arg31: memref<1x32xf32, #tpu.memory_space<vmem>>, %arg32: memref<32x2xf32, #tpu.memory_space<vmem>>, %arg33: memref<1x2xf32, #tpu.memory_space<vmem>>, %arg34: memref<1x32x64xf32, #tpu.memory_space<vmem>>, %arg35: memref<1x64x2xf32, #tpu.memory_space<vmem>>) attributes {dimension_semantics = [#tpu.dimension_semantics<parallel>], iteration_bounds = array<i64: 2>, scalar_prefetch = 0 : i64, scratch_operands = 0 : i64, tpu.core_type = #tpu.core_type<tc>, window_params = [{transform_indices = @transform_0, window_bounds = array<i64: 1, 64, 8>}, {pipeline_mode = #tpu.pipeline_mode<synchronous>, transform_indices = @transform_1, window_bounds = array<i64: 8, 32>}, {pipeline_mode = #tpu.pipeline_mode<synchronous>, transform_indices = @transform_2, window_bounds = array<i64: 1, 32>}, {pipeline_mode = #tpu.pipeline_mode<synchronous>, transform_indices = @transform_3, window_bounds = array<i64: 32, 32>}, {pipeline_mode = #tpu.pipeline_mode<synchronous>, transform_indices = @transform_4, window_bounds = array<i64: 1, 32>}, {pipeline_mode = #tpu.pipeline_mode<synchronous>, transform_indices = @transform_5, window_bounds = array<i64: 32, 32>}, {pipeline_mode = #tpu.pipeline_mode<synchronous>, transform_indices = @transform_6, window_bounds = array<i64: 1, 32>}, {pipeline_mode = #tpu.pipeline_mode<synchronous>, transform_indices = @transform_7, window_bounds = array<i64: 32, 96>}, {pipeline_mode = #tpu.pipeline_mode<synchronous>, transform_indices = @transform_8, window_bounds = array<i64: 1, 96>}, {pipeline_mode = #tpu.pipeline_mode<synchronous>, transform_indices = @transform_9, window_bounds = array<i64: 32, 32>}, {pipeline_mode = #tpu.pipeline_mode<synchronous>, transform_indices = @transform_10, window_bounds = array<i64: 1, 32>}, {pipeline_mode = #tpu.pipeline_mode<synchronous>, transform_indices = @transform_11, window_bounds = array<i64: 64, 64>}, {pipeline_mode = #tpu.pipeline_mode<synchronous>, transform_indices = @transform_12, window_bounds = array<i64: 1, 64>}, {pipeline_mode = #tpu.pipeline_mode<synchronous>, transform_indices = @transform_13, window_bounds = array<i64: 64, 32>}, {pipeline_mode = #tpu.pipeline_mode<synchronous>, transform_indices = @transform_14, window_bounds = array<i64: 1, 32>}, {pipeline_mode = #tpu.pipeline_mode<synchronous>, transform_indices = @transform_15, window_bounds = array<i64: 32, 96>}, {pipeline_mode = #tpu.pipeline_mode<synchronous>, transform_indices = @transform_16, window_bounds = array<i64: 1, 96>}, {pipeline_mode = #tpu.pipeline_mode<synchronous>, transform_indices = @transform_17, window_bounds = array<i64: 32, 32>}, {pipeline_mode = #tpu.pipeline_mode<synchronous>, transform_indices = @transform_18, window_bounds = array<i64: 1, 32>}, {pipeline_mode = #tpu.pipeline_mode<synchronous>, transform_indices = @transform_19, window_bounds = array<i64: 64, 64>}, {pipeline_mode = #tpu.pipeline_mode<synchronous>, transform_indices = @transform_20, window_bounds = array<i64: 1, 64>}, {pipeline_mode = #tpu.pipeline_mode<synchronous>, transform_indices = @transform_21, window_bounds = array<i64: 64, 32>}, {pipeline_mode = #tpu.pipeline_mode<synchronous>, transform_indices = @transform_22, window_bounds = array<i64: 1, 32>}, {pipeline_mode = #tpu.pipeline_mode<synchronous>, transform_indices = @transform_23, window_bounds = array<i64: 32, 32>}, {pipeline_mode = #tpu.pipeline_mode<synchronous>, transform_indices = @transform_24, window_bounds = array<i64: 1, 32>}, {pipeline_mode = #tpu.pipeline_mode<synchronous>, transform_indices = @transform_25, window_bounds = array<i64: 32, 32>}, {pipeline_mode = #tpu.pipeline_mode<synchronous>, transform_indices = @transform_26, window_bounds = array<i64: 1, 32>}, {pipeline_mode = #tpu.pipeline_mode<synchronous>, transform_indices = @transform_27, window_bounds = array<i64: 32, 32>}, {pipeline_mode = #tpu.pipeline_mode<synchronous>, transform_indices = @transform_28, window_bounds = array<i64: 1, 32>}, {pipeline_mode = #tpu.pipeline_mode<synchronous>, transform_indices = @transform_29, window_bounds = array<i64: 32, 32>}, {pipeline_mode = #tpu.pipeline_mode<synchronous>, transform_indices = @transform_30, window_bounds = array<i64: 1, 32>}, {pipeline_mode = #tpu.pipeline_mode<synchronous>, transform_indices = @transform_31, window_bounds = array<i64: 32, 2>}, {pipeline_mode = #tpu.pipeline_mode<synchronous>, transform_indices = @transform_32, window_bounds = array<i64: 1, 2>}, {transform_indices = @transform_33, window_bounds = array<i64: 1, 32, 64>}, {transform_indices = @transform_34, window_bounds = array<i64: 1, 64, 2>}]} {
    %c0 = arith.constant 0 : index
    %c0_0 = arith.constant 0 : index
    %c0_1 = arith.constant 0 : index
    %0 = vector.load %arg1[%c0, %c0_0, %c0_1] : memref<1x64x8xf32, #tpu.memory_space<vmem>>, vector<1x64x8xf32>
    %1 = vector.shape_cast %0 : vector<1x64x8xf32> to vector<64x8xf32>
    %c0_2 = arith.constant 0 : index
    %c0_3 = arith.constant 0 : index
    %2 = vector.load %arg2[%c0_2, %c0_3] : memref<8x32xf32, #tpu.memory_space<vmem>>, vector<8x32xf32>
    %cst = arith.constant dense<0.000000e+00> : vector<64x32xf32>
    %3 = tpu.matmul %1, %2, %cst {dimension_numbers = #tpu.dot_dimension_numbers<[1], [0], [0], [1], [0, 0, 1, 1], [], []>} : vector<64x8xf32>, vector<8x32xf32>, vector<64x32xf32> -> vector<64x32xf32>
    %c0_4 = arith.constant 0 : index
    %c0_5 = arith.constant 0 : index
    %4 = vector.load %arg3[%c0_4, %c0_5] : memref<1x32xf32, #tpu.memory_space<vmem>>, vector<1x32xf32>
    %5 = vector.broadcast %4 : vector<1x32xf32> to vector<64x32xf32>
    %6 = arith.addf %3, %5 : vector<64x32xf32>
    %cst_6 = arith.constant 0.000000e+00 : f32
    %7 = vector.broadcast %cst_6 : f32 to vector<64x32xf32>
    %8 = arith.maximumf %6, %7 : vector<64x32xf32>
    %c0_7 = arith.constant 0 : index
    %c0_8 = arith.constant 0 : index
    %9 = vector.load %arg4[%c0_7, %c0_8] : memref<32x32xf32, #tpu.memory_space<vmem>>, vector<32x32xf32>
    %cst_9 = arith.constant dense<0.000000e+00> : vector<64x32xf32>
    %10 = tpu.matmul %8, %9, %cst_9 {dimension_numbers = #tpu.dot_dimension_numbers<[1], [0], [0], [1], [0, 0, 1, 1], [], []>} : vector<64x32xf32>, vector<32x32xf32>, vector<64x32xf32> -> vector<64x32xf32>
    %c0_10 = arith.constant 0 : index
    %c0_11 = arith.constant 0 : index
    %11 = vector.load %arg5[%c0_10, %c0_11] : memref<1x32xf32, #tpu.memory_space<vmem>>, vector<1x32xf32>
    %12 = vector.broadcast %11 : vector<1x32xf32> to vector<64x32xf32>
    %13 = arith.addf %10, %12 : vector<64x32xf32>
    %cst_12 = arith.constant 0.000000e+00 : f32
    %14 = vector.broadcast %cst_12 : f32 to vector<64x32xf32>
    %15 = arith.maximumf %13, %14 : vector<64x32xf32>
    %c0_13 = arith.constant 0 : index
    %c0_14 = arith.constant 0 : index
    %16 = vector.load %arg6[%c0_13, %c0_14] : memref<32x32xf32, #tpu.memory_space<vmem>>, vector<32x32xf32>
    %cst_15 = arith.constant dense<0.000000e+00> : vector<64x32xf32>
    %17 = tpu.matmul %15, %16, %cst_15 {dimension_numbers = #tpu.dot_dimension_numbers<[1], [0], [0], [1], [0, 0, 1, 1], [], []>} : vector<64x32xf32>, vector<32x32xf32>, vector<64x32xf32> -> vector<64x32xf32>
    %c0_16 = arith.constant 0 : index
    %c0_17 = arith.constant 0 : index
    %18 = vector.load %arg7[%c0_16, %c0_17] : memref<1x32xf32, #tpu.memory_space<vmem>>, vector<1x32xf32>
    %19 = vector.broadcast %18 : vector<1x32xf32> to vector<64x32xf32>
    %20 = arith.addf %17, %19 : vector<64x32xf32>
    %c0_18 = arith.constant 0 : index
    %c0_19 = arith.constant 0 : index
    %21 = vector.load %arg8[%c0_18, %c0_19] : memref<32x96xf32, #tpu.memory_space<vmem>>, vector<32x96xf32>
    %cst_20 = arith.constant dense<0.000000e+00> : vector<64x96xf32>
    %22 = tpu.matmul %20, %21, %cst_20 {dimension_numbers = #tpu.dot_dimension_numbers<[1], [0], [0], [1], [0, 0, 1, 1], [], []>} : vector<64x32xf32>, vector<32x96xf32>, vector<64x96xf32> -> vector<64x96xf32>
    %c0_21 = arith.constant 0 : index
    %c0_22 = arith.constant 0 : index
    %23 = vector.load %arg9[%c0_21, %c0_22] : memref<1x96xf32, #tpu.memory_space<vmem>>, vector<1x96xf32>
    %24 = vector.broadcast %23 : vector<1x96xf32> to vector<64x96xf32>
    %25 = arith.addf %22, %24 : vector<64x96xf32>
    %26 = vector.extract_strided_slice %25 {offsets = [0, 0], sizes = [64, 8], strides = [1, 1]} : vector<64x96xf32> to vector<64x8xf32>
    %27 = vector.extract_strided_slice %25 {offsets = [0, 32], sizes = [64, 8], strides = [1, 1]} : vector<64x96xf32> to vector<64x8xf32>
    %28 = vector.extract_strided_slice %25 {offsets = [0, 64], sizes = [64, 8], strides = [1, 1]} : vector<64x96xf32> to vector<64x8xf32>
    %cst_23 = arith.constant dense<0.000000e+00> : vector<64x64xf32>
    %29 = tpu.matmul %26, %27, %cst_23 {dimension_numbers = #tpu.dot_dimension_numbers<[1], [1], [0], [0], [0, 0, 1, 0], [], []>} : vector<64x8xf32>, vector<64x8xf32>, vector<64x64xf32> -> vector<64x64xf32>
    %cst_24 = arith.constant dense<0xFF800000> : vector<64xf32>
    %30 = vector.multi_reduction <maximumf>, %29, %cst_24 [1] : vector<64x64xf32> to vector<64xf32>
    %31 = vector.shape_cast %30 : vector<64xf32> to vector<64x1xf32>
    %32 = vector.broadcast %31 : vector<64x1xf32> to vector<64x64xf32>
    %33 = arith.subf %29, %32 : vector<64x64xf32>
    %34 = math.exp %33 : vector<64x64xf32>
    %cst_25 = arith.constant dense<0.000000e+00> : vector<64xf32>
    %35 = vector.multi_reduction <add>, %34, %cst_25 [1] : vector<64x64xf32> to vector<64xf32>
    %36 = vector.shape_cast %35 : vector<64xf32> to vector<64x1xf32>
    %37 = tpu.reciprocal %36 {approx = true} : vector<64x1xf32> -> vector<64x1xf32>
    %38 = vector.broadcast %37 : vector<64x1xf32> to vector<64x64xf32>
    %39 = arith.mulf %34, %38 : vector<64x64xf32>
    %cst_26 = arith.constant dense<0.000000e+00> : vector<64x8xf32>
    %40 = tpu.matmul %39, %28, %cst_26 {dimension_numbers = #tpu.dot_dimension_numbers<[1], [0], [0], [1], [0, 0, 1, 1], [], []>} : vector<64x64xf32>, vector<64x8xf32>, vector<64x8xf32> -> vector<64x8xf32>
    %41 = vector.extract_strided_slice %25 {offsets = [0, 8], sizes = [64, 8], strides = [1, 1]} : vector<64x96xf32> to vector<64x8xf32>
    %42 = vector.extract_strided_slice %25 {offsets = [0, 40], sizes = [64, 8], strides = [1, 1]} : vector<64x96xf32> to vector<64x8xf32>
    %43 = vector.extract_strided_slice %25 {offsets = [0, 72], sizes = [64, 8], strides = [1, 1]} : vector<64x96xf32> to vector<64x8xf32>
    %cst_27 = arith.constant dense<0.000000e+00> : vector<64x64xf32>
    %44 = tpu.matmul %41, %42, %cst_27 {dimension_numbers = #tpu.dot_dimension_numbers<[1], [1], [0], [0], [0, 0, 1, 0], [], []>} : vector<64x8xf32>, vector<64x8xf32>, vector<64x64xf32> -> vector<64x64xf32>
    %cst_28 = arith.constant dense<0xFF800000> : vector<64xf32>
    %45 = vector.multi_reduction <maximumf>, %44, %cst_28 [1] : vector<64x64xf32> to vector<64xf32>
    %46 = vector.shape_cast %45 : vector<64xf32> to vector<64x1xf32>
    %47 = vector.broadcast %46 : vector<64x1xf32> to vector<64x64xf32>
    %48 = arith.subf %44, %47 : vector<64x64xf32>
    %49 = math.exp %48 : vector<64x64xf32>
    %cst_29 = arith.constant dense<0.000000e+00> : vector<64xf32>
    %50 = vector.multi_reduction <add>, %49, %cst_29 [1] : vector<64x64xf32> to vector<64xf32>
    %51 = vector.shape_cast %50 : vector<64xf32> to vector<64x1xf32>
    %52 = tpu.reciprocal %51 {approx = true} : vector<64x1xf32> -> vector<64x1xf32>
    %53 = vector.broadcast %52 : vector<64x1xf32> to vector<64x64xf32>
    %54 = arith.mulf %49, %53 : vector<64x64xf32>
    %cst_30 = arith.constant dense<0.000000e+00> : vector<64x8xf32>
    %55 = tpu.matmul %54, %43, %cst_30 {dimension_numbers = #tpu.dot_dimension_numbers<[1], [0], [0], [1], [0, 0, 1, 1], [], []>} : vector<64x64xf32>, vector<64x8xf32>, vector<64x8xf32> -> vector<64x8xf32>
    %56 = vector.extract_strided_slice %25 {offsets = [0, 16], sizes = [64, 8], strides = [1, 1]} : vector<64x96xf32> to vector<64x8xf32>
    %57 = vector.extract_strided_slice %25 {offsets = [0, 48], sizes = [64, 8], strides = [1, 1]} : vector<64x96xf32> to vector<64x8xf32>
    %58 = vector.extract_strided_slice %25 {offsets = [0, 80], sizes = [64, 8], strides = [1, 1]} : vector<64x96xf32> to vector<64x8xf32>
    %cst_31 = arith.constant dense<0.000000e+00> : vector<64x64xf32>
    %59 = tpu.matmul %56, %57, %cst_31 {dimension_numbers = #tpu.dot_dimension_numbers<[1], [1], [0], [0], [0, 0, 1, 0], [], []>} : vector<64x8xf32>, vector<64x8xf32>, vector<64x64xf32> -> vector<64x64xf32>
    %cst_32 = arith.constant dense<0xFF800000> : vector<64xf32>
    %60 = vector.multi_reduction <maximumf>, %59, %cst_32 [1] : vector<64x64xf32> to vector<64xf32>
    %61 = vector.shape_cast %60 : vector<64xf32> to vector<64x1xf32>
    %62 = vector.broadcast %61 : vector<64x1xf32> to vector<64x64xf32>
    %63 = arith.subf %59, %62 : vector<64x64xf32>
    %64 = math.exp %63 : vector<64x64xf32>
    %cst_33 = arith.constant dense<0.000000e+00> : vector<64xf32>
    %65 = vector.multi_reduction <add>, %64, %cst_33 [1] : vector<64x64xf32> to vector<64xf32>
    %66 = vector.shape_cast %65 : vector<64xf32> to vector<64x1xf32>
    %67 = tpu.reciprocal %66 {approx = true} : vector<64x1xf32> -> vector<64x1xf32>
    %68 = vector.broadcast %67 : vector<64x1xf32> to vector<64x64xf32>
    %69 = arith.mulf %64, %68 : vector<64x64xf32>
    %cst_34 = arith.constant dense<0.000000e+00> : vector<64x8xf32>
    %70 = tpu.matmul %69, %58, %cst_34 {dimension_numbers = #tpu.dot_dimension_numbers<[1], [0], [0], [1], [0, 0, 1, 1], [], []>} : vector<64x64xf32>, vector<64x8xf32>, vector<64x8xf32> -> vector<64x8xf32>
    %71 = vector.extract_strided_slice %25 {offsets = [0, 24], sizes = [64, 8], strides = [1, 1]} : vector<64x96xf32> to vector<64x8xf32>
    %72 = vector.extract_strided_slice %25 {offsets = [0, 56], sizes = [64, 8], strides = [1, 1]} : vector<64x96xf32> to vector<64x8xf32>
    %73 = vector.extract_strided_slice %25 {offsets = [0, 88], sizes = [64, 8], strides = [1, 1]} : vector<64x96xf32> to vector<64x8xf32>
    %cst_35 = arith.constant dense<0.000000e+00> : vector<64x64xf32>
    %74 = tpu.matmul %71, %72, %cst_35 {dimension_numbers = #tpu.dot_dimension_numbers<[1], [1], [0], [0], [0, 0, 1, 0], [], []>} : vector<64x8xf32>, vector<64x8xf32>, vector<64x64xf32> -> vector<64x64xf32>
    %cst_36 = arith.constant dense<0xFF800000> : vector<64xf32>
    %75 = vector.multi_reduction <maximumf>, %74, %cst_36 [1] : vector<64x64xf32> to vector<64xf32>
    %76 = vector.shape_cast %75 : vector<64xf32> to vector<64x1xf32>
    %77 = vector.broadcast %76 : vector<64x1xf32> to vector<64x64xf32>
    %78 = arith.subf %74, %77 : vector<64x64xf32>
    %79 = math.exp %78 : vector<64x64xf32>
    %cst_37 = arith.constant dense<0.000000e+00> : vector<64xf32>
    %80 = vector.multi_reduction <add>, %79, %cst_37 [1] : vector<64x64xf32> to vector<64xf32>
    %81 = vector.shape_cast %80 : vector<64xf32> to vector<64x1xf32>
    %82 = tpu.reciprocal %81 {approx = true} : vector<64x1xf32> -> vector<64x1xf32>
    %83 = vector.broadcast %82 : vector<64x1xf32> to vector<64x64xf32>
    %84 = arith.mulf %79, %83 : vector<64x64xf32>
    %cst_38 = arith.constant dense<0.000000e+00> : vector<64x8xf32>
    %85 = tpu.matmul %84, %73, %cst_38 {dimension_numbers = #tpu.dot_dimension_numbers<[1], [0], [0], [1], [0, 0, 1, 1], [], []>} : vector<64x64xf32>, vector<64x8xf32>, vector<64x8xf32> -> vector<64x8xf32>
    %86 = tpu.concatenate %40, %55, %70, %85 in 1 : vector<64x8xf32>, vector<64x8xf32>, vector<64x8xf32>, vector<64x8xf32> -> vector<64x32xf32>
    %c0_39 = arith.constant 0 : index
    %c0_40 = arith.constant 0 : index
    %87 = vector.load %arg10[%c0_39, %c0_40] : memref<32x32xf32, #tpu.memory_space<vmem>>, vector<32x32xf32>
    %cst_41 = arith.constant dense<0.000000e+00> : vector<64x32xf32>
    %88 = tpu.matmul %86, %87, %cst_41 {dimension_numbers = #tpu.dot_dimension_numbers<[1], [0], [0], [1], [0, 0, 1, 1], [], []>} : vector<64x32xf32>, vector<32x32xf32>, vector<64x32xf32> -> vector<64x32xf32>
    %c0_42 = arith.constant 0 : index
    %c0_43 = arith.constant 0 : index
    %89 = vector.load %arg11[%c0_42, %c0_43] : memref<1x32xf32, #tpu.memory_space<vmem>>, vector<1x32xf32>
    %90 = vector.broadcast %89 : vector<1x32xf32> to vector<64x32xf32>
    %91 = arith.addf %88, %90 : vector<64x32xf32>
    %92 = tpu.concatenate %20, %91 in 1 : vector<64x32xf32>, vector<64x32xf32> -> vector<64x64xf32>
    %c0_44 = arith.constant 0 : index
    %c0_45 = arith.constant 0 : index
    %93 = vector.load %arg12[%c0_44, %c0_45] : memref<64x64xf32, #tpu.memory_space<vmem>>, vector<64x64xf32>
    %cst_46 = arith.constant dense<0.000000e+00> : vector<64x64xf32>
    %94 = tpu.matmul %92, %93, %cst_46 {dimension_numbers = #tpu.dot_dimension_numbers<[1], [0], [0], [1], [0, 0, 1, 1], [], []>} : vector<64x64xf32>, vector<64x64xf32>, vector<64x64xf32> -> vector<64x64xf32>
    %c0_47 = arith.constant 0 : index
    %c0_48 = arith.constant 0 : index
    %95 = vector.load %arg13[%c0_47, %c0_48] : memref<1x64xf32, #tpu.memory_space<vmem>>, vector<1x64xf32>
    %96 = vector.broadcast %95 : vector<1x64xf32> to vector<64x64xf32>
    %97 = arith.addf %94, %96 : vector<64x64xf32>
    %cst_49 = arith.constant 0.000000e+00 : f32
    %98 = vector.broadcast %cst_49 : f32 to vector<64x64xf32>
    %99 = arith.maximumf %97, %98 : vector<64x64xf32>
    %c0_50 = arith.constant 0 : index
    %c0_51 = arith.constant 0 : index
    %100 = vector.load %arg14[%c0_50, %c0_51] : memref<64x32xf32, #tpu.memory_space<vmem>>, vector<64x32xf32>
    %cst_52 = arith.constant dense<0.000000e+00> : vector<64x32xf32>
    %101 = tpu.matmul %99, %100, %cst_52 {dimension_numbers = #tpu.dot_dimension_numbers<[1], [0], [0], [1], [0, 0, 1, 1], [], []>} : vector<64x64xf32>, vector<64x32xf32>, vector<64x32xf32> -> vector<64x32xf32>
    %c0_53 = arith.constant 0 : index
    %c0_54 = arith.constant 0 : index
    %102 = vector.load %arg15[%c0_53, %c0_54] : memref<1x32xf32, #tpu.memory_space<vmem>>, vector<1x32xf32>
    %103 = vector.broadcast %102 : vector<1x32xf32> to vector<64x32xf32>
    %104 = arith.addf %101, %103 : vector<64x32xf32>
    %105 = arith.addf %20, %104 : vector<64x32xf32>
    %c0_55 = arith.constant 0 : index
    %c0_56 = arith.constant 0 : index
    %106 = vector.load %arg16[%c0_55, %c0_56] : memref<32x96xf32, #tpu.memory_space<vmem>>, vector<32x96xf32>
    %cst_57 = arith.constant dense<0.000000e+00> : vector<64x96xf32>
    %107 = tpu.matmul %105, %106, %cst_57 {dimension_numbers = #tpu.dot_dimension_numbers<[1], [0], [0], [1], [0, 0, 1, 1], [], []>} : vector<64x32xf32>, vector<32x96xf32>, vector<64x96xf32> -> vector<64x96xf32>
    %c0_58 = arith.constant 0 : index
    %c0_59 = arith.constant 0 : index
    %108 = vector.load %arg17[%c0_58, %c0_59] : memref<1x96xf32, #tpu.memory_space<vmem>>, vector<1x96xf32>
    %109 = vector.broadcast %108 : vector<1x96xf32> to vector<64x96xf32>
    %110 = arith.addf %107, %109 : vector<64x96xf32>
    %111 = vector.extract_strided_slice %110 {offsets = [0, 0], sizes = [64, 8], strides = [1, 1]} : vector<64x96xf32> to vector<64x8xf32>
    %112 = vector.extract_strided_slice %110 {offsets = [0, 32], sizes = [64, 8], strides = [1, 1]} : vector<64x96xf32> to vector<64x8xf32>
    %113 = vector.extract_strided_slice %110 {offsets = [0, 64], sizes = [64, 8], strides = [1, 1]} : vector<64x96xf32> to vector<64x8xf32>
    %cst_60 = arith.constant dense<0.000000e+00> : vector<64x64xf32>
    %114 = tpu.matmul %111, %112, %cst_60 {dimension_numbers = #tpu.dot_dimension_numbers<[1], [1], [0], [0], [0, 0, 1, 0], [], []>} : vector<64x8xf32>, vector<64x8xf32>, vector<64x64xf32> -> vector<64x64xf32>
    %cst_61 = arith.constant dense<0xFF800000> : vector<64xf32>
    %115 = vector.multi_reduction <maximumf>, %114, %cst_61 [1] : vector<64x64xf32> to vector<64xf32>
    %116 = vector.shape_cast %115 : vector<64xf32> to vector<64x1xf32>
    %117 = vector.broadcast %116 : vector<64x1xf32> to vector<64x64xf32>
    %118 = arith.subf %114, %117 : vector<64x64xf32>
    %119 = math.exp %118 : vector<64x64xf32>
    %cst_62 = arith.constant dense<0.000000e+00> : vector<64xf32>
    %120 = vector.multi_reduction <add>, %119, %cst_62 [1] : vector<64x64xf32> to vector<64xf32>
    %121 = vector.shape_cast %120 : vector<64xf32> to vector<64x1xf32>
    %122 = tpu.reciprocal %121 {approx = true} : vector<64x1xf32> -> vector<64x1xf32>
    %123 = vector.broadcast %122 : vector<64x1xf32> to vector<64x64xf32>
    %124 = arith.mulf %119, %123 : vector<64x64xf32>
    %cst_63 = arith.constant dense<0.000000e+00> : vector<64x8xf32>
    %125 = tpu.matmul %124, %113, %cst_63 {dimension_numbers = #tpu.dot_dimension_numbers<[1], [0], [0], [1], [0, 0, 1, 1], [], []>} : vector<64x64xf32>, vector<64x8xf32>, vector<64x8xf32> -> vector<64x8xf32>
    %126 = vector.extract_strided_slice %110 {offsets = [0, 8], sizes = [64, 8], strides = [1, 1]} : vector<64x96xf32> to vector<64x8xf32>
    %127 = vector.extract_strided_slice %110 {offsets = [0, 40], sizes = [64, 8], strides = [1, 1]} : vector<64x96xf32> to vector<64x8xf32>
    %128 = vector.extract_strided_slice %110 {offsets = [0, 72], sizes = [64, 8], strides = [1, 1]} : vector<64x96xf32> to vector<64x8xf32>
    %cst_64 = arith.constant dense<0.000000e+00> : vector<64x64xf32>
    %129 = tpu.matmul %126, %127, %cst_64 {dimension_numbers = #tpu.dot_dimension_numbers<[1], [1], [0], [0], [0, 0, 1, 0], [], []>} : vector<64x8xf32>, vector<64x8xf32>, vector<64x64xf32> -> vector<64x64xf32>
    %cst_65 = arith.constant dense<0xFF800000> : vector<64xf32>
    %130 = vector.multi_reduction <maximumf>, %129, %cst_65 [1] : vector<64x64xf32> to vector<64xf32>
    %131 = vector.shape_cast %130 : vector<64xf32> to vector<64x1xf32>
    %132 = vector.broadcast %131 : vector<64x1xf32> to vector<64x64xf32>
    %133 = arith.subf %129, %132 : vector<64x64xf32>
    %134 = math.exp %133 : vector<64x64xf32>
    %cst_66 = arith.constant dense<0.000000e+00> : vector<64xf32>
    %135 = vector.multi_reduction <add>, %134, %cst_66 [1] : vector<64x64xf32> to vector<64xf32>
    %136 = vector.shape_cast %135 : vector<64xf32> to vector<64x1xf32>
    %137 = tpu.reciprocal %136 {approx = true} : vector<64x1xf32> -> vector<64x1xf32>
    %138 = vector.broadcast %137 : vector<64x1xf32> to vector<64x64xf32>
    %139 = arith.mulf %134, %138 : vector<64x64xf32>
    %cst_67 = arith.constant dense<0.000000e+00> : vector<64x8xf32>
    %140 = tpu.matmul %139, %128, %cst_67 {dimension_numbers = #tpu.dot_dimension_numbers<[1], [0], [0], [1], [0, 0, 1, 1], [], []>} : vector<64x64xf32>, vector<64x8xf32>, vector<64x8xf32> -> vector<64x8xf32>
    %141 = vector.extract_strided_slice %110 {offsets = [0, 16], sizes = [64, 8], strides = [1, 1]} : vector<64x96xf32> to vector<64x8xf32>
    %142 = vector.extract_strided_slice %110 {offsets = [0, 48], sizes = [64, 8], strides = [1, 1]} : vector<64x96xf32> to vector<64x8xf32>
    %143 = vector.extract_strided_slice %110 {offsets = [0, 80], sizes = [64, 8], strides = [1, 1]} : vector<64x96xf32> to vector<64x8xf32>
    %cst_68 = arith.constant dense<0.000000e+00> : vector<64x64xf32>
    %144 = tpu.matmul %141, %142, %cst_68 {dimension_numbers = #tpu.dot_dimension_numbers<[1], [1], [0], [0], [0, 0, 1, 0], [], []>} : vector<64x8xf32>, vector<64x8xf32>, vector<64x64xf32> -> vector<64x64xf32>
    %cst_69 = arith.constant dense<0xFF800000> : vector<64xf32>
    %145 = vector.multi_reduction <maximumf>, %144, %cst_69 [1] : vector<64x64xf32> to vector<64xf32>
    %146 = vector.shape_cast %145 : vector<64xf32> to vector<64x1xf32>
    %147 = vector.broadcast %146 : vector<64x1xf32> to vector<64x64xf32>
    %148 = arith.subf %144, %147 : vector<64x64xf32>
    %149 = math.exp %148 : vector<64x64xf32>
    %cst_70 = arith.constant dense<0.000000e+00> : vector<64xf32>
    %150 = vector.multi_reduction <add>, %149, %cst_70 [1] : vector<64x64xf32> to vector<64xf32>
    %151 = vector.shape_cast %150 : vector<64xf32> to vector<64x1xf32>
    %152 = tpu.reciprocal %151 {approx = true} : vector<64x1xf32> -> vector<64x1xf32>
    %153 = vector.broadcast %152 : vector<64x1xf32> to vector<64x64xf32>
    %154 = arith.mulf %149, %153 : vector<64x64xf32>
    %cst_71 = arith.constant dense<0.000000e+00> : vector<64x8xf32>
    %155 = tpu.matmul %154, %143, %cst_71 {dimension_numbers = #tpu.dot_dimension_numbers<[1], [0], [0], [1], [0, 0, 1, 1], [], []>} : vector<64x64xf32>, vector<64x8xf32>, vector<64x8xf32> -> vector<64x8xf32>
    %156 = vector.extract_strided_slice %110 {offsets = [0, 24], sizes = [64, 8], strides = [1, 1]} : vector<64x96xf32> to vector<64x8xf32>
    %157 = vector.extract_strided_slice %110 {offsets = [0, 56], sizes = [64, 8], strides = [1, 1]} : vector<64x96xf32> to vector<64x8xf32>
    %158 = vector.extract_strided_slice %110 {offsets = [0, 88], sizes = [64, 8], strides = [1, 1]} : vector<64x96xf32> to vector<64x8xf32>
    %cst_72 = arith.constant dense<0.000000e+00> : vector<64x64xf32>
    %159 = tpu.matmul %156, %157, %cst_72 {dimension_numbers = #tpu.dot_dimension_numbers<[1], [1], [0], [0], [0, 0, 1, 0], [], []>} : vector<64x8xf32>, vector<64x8xf32>, vector<64x64xf32> -> vector<64x64xf32>
    %cst_73 = arith.constant dense<0xFF800000> : vector<64xf32>
    %160 = vector.multi_reduction <maximumf>, %159, %cst_73 [1] : vector<64x64xf32> to vector<64xf32>
    %161 = vector.shape_cast %160 : vector<64xf32> to vector<64x1xf32>
    %162 = vector.broadcast %161 : vector<64x1xf32> to vector<64x64xf32>
    %163 = arith.subf %159, %162 : vector<64x64xf32>
    %164 = math.exp %163 : vector<64x64xf32>
    %cst_74 = arith.constant dense<0.000000e+00> : vector<64xf32>
    %165 = vector.multi_reduction <add>, %164, %cst_74 [1] : vector<64x64xf32> to vector<64xf32>
    %166 = vector.shape_cast %165 : vector<64xf32> to vector<64x1xf32>
    %167 = tpu.reciprocal %166 {approx = true} : vector<64x1xf32> -> vector<64x1xf32>
    %168 = vector.broadcast %167 : vector<64x1xf32> to vector<64x64xf32>
    %169 = arith.mulf %164, %168 : vector<64x64xf32>
    %cst_75 = arith.constant dense<0.000000e+00> : vector<64x8xf32>
    %170 = tpu.matmul %169, %158, %cst_75 {dimension_numbers = #tpu.dot_dimension_numbers<[1], [0], [0], [1], [0, 0, 1, 1], [], []>} : vector<64x64xf32>, vector<64x8xf32>, vector<64x8xf32> -> vector<64x8xf32>
    %171 = tpu.concatenate %125, %140, %155, %170 in 1 : vector<64x8xf32>, vector<64x8xf32>, vector<64x8xf32>, vector<64x8xf32> -> vector<64x32xf32>
    %c0_76 = arith.constant 0 : index
    %c0_77 = arith.constant 0 : index
    %172 = vector.load %arg18[%c0_76, %c0_77] : memref<32x32xf32, #tpu.memory_space<vmem>>, vector<32x32xf32>
    %cst_78 = arith.constant dense<0.000000e+00> : vector<64x32xf32>
    %173 = tpu.matmul %171, %172, %cst_78 {dimension_numbers = #tpu.dot_dimension_numbers<[1], [0], [0], [1], [0, 0, 1, 1], [], []>} : vector<64x32xf32>, vector<32x32xf32>, vector<64x32xf32> -> vector<64x32xf32>
    %c0_79 = arith.constant 0 : index
    %c0_80 = arith.constant 0 : index
    %174 = vector.load %arg19[%c0_79, %c0_80] : memref<1x32xf32, #tpu.memory_space<vmem>>, vector<1x32xf32>
    %175 = vector.broadcast %174 : vector<1x32xf32> to vector<64x32xf32>
    %176 = arith.addf %173, %175 : vector<64x32xf32>
    %177 = tpu.concatenate %105, %176 in 1 : vector<64x32xf32>, vector<64x32xf32> -> vector<64x64xf32>
    %c0_81 = arith.constant 0 : index
    %c0_82 = arith.constant 0 : index
    %178 = vector.load %arg20[%c0_81, %c0_82] : memref<64x64xf32, #tpu.memory_space<vmem>>, vector<64x64xf32>
    %cst_83 = arith.constant dense<0.000000e+00> : vector<64x64xf32>
    %179 = tpu.matmul %177, %178, %cst_83 {dimension_numbers = #tpu.dot_dimension_numbers<[1], [0], [0], [1], [0, 0, 1, 1], [], []>} : vector<64x64xf32>, vector<64x64xf32>, vector<64x64xf32> -> vector<64x64xf32>
    %c0_84 = arith.constant 0 : index
    %c0_85 = arith.constant 0 : index
    %180 = vector.load %arg21[%c0_84, %c0_85] : memref<1x64xf32, #tpu.memory_space<vmem>>, vector<1x64xf32>
    %181 = vector.broadcast %180 : vector<1x64xf32> to vector<64x64xf32>
    %182 = arith.addf %179, %181 : vector<64x64xf32>
    %cst_86 = arith.constant 0.000000e+00 : f32
    %183 = vector.broadcast %cst_86 : f32 to vector<64x64xf32>
    %184 = arith.maximumf %182, %183 : vector<64x64xf32>
    %c0_87 = arith.constant 0 : index
    %c0_88 = arith.constant 0 : index
    %185 = vector.load %arg22[%c0_87, %c0_88] : memref<64x32xf32, #tpu.memory_space<vmem>>, vector<64x32xf32>
    %cst_89 = arith.constant dense<0.000000e+00> : vector<64x32xf32>
    %186 = tpu.matmul %184, %185, %cst_89 {dimension_numbers = #tpu.dot_dimension_numbers<[1], [0], [0], [1], [0, 0, 1, 1], [], []>} : vector<64x64xf32>, vector<64x32xf32>, vector<64x32xf32> -> vector<64x32xf32>
    %c0_90 = arith.constant 0 : index
    %c0_91 = arith.constant 0 : index
    %187 = vector.load %arg23[%c0_90, %c0_91] : memref<1x32xf32, #tpu.memory_space<vmem>>, vector<1x32xf32>
    %188 = vector.broadcast %187 : vector<1x32xf32> to vector<64x32xf32>
    %189 = arith.addf %186, %188 : vector<64x32xf32>
    %190 = arith.addf %105, %189 : vector<64x32xf32>
    %c0_92 = arith.constant 0 : index
    %c0_93 = arith.constant 0 : index
    %191 = vector.load %arg24[%c0_92, %c0_93] : memref<32x32xf32, #tpu.memory_space<vmem>>, vector<32x32xf32>
    %cst_94 = arith.constant dense<0.000000e+00> : vector<64x32xf32>
    %192 = tpu.matmul %190, %191, %cst_94 {dimension_numbers = #tpu.dot_dimension_numbers<[1], [0], [0], [1], [0, 0, 1, 1], [], []>} : vector<64x32xf32>, vector<32x32xf32>, vector<64x32xf32> -> vector<64x32xf32>
    %c0_95 = arith.constant 0 : index
    %c0_96 = arith.constant 0 : index
    %193 = vector.load %arg25[%c0_95, %c0_96] : memref<1x32xf32, #tpu.memory_space<vmem>>, vector<1x32xf32>
    %194 = vector.broadcast %193 : vector<1x32xf32> to vector<64x32xf32>
    %195 = arith.addf %192, %194 : vector<64x32xf32>
    %cst_97 = arith.constant 0.000000e+00 : f32
    %196 = vector.broadcast %cst_97 : f32 to vector<64x32xf32>
    %197 = arith.maximumf %195, %196 : vector<64x32xf32>
    %c0_98 = arith.constant 0 : index
    %c0_99 = arith.constant 0 : index
    %198 = vector.load %arg26[%c0_98, %c0_99] : memref<32x32xf32, #tpu.memory_space<vmem>>, vector<32x32xf32>
    %cst_100 = arith.constant dense<0.000000e+00> : vector<64x32xf32>
    %199 = tpu.matmul %197, %198, %cst_100 {dimension_numbers = #tpu.dot_dimension_numbers<[1], [0], [0], [1], [0, 0, 1, 1], [], []>} : vector<64x32xf32>, vector<32x32xf32>, vector<64x32xf32> -> vector<64x32xf32>
    %c0_101 = arith.constant 0 : index
    %c0_102 = arith.constant 0 : index
    %200 = vector.load %arg27[%c0_101, %c0_102] : memref<1x32xf32, #tpu.memory_space<vmem>>, vector<1x32xf32>
    %201 = vector.broadcast %200 : vector<1x32xf32> to vector<64x32xf32>
    %202 = arith.addf %199, %201 : vector<64x32xf32>
    %cst_103 = arith.constant 0.000000e+00 : f32
    %203 = vector.broadcast %cst_103 : f32 to vector<64x32xf32>
    %204 = arith.maximumf %202, %203 : vector<64x32xf32>
    %205 = tpu.transpose %204, [1, 0] : vector<64x32xf32> -> vector<32x64xf32>
    %c0_104 = arith.constant 0 : index
    %c0_105 = arith.constant 0 : index
    %c0_106 = arith.constant 0 : index
    %206 = vector.load %arg34[%c0_104, %c0_105, %c0_106] : memref<1x32x64xf32, #tpu.memory_space<vmem>>, vector<1x32x64xf32>
    %207 = vector.shape_cast %206 : vector<1x32x64xf32> to vector<32x64xf32>
    %208 = vector.shape_cast %205 : vector<32x64xf32> to vector<1x32x64xf32>
    tpu.vector_store %arg34[%c0_104, %c0_105, %c0_106], %208 {strides = array<i32>} : memref<1x32x64xf32, #tpu.memory_space<vmem>>, vector<1x32x64xf32>,
    %c0_107 = arith.constant 0 : index
    %c0_108 = arith.constant 0 : index
    %209 = vector.load %arg28[%c0_107, %c0_108] : memref<32x32xf32, #tpu.memory_space<vmem>>, vector<32x32xf32>
    %cst_109 = arith.constant dense<0.000000e+00> : vector<64x32xf32>
    %210 = tpu.matmul %190, %209, %cst_109 {dimension_numbers = #tpu.dot_dimension_numbers<[1], [0], [0], [1], [0, 0, 1, 1], [], []>} : vector<64x32xf32>, vector<32x32xf32>, vector<64x32xf32> -> vector<64x32xf32>
    %c0_110 = arith.constant 0 : index
    %c0_111 = arith.constant 0 : index
    %211 = vector.load %arg29[%c0_110, %c0_111] : memref<1x32xf32, #tpu.memory_space<vmem>>, vector<1x32xf32>
    %212 = vector.broadcast %211 : vector<1x32xf32> to vector<64x32xf32>
    %213 = arith.addf %210, %212 : vector<64x32xf32>
    %cst_112 = arith.constant 0.000000e+00 : f32
    %214 = vector.broadcast %cst_112 : f32 to vector<64x32xf32>
    %215 = arith.maximumf %213, %214 : vector<64x32xf32>
    %c0_113 = arith.constant 0 : index
    %c0_114 = arith.constant 0 : index
    %216 = vector.load %arg30[%c0_113, %c0_114] : memref<32x32xf32, #tpu.memory_space<vmem>>, vector<32x32xf32>
    %cst_115 = arith.constant dense<0.000000e+00> : vector<64x32xf32>
    %217 = tpu.matmul %215, %216, %cst_115 {dimension_numbers = #tpu.dot_dimension_numbers<[1], [0], [0], [1], [0, 0, 1, 1], [], []>} : vector<64x32xf32>, vector<32x32xf32>, vector<64x32xf32> -> vector<64x32xf32>
    %c0_116 = arith.constant 0 : index
    %c0_117 = arith.constant 0 : index
    %218 = vector.load %arg31[%c0_116, %c0_117] : memref<1x32xf32, #tpu.memory_space<vmem>>, vector<1x32xf32>
    %219 = vector.broadcast %218 : vector<1x32xf32> to vector<64x32xf32>
    %220 = arith.addf %217, %219 : vector<64x32xf32>
    %cst_118 = arith.constant 0.000000e+00 : f32
    %221 = vector.broadcast %cst_118 : f32 to vector<64x32xf32>
    %222 = arith.maximumf %220, %221 : vector<64x32xf32>
    %c0_119 = arith.constant 0 : index
    %c0_120 = arith.constant 0 : index
    %223 = vector.load %arg32[%c0_119, %c0_120] : memref<32x2xf32, #tpu.memory_space<vmem>>, vector<32x2xf32>
    %cst_121 = arith.constant dense<0.000000e+00> : vector<64x2xf32>
    %224 = tpu.matmul %222, %223, %cst_121 {dimension_numbers = #tpu.dot_dimension_numbers<[1], [0], [0], [1], [0, 0, 1, 1], [], []>} : vector<64x32xf32>, vector<32x2xf32>, vector<64x2xf32> -> vector<64x2xf32>
    %c0_122 = arith.constant 0 : index
    %c0_123 = arith.constant 0 : index
    %225 = vector.load %arg33[%c0_122, %c0_123] : memref<1x2xf32, #tpu.memory_space<vmem>>, vector<1x2xf32>
    %226 = vector.broadcast %225 : vector<1x2xf32> to vector<64x2xf32>
    %227 = arith.addf %224, %226 : vector<64x2xf32>
    %cst_124 = arith.constant -1.000000e+00 : f32
    %cst_125 = arith.constant 1.000000e+00 : f32
    %228 = vector.broadcast %cst_124 : f32 to vector<64x2xf32>
    %229 = arith.maximumf %228, %227 : vector<64x2xf32>
    %230 = vector.broadcast %cst_125 : f32 to vector<64x2xf32>
    %231 = arith.minimumf %230, %229 : vector<64x2xf32>
    %c0_126 = arith.constant 0 : index
    %c0_127 = arith.constant 0 : index
    %c0_128 = arith.constant 0 : index
    %232 = vector.load %arg35[%c0_126, %c0_127, %c0_128] : memref<1x64x2xf32, #tpu.memory_space<vmem>>, vector<1x64x2xf32>
    %233 = vector.shape_cast %232 : vector<1x64x2xf32> to vector<64x2xf32>
    %234 = vector.shape_cast %231 : vector<64x2xf32> to vector<1x64x2xf32>
    tpu.vector_store %arg35[%c0_126, %c0_127, %c0_128], %234 {strides = array<i32>} : memref<1x64x2xf32, #tpu.memory_space<vmem>>, vector<1x64x2xf32>,
    return
  }
  func.func @transform_0(%arg0: i32) -> (i32, i32, i32) {
    %c0_i32 = arith.constant 0 : i32
    %c0_i32_0 = arith.constant 0 : i32
    %c0_i32_1 = arith.constant 0 : i32
    return %arg0, %c0_i32, %c0_i32_0 : i32, i32, i32
  }
  func.func @transform_1(%arg0: i32) -> (i32, i32) {
    %c0_i32 = arith.constant 0 : i32
    %c0_i32_0 = arith.constant 0 : i32
    %c0_i32_1 = arith.constant 0 : i32
    return %c0_i32, %c0_i32_0 : i32, i32
  }
  func.func @transform_2(%arg0: i32) -> (i32, i32) {
    %c0_i32 = arith.constant 0 : i32
    %c0_i32_0 = arith.constant 0 : i32
    %c0_i32_1 = arith.constant 0 : i32
    return %c0_i32, %c0_i32_0 : i32, i32
  }
  func.func @transform_3(%arg0: i32) -> (i32, i32) {
    %c0_i32 = arith.constant 0 : i32
    %c0_i32_0 = arith.constant 0 : i32
    %c0_i32_1 = arith.constant 0 : i32
    return %c0_i32, %c0_i32_0 : i32, i32
  }
  func.func @transform_4(%arg0: i32) -> (i32, i32) {
    %c0_i32 = arith.constant 0 : i32
    %c0_i32_0 = arith.constant 0 : i32
    %c0_i32_1 = arith.constant 0 : i32
    return %c0_i32, %c0_i32_0 : i32, i32
  }
  func.func @transform_5(%arg0: i32) -> (i32, i32) {
    %c0_i32 = arith.constant 0 : i32
    %c0_i32_0 = arith.constant 0 : i32
    %c0_i32_1 = arith.constant 0 : i32
    return %c0_i32, %c0_i32_0 : i32, i32
  }
  func.func @transform_6(%arg0: i32) -> (i32, i32) {
    %c0_i32 = arith.constant 0 : i32
    %c0_i32_0 = arith.constant 0 : i32
    %c0_i32_1 = arith.constant 0 : i32
    return %c0_i32, %c0_i32_0 : i32, i32
  }
  func.func @transform_7(%arg0: i32) -> (i32, i32) {
    %c0_i32 = arith.constant 0 : i32
    %c0_i32_0 = arith.constant 0 : i32
    %c0_i32_1 = arith.constant 0 : i32
    return %c0_i32, %c0_i32_0 : i32, i32
  }
  func.func @transform_8(%arg0: i32) -> (i32, i32) {
    %c0_i32 = arith.constant 0 : i32
    %c0_i32_0 = arith.constant 0 : i32
    %c0_i32_1 = arith.constant 0 : i32
    return %c0_i32, %c0_i32_0 : i32, i32
  }
  func.func @transform_9(%arg0: i32) -> (i32, i32) {
    %c0_i32 = arith.constant 0 : i32
    %c0_i32_0 = arith.constant 0 : i32
    %c0_i32_1 = arith.constant 0 : i32
    return %c0_i32, %c0_i32_0 : i32, i32
  }
  func.func @transform_10(%arg0: i32) -> (i32, i32) {
    %c0_i32 = arith.constant 0 : i32
    %c0_i32_0 = arith.constant 0 : i32
    %c0_i32_1 = arith.constant 0 : i32
    return %c0_i32, %c0_i32_0 : i32, i32
  }
  func.func @transform_11(%arg0: i32) -> (i32, i32) {
    %c0_i32 = arith.constant 0 : i32
    %c0_i32_0 = arith.constant 0 : i32
    %c0_i32_1 = arith.constant 0 : i32
    return %c0_i32, %c0_i32_0 : i32, i32
  }
  func.func @transform_12(%arg0: i32) -> (i32, i32) {
    %c0_i32 = arith.constant 0 : i32
    %c0_i32_0 = arith.constant 0 : i32
    %c0_i32_1 = arith.constant 0 : i32
    return %c0_i32, %c0_i32_0 : i32, i32
  }
  func.func @transform_13(%arg0: i32) -> (i32, i32) {
    %c0_i32 = arith.constant 0 : i32
    %c0_i32_0 = arith.constant 0 : i32
    %c0_i32_1 = arith.constant 0 : i32
    return %c0_i32, %c0_i32_0 : i32, i32
  }
  func.func @transform_14(%arg0: i32) -> (i32, i32) {
    %c0_i32 = arith.constant 0 : i32
    %c0_i32_0 = arith.constant 0 : i32
    %c0_i32_1 = arith.constant 0 : i32
    return %c0_i32, %c0_i32_0 : i32, i32
  }
  func.func @transform_15(%arg0: i32) -> (i32, i32) {
    %c0_i32 = arith.constant 0 : i32
    %c0_i32_0 = arith.constant 0 : i32
    %c0_i32_1 = arith.constant 0 : i32
    return %c0_i32, %c0_i32_0 : i32, i32
  }
  func.func @transform_16(%arg0: i32) -> (i32, i32) {
    %c0_i32 = arith.constant 0 : i32
    %c0_i32_0 = arith.constant 0 : i32
    %c0_i32_1 = arith.constant 0 : i32
    return %c0_i32, %c0_i32_0 : i32, i32
  }
  func.func @transform_17(%arg0: i32) -> (i32, i32) {
    %c0_i32 = arith.constant 0 : i32
    %c0_i32_0 = arith.constant 0 : i32
    %c0_i32_1 = arith.constant 0 : i32
    return %c0_i32, %c0_i32_0 : i32, i32
  }
  func.func @transform_18(%arg0: i32) -> (i32, i32) {
    %c0_i32 = arith.constant 0 : i32
    %c0_i32_0 = arith.constant 0 : i32
    %c0_i32_1 = arith.constant 0 : i32
    return %c0_i32, %c0_i32_0 : i32, i32
  }
  func.func @transform_19(%arg0: i32) -> (i32, i32) {
    %c0_i32 = arith.constant 0 : i32
    %c0_i32_0 = arith.constant 0 : i32
    %c0_i32_1 = arith.constant 0 : i32
    return %c0_i32, %c0_i32_0 : i32, i32
  }
  func.func @transform_20(%arg0: i32) -> (i32, i32) {
    %c0_i32 = arith.constant 0 : i32
    %c0_i32_0 = arith.constant 0 : i32
    %c0_i32_1 = arith.constant 0 : i32
    return %c0_i32, %c0_i32_0 : i32, i32
  }
  func.func @transform_21(%arg0: i32) -> (i32, i32) {
    %c0_i32 = arith.constant 0 : i32
    %c0_i32_0 = arith.constant 0 : i32
    %c0_i32_1 = arith.constant 0 : i32
    return %c0_i32, %c0_i32_0 : i32, i32
  }
  func.func @transform_22(%arg0: i32) -> (i32, i32) {
    %c0_i32 = arith.constant 0 : i32
    %c0_i32_0 = arith.constant 0 : i32
    %c0_i32_1 = arith.constant 0 : i32
    return %c0_i32, %c0_i32_0 : i32, i32
  }
  func.func @transform_23(%arg0: i32) -> (i32, i32) {
    %c0_i32 = arith.constant 0 : i32
    %c0_i32_0 = arith.constant 0 : i32
    %c0_i32_1 = arith.constant 0 : i32
    return %c0_i32, %c0_i32_0 : i32, i32
  }
  func.func @transform_24(%arg0: i32) -> (i32, i32) {
    %c0_i32 = arith.constant 0 : i32
    %c0_i32_0 = arith.constant 0 : i32
    %c0_i32_1 = arith.constant 0 : i32
    return %c0_i32, %c0_i32_0 : i32, i32
  }
  func.func @transform_25(%arg0: i32) -> (i32, i32) {
    %c0_i32 = arith.constant 0 : i32
    %c0_i32_0 = arith.constant 0 : i32
    %c0_i32_1 = arith.constant 0 : i32
    return %c0_i32, %c0_i32_0 : i32, i32
  }
  func.func @transform_26(%arg0: i32) -> (i32, i32) {
    %c0_i32 = arith.constant 0 : i32
    %c0_i32_0 = arith.constant 0 : i32
    %c0_i32_1 = arith.constant 0 : i32
    return %c0_i32, %c0_i32_0 : i32, i32
  }
  func.func @transform_27(%arg0: i32) -> (i32, i32) {
    %c0_i32 = arith.constant 0 : i32
    %c0_i32_0 = arith.constant 0 : i32
    %c0_i32_1 = arith.constant 0 : i32
    return %c0_i32, %c0_i32_0 : i32, i32
  }
  func.func @transform_28(%arg0: i32) -> (i32, i32) {
    %c0_i32 = arith.constant 0 : i32
    %c0_i32_0 = arith.constant 0 : i32
    %c0_i32_1 = arith.constant 0 : i32
    return %c0_i32, %c0_i32_0 : i32, i32
  }
  func.func @transform_29(%arg0: i32) -> (i32, i32) {
    %c0_i32 = arith.constant 0 : i32
    %c0_i32_0 = arith.constant 0 : i32
    %c0_i32_1 = arith.constant 0 : i32
    return %c0_i32, %c0_i32_0 : i32, i32
  }
  func.func @transform_30(%arg0: i32) -> (i32, i32) {
    %c0_i32 = arith.constant 0 : i32
    %c0_i32_0 = arith.constant 0 : i32
    %c0_i32_1 = arith.constant 0 : i32
    return %c0_i32, %c0_i32_0 : i32, i32
  }
  func.func @transform_31(%arg0: i32) -> (i32, i32) {
    %c0_i32 = arith.constant 0 : i32
    %c0_i32_0 = arith.constant 0 : i32
    %c0_i32_1 = arith.constant 0 : i32
    return %c0_i32, %c0_i32_0 : i32, i32
  }
  func.func @transform_32(%arg0: i32) -> (i32, i32) {
    %c0_i32 = arith.constant 0 : i32
    %c0_i32_0 = arith.constant 0 : i32
    %c0_i32_1 = arith.constant 0 : i32
    return %c0_i32, %c0_i32_0 : i32, i32
  }
  func.func @transform_33(%arg0: i32) -> (i32, i32, i32) {
    %c0_i32 = arith.constant 0 : i32
    %c0_i32_0 = arith.constant 0 : i32
    %c0_i32_1 = arith.constant 0 : i32
    return %arg0, %c0_i32, %c0_i32_0 : i32, i32, i32
  }
  func.func @transform_34(%arg0: i32) -> (i32, i32, i32) {
    %c0_i32 = arith.constant 0 : i32
    %c0_i32_0 = arith.constant 0 : i32
    %c0_i32_1 = arith.constant 0 : i32
    return %arg0, %c0_i32, %c0_i32_0 : i32, i32, i32
  }
}

</mosaic_0001>

<bundles_post_ra>
// kernel: _lambda_.1
= control target key start
LH: loop header
LB: loop body
LE: loop exit
PB: predicated region body
PF: predicated region fallthrough
CT: control target
= control target key end

     0   :  { %s9188_s6 = smov 1   ;;  %s9189_s10 = smov 2   ;;  %s11205_s0 = inlined_call_operand.smem [shape: u32[35], index: -1, kind: input, shape index: {}] }
   0x1   :  { %s9247_s5 = sld [smem:[%s11205_s0]]   ;;  %s9190_s14 = smov 3  }
   0x2   :  { %s9252_s9 = sld [smem:[%s11205_s0 + %s9188_s6]]   ;;  %s9191_s18 = smov 4  }
   0x3   :  { %s9257_s13 = sld [smem:[%s11205_s0 + %s9189_s10]]   ;;  %s9192_s22 = smov 5  }
   0x4   :  { %s9262_s17 = sld [smem:[%s11205_s0 + %s9190_s14]]   ;;  %s9193_s26 = smov 6  }
   0x5   :  { %s9267_s21 = sld [smem:[%s11205_s0 + %s9191_s18]]   ;;  %s9194_s30 = smov 7  }
   0x6   :  { %s9272_s25 = sld [smem:[%s11205_s0 + %s9192_s22]]   ;;  %s9195_s4 = smov 8  }
   0x7   :  { %11253 = sst [smem:[#allocation5_spill]] %s9247_s5  ;;  %s9196_s10 = smov 9  }
   0x8   :  { %11254 = sst [smem:[#allocation6_spill]] %s9252_s9  ;;  %s9197_s15 = smov 10  }
   0x9   :  { %11255 = sst [smem:[#allocation7_spill]] %s9257_s13  ;;  %s9198_s20 = smov 11  }
   0xa   :  { %11256 = sst [smem:[#allocation8_spill]] %s9262_s17  ;;  %s9200_s1 = smov 13  }
   0xb   :  { %s9277_s29 = sld [smem:[%s11205_s0 + %s9193_s26]]   ;;  %s9199_s26 = smov 12  }
   0xc   :  { %s9282_s3 = sld [smem:[%s11205_s0 + %s9194_s30]]   ;;  %s9201_s7 = smov 14  }
   0xd   :  { %s9287_s8 = sld [smem:[%s11205_s0 + %s9195_s4]]   ;;  %s9203_s22 = smov 16  }
   0xe   :  { %s9292_s14 = sld [smem:[%s11205_s0 + %s9196_s10]]   ;;  %s9204_s28 = smov 17  }
   0xf   :  { %s9297_s19 = sld [smem:[%s11205_s0 + %s9197_s15]]   ;;  %s9202_s15 = smov 15  }
  0x10   :  { %s9302_s24 = sld [smem:[%s11205_s0 + %s9198_s20]]  }
  0x11   :  { %s9307_s30 = sld [smem:[%s11205_s0 + %s9199_s26]]  }
  0x12   :  { %11257 = sst [smem:[#allocation9_spill]] %s9282_s3 }
  0x13   :  { %11258 = sst [smem:[#allocation10_spill]] %s9287_s8 }
  0x14   :  { %11259 = sst [smem:[#allocation11_spill]] %s9292_s14 }
  0x15   :  { %11260 = sst [smem:[#allocation12_spill]] %s9297_s19 }
  0x16   :  { %s9312_s6 = sld [smem:[%s11205_s0 + %s9200_s1]]  }
  0x17   :  { %11261 = sst [smem:[#allocation13_spill]] %s9307_s30 }
  0x18   :  { %s9317_s12 = sld [smem:[%s11205_s0 + %s9201_s7]]   ;;  %s9205_s7 = smov 18  }
  0x19   :  { %s9322_s20 = sld [smem:[%s11205_s0 + %s9202_s15]]   ;;  %s9206_s15 = smov 19  }
  0x1a   :  { %s9327_s27 = sld [smem:[%s11205_s0 + %s9203_s22]]   ;;  %s9207_s22 = smov 20  }
  0x1b   :  { %s9332_s4 = sld [smem:[%s11205_s0 + %s9204_s28]]   ;;  %s9208_s28 = smov 21  }
  0x1c   :  { %11262 = sst [smem:[#allocation14_spill]] %s9312_s6 }
  0x1d   :  { %s9342_s30 = sld [smem:[%s11205_s0 + %s9206_s15]]   ;;  %s9210_s15 = smov 23  }
  0x1e   :  { %11263 = sst [smem:[#allocation15_spill]] %s9317_s12 }
  0x1f   :  { %s9337_s12 = sld [smem:[%s11205_s0 + %s9205_s7]]   ;;  %s9209_s7 = smov 22  }
  0x20   :  { %11264 = sst [smem:[#allocation16_spill]] %s9327_s27 }
  0x21   :  { %11265 = sst [smem:[#allocation17_spill]] %s9332_s4 }
  0x22   :  { %s9347_s27 = sld [smem:[%s11205_s0 + %s9207_s22]]   ;;  %s9211_s22 = smov 24  }
  0x23   :  { %11267 = sst [smem:[#allocation19_spill]] %s9342_s30 }
  0x24   :  { %s9352_s4 = sld [smem:[%s11205_s0 + %s9208_s28]]   ;;  %s9212_s28 = smov 25  }
  0x25   :  { %11266 = sst [smem:[#allocation18_spill]] %s9337_s12 }
  0x26   :  { %s9357_s12 = sld [smem:[%s11205_s0 + %s9209_s7]]   ;;  %s9213_s7 = smov 26  }
  0x27   :  { %s9362_s30 = sld [smem:[%s11205_s0 + %s9210_s15]]   ;;  %s9214_s15 = smov 27  }
  0x28   :  { %11268 = sst [smem:[#allocation20_spill]] %s9347_s27 }
  0x29   :  { %s9367_s27 = sld [smem:[%s11205_s0 + %s9211_s22]]   ;;  %s9215_s22 = smov 28  }
  0x2a   :  { %11269 = sst [smem:[#allocation21_spill]] %s9352_s4 }
  0x2b   :  { %s9372_s4 = sld [smem:[%s11205_s0 + %s9212_s28]]   ;;  %s9216_s28 = smov 29  }
  0x2c   :  { %11270 = sst [smem:[#allocation22_spill]] %s9357_s12 }
  0x2d   :  { %11271 = sst [smem:[#allocation23_spill]] %s9362_s30 }
  0x2e   :  { %s9377_s12 = sld [smem:[%s11205_s0 + %s9213_s7]]   ;;  %s9217_s7 = smov 30  }
  0x2f   :  { %11272 = sst [smem:[#allocation24_spill]] %s9367_s27 }
  0x30   :  { %s9382_s30 = sld [smem:[%s11205_s0 + %s9214_s15]]   ;;  %s9218_s15 = smov 31  }
  0x31   :  { %11273 = sst [smem:[#allocation25_spill]] %s9372_s4 }
  0x32   :  { %s9387_s27 = sld [smem:[%s11205_s0 + %s9215_s22]]   ;;  %s9219_s22 = smov 32  }
  0x33   :  { %s9392_s4 = sld [smem:[%s11205_s0 + %s9216_s28]]   ;;  %s9220_s28 = smov 33  }
  0x34   :  { %11274 = sst [smem:[#allocation26_spill]] %s9377_s12 }
  0x35   :  { %s9397_s12 = sld [smem:[%s11205_s0 + %s9217_s7]]   ;;  %s9221_s7 = smov 34  }
  0x36   :  { %11275 = sst [smem:[#allocation27_spill]] %s9382_s30 }
  0x37   :  { %s9402_s30 = sld [smem:[%s11205_s0 + %s9218_s15]]  }
  0x38   :  { %11276 = sst [smem:[#allocation28_spill]] %s9387_s27 }
  0x39   :  { %11277 = sst [smem:[#allocation29_spill]] %s9392_s4 }
  0x3a   :  { %s9407_s27 = sld [smem:[%s11205_s0 + %s9219_s22]]  }
  0x3b   :  { %11278 = sst [smem:[#allocation30_spill]] %s9397_s12 }
  0x3c   :  { %s9412_s4 = sld [smem:[%s11205_s0 + %s9220_s28]]  }
  0x3d   :  { %s9417_s12 = sld [smem:[%s11205_s0 + %s9221_s7]]  }
  0x3e   :  { %75 = vsyncpa [#allocation3], 0 }
  0x3f   :  { %77 = vsyncpa [#allocation3 + $0x1], 0  ;;  %s9419_s15 = smov 0   ;;  %s9421_s16 = smov 0  }
  0x40   :  { %s9423_s18 = smov 0   ;;  %s9425_s22 = smov 0  }
  0x41 LB: > { %s11279_s17 = sld [smem:[#allocation8_spill]]  ;;  %s9440_s0 = sadd.s32 4294967295, %s9186_s22   ;;  %s9186_s22 = sphi %s9425_s22, %s11326_s22   ;;  %s9182_s18 = sphi %s9423_s18, %s11325_s18   ;;  %s9178_s16 = sphi %s9421_s16, %s11324_s16   ;;  %s9174_s15 = sphi %s9419_s15, %s11323_s15  }
  0x42   : > { %s11280_s14 = sld [smem:[#allocation11_spill]]  ;;  %s7164_s23 = sadd.s32 4294967294, %s9186_s22  }
  0x43   : > { %s11281_s6 = sld [smem:[#allocation14_spill]]  ;;  %s9444_s26 = sadd.s32 1, %s9186_s22  }
  0x44   : > { %s11282_s3 = sld [smem:[#allocation9_spill]]  ;;  %s788_s28 = sadd.s32 1, %s9182_s18 }
  0x45   : > { %s785_s1 = ssub.s32 %s9186_s22, %s9444_s26  ;;  %p798_p0 = scmp.ne.s32.totalorder %s9182_s18, %s9178_s16 }
  0x46   : > { %p786_p1 = scmp.eq.s32.totalorder %s785_s1, 0  ;;  %p799_p2 = scmp.eq.s32.totalorder %s9440_s0, 1 }
  0x47   : > { %p804_p3 = scmp.ne.s32.totalorder %s9178_s16, %s9174_s15  ;;  %p805_p4 = scmp.eq.s32.totalorder %s7164_s23, 1 }
  0x48   : > { %s9455_s2 = scalar_select %p786_p1, %s9182_s18, %s788_s28  }
  0x49   : > { %p9457_p5 = por %p799_p2, %p798_p0  ;;  %p9461_p6 = por %p805_p4, %p804_p3 }
  0x4a   : > { %p7167_p7 = scmp.ge.s32.totalorder %s9186_s22, 1  ;;  %p953_p8 = scmp.lt.s32.totalorder %s9186_s22, 3 }
  0x4c   : > { %p954_p9 = pnand %p7167_p7, %p953_p8 }
  0x4d   : > { %s11285_s9 = sld [smem:[#allocation6_spill]] (!%p954_p9)  ;;  %p1044_p10 = scmp.lt.s32.totalorder (!%p954_p9), %s9440_s0, 1 }
  0x4e   : > { %957 = sbr.rel (%p954_p9) target bundleno = 8631 (0x21b7), region = 152  ;;  %s11286_s5 = sld [smem:[#allocation5_spill]] (!%p954_p9) }
  0x4f   : > { %s11287_s13 = sld [smem:[#allocation7_spill]] (!%p954_p9)  ;;  %s11232_s1 = smov (!%p954_p9), 96  }
  0x50   : > { %s11288_s8 = sld [smem:[#allocation10_spill]] (!%p954_p9) }
  0x51   : > { %s11289_s19 = sld [smem:[#allocation12_spill]] (!%p954_p9) }
  0x53   : > { %v1062_v0 = vld [vmem:[%s11285_s9] sm:$0xff]  ;;  %s9470_s11 = scalar_select %p1044_p10, %s9440_s0, 1  ;;  %vm1070_vm0 = vcmask 64512   ;;  %v1211_v9 = vld [vmem:[%s11279_s17 + $0x18] sm:$0xff]  ;;  %v1210_v10 = vld [vmem:[%s11279_s17 + $0x10] sm:$0xff]  ;;  %vm1219_vm1 = vcmask 261120  }
  0x54   : > { %7986 = vmatprep.subr.mxu0 %v1062_v0  ;;  %8000 = vmatprep.subr.mxu1 %v1211_v9  ;;  %v1209_v11 = vld [vmem:[%s11279_s17 + $0x8] sm:$0xff]  ;;  %v1208_v12 = vld [vmem:[%s11279_s17] sm:$0xff]  ;;  %v1360_v13 = vld [vmem:[%s9272_s25 + $0x18] sm:$0xff]  ;;  %vm1798_vm2 = vcmask 523264   ;;  %vm3374_vm3 = vcmask 130048   ;;  %vm3383_vm4 = vcmask 195584  }
  0x55   : > { %7987 = vmatpush3.msra.mxu0 %v1062_v0  ;;  %s11213_s23 = sshll.u32 %s9470_s11, 6  ;;  %8001 = vmatpush3.msra.mxu1 %v1211_v9  ;;  %v1359_v14 = vld [vmem:[%s9272_s25 + $0x10] sm:$0xff]  ;;  %v7173_v15 = vld [vmem:[%s11287_s13] ss:$0 sm:$0xff]  ;;  %v1358_v40 = vld [vmem:[%s9272_s25 + $0x8] sm:$0xff]  ;;  %s7524_s9 = sshll.u32 %s9440_s0, 9 }
  0x56   : > { %s1048_s28 = scalar_lea.vmem %s11286_s5, %s11213_s23  ;;  %8002 = vmatprep.subr.mxu1 %v1210_v10  ;;  %8020 = vmatprep.subr.mxu0 %v1360_v13  ;;  %v1357_v41 = vld [vmem:[%s9272_s25] sm:$0xff]  ;;  %v1500_v42 = vld [vmem:[%s11282_s3 + $0x18] sm:$0xff]  ;;  %v1499_v43 = vld [vmem:[%s11282_s3 + $0x10] sm:$0xff]  ;;  %s11216_s23 = smov 88  }
  0x57   : > { %v1054_v1 = vld [vmem:[%s1048_s28] sm:$0xff]  ;;  %v1055_v2 = vld [vmem:[%s1048_s28 + $0x8] sm:$0xff]  ;;  %v1056_v3 = vld [vmem:[%s1048_s28 + $0x10] sm:$0xff]  ;;  %8003 = vmatpush3.msra.mxu1 %v1210_v10  ;;  %s11310_s5 = sld [smem:[#allocation21_spill]]  ;;  %s11143_s13 = scalar_lea.hbm %s9412_s4, %s7524_s9 }
  0x58   : > { %7988 = vmatprep.mubr.msk.f32.mxu0 %vm1070_vm0, %v1054_v1  ;;  %v1057_v4 = vld [vmem:[%s1048_s28 + $0x18] sm:$0xff]  ;;  %v1058_v5 = vld [vmem:[%s1048_s28 + $0x20] sm:$0xff]  ;;  %v1059_v6 = vld [vmem:[%s1048_s28 + $0x28] sm:$0xff]  ;;  %8004 = vmatprep.subr.mxu1 %v1209_v11  ;;  %s9237_s0 = smov [#allocation2]  }
  0x59   : > { %7989 = vmatmul.mubr.msk.f32.vlgmr.msra.gmra.mxu0 %vm1070_vm0, %v1055_v2  ;;  %v1060_v7 = vld [vmem:[%s1048_s28 + $0x30] sm:$0xff]  ;;  %v1061_v8 = vld [vmem:[%s1048_s28 + $0x38] sm:$0xff]  ;;  %8005 = vmatpush3.msra.mxu1 %v1209_v11  ;;  %v1498_v44 = vld [vmem:[%s11282_s3 + $0x8] sm:$0xff]  ;;  %s11214_s28 = smov 64   ;;  %s9130_s17 = sshll.u32 %s9237_s0, 4  ;;  %s9131_s17 = int_to_ptr.vmem [resolvable:$false] %s9130_s17 }
  0x5a   : > { %7991 = vmatprep.mubr.msk.f32.mxu0 %vm1070_vm0, %v1056_v3  ;;  %8006 = vmatprep.subr.mxu1 %v1208_v12  ;;  %v7182_v45 = vld [vmem:[%s9267_s21] ss:$0 sm:$0xff] }
  0x5b   : > { %8007 = vmatpush3.msra.mxu1 %v1208_v12  ;;  %8021 = vmatpush3.msra.mxu0 %v1360_v13 }
  0x5c   : > { %8022 = vmatprep.subr.mxu0 %v1359_v14  ;;  %8040 = vmatprep.subr.mxu1 %v1500_v42 }
  0x5d   : > { %7992 = vmatmul.mubr.msk.f32.gmra.mxu0 %vm1070_vm0, %v1057_v4 }
  0x5e   : > { %7994 = vmatprep.mubr.msk.f32.mxu0 %vm1070_vm0, %v1058_v5  ;;  %8023 = vmatpush3.msra.mxu0 %v1359_v14 }
  0x5f   : > { %8024 = vmatprep.subr.mxu0 %v1358_v40 }
  0x60   : > { %8025 = vmatpush3.msra.mxu0 %v1358_v40 }
  0x61   : > { %7995 = vmatmul.mubr.msk.f32.gmra.mxu0 %vm1070_vm0, %v1059_v6  ;;  %8026 = vmatprep.subr.mxu0 %v1357_v41  ;;  %v1497_v6 = vld [vmem:[%s11282_s3] sm:$0xff]  ;;  %s11309_s3 = sld [smem:[#allocation18_spill]] }
  0x62   : > { %7997 = vmatprep.mubr.msk.f32.mxu0 %vm1070_vm0, %v1060_v7  ;;  %8027 = vmatpush3.msra.mxu0 %v1357_v41 }
  0x65   : > { %7998 = vmatmul.mubr.msk.f32.gmra.mxu0 %vm1070_vm0, %v1061_v8  ;;  %v7191_v8 = vld [vmem:[%s9277_s29] ss:$0 sm:$0xff] }
 0x119   : > { %v7990_v16 = vpop.f32.mrf.mxu0 }
 0x11a   : > { %v1167_v17 = vadd.f32 %v7990_v16, %v7173_v15 }
 0x11b   : > { %v1161_v18 = vpop.f32.mrf.mxu0 }
 0x11c   : > { %v1162_v19 = vadd.f32 %v7173_v15, %v1161_v18  ;;  %v1201_v22 = vmax.f32 %v1167_v17, 0.0 }
 0x11d   : > { %v7993_v20 = vpop.f32.mrf.mxu0 }
 0x11e   : > { %v1200_v21 = vmax.f32 %v1162_v19, 0.0  ;;  %v1177_v23 = vadd.f32 %v7993_v20, %v7173_v15 }
 0x11f   : > { %v1171_v24 = vpop.f32.mrf.mxu0 }
 0x120   : > { %v1172_v25 = vadd.f32 %v7173_v15, %v1171_v24  ;;  %8008 = vmatprep.mubr.msk.f32.mxu1 %vm1219_vm1, %v1200_v21  ;;  %v1203_v28 = vmax.f32 %v1177_v23, 0.0 }
 0x121   : > { %v7996_v26 = vpop.f32.mrf.mxu0  ;;  %8009 = vmatmul.mubr.msk.f32.vlgmr.msra.gmra.mxu1 %vm1219_vm1, %v1201_v22 }
 0x122   : > { %v1202_v27 = vmax.f32 %v1172_v25, 0.0  ;;  %v1187_v29 = vadd.f32 %v7996_v26, %v7173_v15  ;;  %8041 = vmatpush3.msra.mxu1 %v1500_v42  ;;  %v7200_v25 = vld [vmem:[%s11288_s8] ss:$0 sm:$0xff]  ;;  %s11316_s8 = sld [smem:[#allocation22_spill]] }
 0x123   : > { %v1181_v30 = vpop.f32.mrf.mxu0  ;;  %8042 = vmatprep.subr.mxu1 %v1499_v43 }
 0x124   : > { %v1182_v31 = vadd.f32 %v7173_v15, %v1181_v30  ;;  %8011 = vmatprep.mubr.msk.f32.mxu1 %vm1219_vm1, %v1202_v27  ;;  %v1205_v34 = vmax.f32 %v1187_v29, 0.0  ;;  %8043 = vmatpush3.msra.mxu1 %v1499_v43 }
 0x125   : > { %v7999_v32 = vpop.f32.mrf.mxu0  ;;  %8012 = vmatmul.mubr.msk.f32.gmra.mxu1 %vm1219_vm1, %v1203_v28  ;;  %8044 = vmatprep.subr.mxu1 %v1498_v44 }
 0x126   : > { %v1204_v33 = vmax.f32 %v1182_v31, 0.0  ;;  %v1197_v35 = vadd.f32 %v7999_v32, %v7173_v15  ;;  %8045 = vmatpush3.msra.mxu1 %v1498_v44 }
 0x127   : > { %v1191_v36 = vpop.f32.mrf.mxu0  ;;  %8046 = vmatprep.subr.mxu1 %v1497_v6 }
 0x128   : > { %v1192_v37 = vadd.f32 %v7173_v15, %v1191_v36  ;;  %8014 = vmatprep.mubr.msk.f32.mxu1 %vm1219_vm1, %v1204_v33  ;;  %v1207_v39 = vmax.f32 %v1197_v35, 0.0  ;;  %8047 = vmatpush3.msra.mxu1 %v1497_v6 }
 0x129   : > { %8015 = vmatmul.mubr.msk.f32.gmra.mxu1 %vm1219_vm1, %v1205_v34 }
 0x12a   : > { %v1206_v38 = vmax.f32 %v1192_v37, 0.0 }
 0x12c   : > { %8017 = vmatprep.mubr.msk.f32.mxu1 %vm1219_vm1, %v1206_v38 }
 0x12d   : > { %8018 = vmatmul.mubr.msk.f32.gmra.mxu1 %vm1219_vm1, %v1207_v39 }
 0x1e1   : > { %v8010_v46 = vpop.f32.mrf.mxu1 }
 0x1e2   : > { %v1316_v47 = vadd.f32 %v8010_v46, %v7182_v45 }
 0x1e3   : > { %v1310_v48 = vpop.f32.mrf.mxu1 }
 0x1e4   : > { %v1311_v49 = vadd.f32 %v7182_v45, %v1310_v48  ;;  %v1350_v52 = vmax.f32 %v1316_v47, 0.0 }
 0x1e5   : > { %v8013_v50 = vpop.f32.mrf.mxu1 }
 0x1e6   : > { %v1349_v51 = vmax.f32 %v1311_v49, 0.0  ;;  %v1326_v53 = vadd.f32 %v8013_v50, %v7182_v45 }
 0x1e7   : > { %v1320_v54 = vpop.f32.mrf.mxu1 }
 0x1e8   : > { %v1321_v55 = vadd.f32 %v7182_v45, %v1320_v54  ;;  %8028 = vmatprep.mubr.msk.f32.mxu0 %vm1219_vm1, %v1349_v51  ;;  %v1352_v58 = vmax.f32 %v1326_v53, 0.0 }
 0x1e9   : > { %v8016_v56 = vpop.f32.mrf.mxu1  ;;  %8029 = vmatmul.mubr.msk.f32.vlgmr.msra.gmra.mxu0 %vm1219_vm1, %v1350_v52 }
 0x1ea   : > { %v1351_v57 = vmax.f32 %v1321_v55, 0.0  ;;  %v1336_v59 = vadd.f32 %v8016_v56, %v7182_v45 }
 0x1eb   : > { %v1330_v60 = vpop.f32.mrf.mxu1 }
 0x1ec   : > { %v1331_v61 = vadd.f32 %v7182_v45, %v1330_v60  ;;  %8031 = vmatprep.mubr.msk.f32.mxu0 %vm1219_vm1, %v1351_v57  ;;  %v1354_v0 = vmax.f32 %v1336_v59, 0.0 }
 0x1ed   : > { %v8019_v62 = vpop.f32.mrf.mxu1  ;;  %8032 = vmatmul.mubr.msk.f32.gmra.mxu0 %vm1219_vm1, %v1352_v58 }
 0x1ee   : > { %v1353_v63 = vmax.f32 %v1331_v61, 0.0  ;;  %v1346_v1 = vadd.f32 %v8019_v62, %v7182_v45 }
 0x1ef   : > { %v1340_v2 = vpop.f32.mrf.mxu1 }
 0x1f0   : > { %v1341_v3 = vadd.f32 %v7182_v45, %v1340_v2  ;;  %8034 = vmatprep.mubr.msk.f32.mxu0 %vm1219_vm1, %v1353_v63  ;;  %v1356_v5 = vmax.f32 %v1346_v1, 0.0 }
 0x1f1   : > { %8035 = vmatmul.mubr.msk.f32.gmra.mxu0 %vm1219_vm1, %v1354_v0 }
 0x1f2   : > { %v1355_v4 = vmax.f32 %v1341_v3, 0.0 }
 0x1f4   : > { %8037 = vmatprep.mubr.msk.f32.mxu0 %vm1219_vm1, %v1355_v4 }
 0x1f5   : > { %8038 = vmatmul.mubr.msk.f32.gmra.mxu0 %vm1219_vm1, %v1356_v5 }
 0x2a9   : > { %v8030_v7 = vpop.f32.mrf.mxu0 }
 0x2aa   : > { %v9517_v11 = vadd.f32 %v8030_v7, %v7191_v8 }
 0x2ab   : > { %v1458_v9 = vpop.f32.mrf.mxu0 }
 0x2ac   : > { %v9515_v10 = vadd.f32 %v7191_v8, %v1458_v9 }
 0x2ad   : > { %v8033_v12 = vpop.f32.mrf.mxu0 }
 0x2ae   : > { %8048 = vmatprep.mubr.msk.f32.mxu1 %vm1219_vm1, %v9515_v10  ;;  %v9525_v15 = vadd.f32 %v8033_v12, %v7191_v8 }
 0x2af   : > { %v1468_v13 = vpop.f32.mrf.mxu0  ;;  %8049 = vmatmul.mubr.msk.f32.vlgmr.msra.gmra.mxu1 %vm1219_vm1, %v9517_v11 }
 0x2b0   : > { %v9523_v14 = vadd.f32 %v7191_v8, %v1468_v13 }
 0x2b1   : > { %v8036_v16 = vpop.f32.mrf.mxu0 }
 0x2b2   : > { %8051 = vmatprep.mubr.msk.f32.mxu1 %vm1219_vm1, %v9523_v14  ;;  %v9533_v19 = vadd.f32 %v8036_v16, %v7191_v8 }
 0x2b3   : > { %v1478_v17 = vpop.f32.mrf.mxu0  ;;  %8052 = vmatmul.mubr.msk.f32.gmra.mxu1 %vm1219_vm1, %v9525_v15 }
 0x2b4   : > { %v9531_v18 = vadd.f32 %v7191_v8, %v1478_v17 }
 0x2b5   : > { %v8039_v20 = vpop.f32.mrf.mxu0 }
 0x2b6   : > { %8054 = vmatprep.mubr.msk.f32.mxu1 %vm1219_vm1, %v9531_v18  ;;  %v9541_v23 = vadd.f32 %v8039_v20, %v7191_v8 }
 0x2b7   : > { %v1488_v21 = vpop.f32.mrf.mxu0  ;;  %8055 = vmatmul.mubr.msk.f32.gmra.mxu1 %vm1219_vm1, %v9533_v19 }
 0x2b8   : > { %v9539_v22 = vadd.f32 %v7191_v8, %v1488_v21 }
 0x2ba   : > { %8057 = vmatprep.mubr.msk.f32.mxu1 %vm1219_vm1, %v9539_v22 }
 0x2bb   : > { %8058 = vmatmul.mubr.msk.f32.gmra.mxu1 %vm1219_vm1, %v9541_v23 }
 0x36f   : > { %v8050_v24 = vpop.f32.mrf.mxu1 }
 0x370   : > { %v9578_v40 = vadd.f32 %v8050_v24, %v7200_v25 }
 0x371   : > { %v1598_v26 = vpop.f32.mrf.mxu1 }
 0x372   : > { %v9548_v27 = vadd.f32 %v7200_v25, %v1598_v26 }
 0x373   : > { %v8053_v28 = vpop.f32.mrf.mxu1 }
 0x374   : > { %8076 = vmatprep.mubr.msk.f32.mxu0 %vm1070_vm0, %v9548_v27  ;;  %v9572_v39 = vadd.f32 %v8053_v28, %v7200_v25 }
 0x375   : > { %v1608_v29 = vpop.f32.mrf.mxu1 }
 0x376   : > { %v9564_v37 = vadd.f32 %v7200_v25, %v1608_v29 }
 0x377   : > { %v8056_v30 = vpop.f32.mrf.mxu1 }
 0x378   : > { %v9552_v31 = vadd.f32 %v8056_v30, %v7200_v25 }
 0x379   : > { %v1618_v32 = vpop.f32.mrf.mxu1 }
 0x37a   : > { %1655 = vrot.lane.b32.xlu1 %v9552_v31, %s11232_s1  ;;  %v9556_v34 = vadd.f32 %v7200_v25, %v1618_v32 }
 0x37b   : > { %v8059_v33 = vpop.f32.mrf.mxu1 }
 0x37c   : > { %v9558_v35 = vadd.f32 %v8059_v33, %v7200_v25 }
 0x37d   : > { %v1628_v36 = vpop.f32.mrf.mxu1 }
 0x37e   : > { %1659 = vrot.lane.b32.xlu0 %v9558_v35, %s11232_s1  ;;  %1653 = vrot.lane.b32.xlu1 %v9556_v34, %s11232_s1  ;;  %v9566_v38 = vadd.f32 %v7200_v25, %v1628_v36 }
 0x382   : > { %1657 = vrot.lane.b32.xlu0 %v9566_v38, %s11232_s1  ;;  %1649 = vrot.lane.b32.xlu1 %v9564_v37, %s11232_s1 }
 0x386   : > { %1651 = vrot.lane.b32.xlu0 %v9572_v39, %s11232_s1  ;;  %1645 = vrot.lane.b32.xlu1 %v9548_v27, %s11232_s1 }
 0x38a   : > { %1647 = vrot.lane.b32.xlu0 %v9578_v40, %s11232_s1  ;;  %1901 = vrot.lane.b32.xlu1 %v9558_v35, %s11214_s28  ;;  %s11234_s1 = smov 16  }
 0x38e   : > { %1893 = vrot.lane.b32.xlu0 %v9572_v39, %s11214_s28  ;;  %1897 = vrot.lane.b32.xlu1 %v9552_v31, %s11214_s28 }
 0x392   : > { %1889 = vrot.lane.b32.xlu0 %v9578_v40, %s11214_s28  ;;  %1895 = vrot.lane.b32.xlu1 %v9556_v34, %s11214_s28 }
 0x396   : > { %2070 = vrot.lane.b32.xlu0 %v9558_v35, %s11216_s23  ;;  %1891 = vrot.lane.b32.xlu1 %v9564_v37, %s11214_s28 }
 0x39a   : > { %1899 = vrot.lane.b32.xlu0 %v9566_v38, %s11214_s28  ;;  %1887 = vrot.lane.b32.xlu1 %v9548_v27, %s11214_s28  ;;  %s11218_s28 = smov 120  }
 0x39e   : > { %2068 = vrot.lane.b32.xlu1 %v9566_v38, %s11216_s23 }
 0x3ec   : > { %v1656_v41 = vpop.permute.xlu1 %1655 }
 0x3f0   : > { %v1660_v42 = vpop.permute.xlu0 %1659  ;;  %v1654_v43 = vpop.permute.xlu1 %1653 }
 0x3f1   : > { %8060 = vmatprep.subr.msk.mxu0 %vm1070_vm0, %v1660_v42 }
 0x3f2   : > { %8061 = vmatpush3.xpose.msk.msra.mxu0 %vm1070_vm0, %v1660_v42 }
 0x3f4   : > { %v1658_v44 = vpop.permute.xlu0 %1657  ;;  %v1650_v45 = vpop.permute.xlu1 %1649 }
 0x3f5   : > { %8062 = vmatprep.subr.msk.mxu0 %vm1070_vm0, %v1658_v44 }
 0x3f6   : > { %8063 = vmatpush3.xpose.msk.msra.mxu0 %vm1070_vm0, %v1658_v44 }
 0x3f7   : > { %8064 = vmatprep.subr.msk.mxu0 %vm1070_vm0, %v1656_v41 }
 0x3f8   : > { %v1652_v46 = vpop.permute.xlu0 %1651  ;;  %v1646_v47 = vpop.permute.xlu1 %1645 }
 0x3fa   : > { %8065 = vmatpush3.xpose.msk.msra.mxu0 %vm1070_vm0, %v1656_v41 }
 0x3fb   : > { %8066 = vmatprep.subr.msk.mxu0 %vm1070_vm0, %v1654_v43 }
 0x3fc   : > { %v1648_v48 = vpop.permute.xlu0 %1647  ;;  %v1902_v49 = vpop.permute.xlu1 %1901 }
 0x3fd   : > { %8088 = vmatprep.subr.mxu1 %v1902_v49 }
 0x3fe   : > { %8067 = vmatpush3.xpose.msk.msra.mxu0 %vm1070_vm0, %v1654_v43  ;;  %8089 = vmatpush3.msra.mxu1 %v1902_v49 }
 0x3ff   : > { %8068 = vmatprep.subr.msk.mxu0 %vm1070_vm0, %v1652_v46 }
 0x400   : > { %v1894_v50 = vpop.permute.xlu0 %1893  ;;  %v1898_v52 = vpop.permute.xlu1 %1897 }
 0x402   : > { %8069 = vmatpush3.xpose.msk.msra.mxu0 %vm1070_vm0, %v1652_v46 }
 0x403   : > { %8070 = vmatprep.subr.msk.mxu0 %vm1070_vm0, %v1650_v45 }
 0x404   : > { %v1890_v51 = vpop.permute.xlu0 %1889  ;;  %v1896_v54 = vpop.permute.xlu1 %1895 }
 0x406   : > { %8071 = vmatpush3.xpose.msk.msra.mxu0 %vm1070_vm0, %v1650_v45 }
 0x407   : > { %8072 = vmatprep.subr.msk.mxu0 %vm1070_vm0, %v1648_v48 }
 0x408   : > { %v9615_v53 = vpop.permute.xlu0 %2070  ;;  %v1892_v56 = vpop.permute.xlu1 %1891 }
 0x40a   : > { %8073 = vmatpush3.xpose.msk.msra.mxu0 %vm1070_vm0, %v1648_v48 }
 0x40b   : > { %8074 = vmatprep.subr.msk.mxu0 %vm1070_vm0, %v1646_v47 }
 0x40c   : > { %v1900_v55 = vpop.permute.xlu0 %1899  ;;  %v1888_v57 = vpop.permute.xlu1 %1887 }
 0x40d   : > { %8090 = vmatprep.subr.mxu1 %v1900_v55 }
 0x40e   : > { %8075 = vmatpush3.xpose.msk.msra.mxu0 %vm1070_vm0, %v1646_v47  ;;  %8091 = vmatpush3.msra.mxu1 %v1900_v55 }
 0x40f   : > { %8092 = vmatprep.subr.mxu1 %v1898_v52 }
 0x410   : > { %8093 = vmatpush3.msra.mxu1 %v1898_v52  ;;  %v9648_v12 = vpop.permute.xlu1 %2068 }
 0x411   : > { %8077 = vmatmul.mubr.msk.f32.vlgmr.msra.gmra.mxu0 %vm1070_vm0, %v9578_v40  ;;  %8094 = vmatprep.subr.mxu1 %v1896_v54 }
 0x412   : > { %8079 = vmatprep.mubr.msk.f32.mxu0 %vm1070_vm0, %v9564_v37  ;;  %8095 = vmatpush3.msra.mxu1 %v1896_v54 }
 0x413   : > { %8096 = vmatprep.subr.mxu1 %v1894_v50 }
 0x414   : > { %8097 = vmatpush3.msra.mxu1 %v1894_v50 }
 0x415   : > { %8080 = vmatmul.mubr.msk.f32.gmra.mxu0 %vm1070_vm0, %v9572_v39  ;;  %8098 = vmatprep.subr.mxu1 %v1892_v56 }
 0x416   : > { %8082 = vmatprep.mubr.msk.f32.mxu0 %vm1070_vm0, %v9556_v34  ;;  %8099 = vmatpush3.msra.mxu1 %v1892_v56 }
 0x417   : > { %8100 = vmatprep.subr.mxu1 %v1890_v51 }
 0x418   : > { %8101 = vmatpush3.msra.mxu1 %v1890_v51 }
 0x419   : > { %8083 = vmatmul.mubr.msk.f32.gmra.mxu0 %vm1070_vm0, %v9552_v31  ;;  %8102 = vmatprep.subr.mxu1 %v1888_v57 }
 0x41a   : > { %8085 = vmatprep.mubr.msk.f32.mxu0 %vm1070_vm0, %v9566_v38  ;;  %8103 = vmatpush3.msra.mxu1 %v1888_v57 }
 0x41b   : > { %8116 = vmatprep.subr.msk.mxu1 %vm1070_vm0, %v9615_v53 }
 0x41d   : > { %8086 = vmatmul.mubr.msk.f32.gmra.mxu0 %vm1070_vm0, %v9558_v35 }
 0x4d1   : > { %v8078_v58 = vpop.f32.mrf.mxu0 }
 0x4d2   : > { %v1802_v59 = vsel %vm1798_vm2, %v8078_v58, -inf }
 0x4d3   : > { %1803 = vmax.xlane.f32.xlu1 %v1802_v59  ;;  %v1759_v60 = vpop.f32.mrf.mxu0 }
 0x4d4   : > { %v1799_v61 = vsel %vm1798_vm2, %v1759_v60, -inf }
 0x4d5   : > { %1800 = vmax.xlane.f32.xlu0 %v1799_v61  ;;  %v8081_v62 = vpop.f32.mrf.mxu0 }
 0x4d6   : > { %v1808_v0 = vsel %vm1798_vm2, %v8081_v62, -inf }
 0x4d7   : > { %v1769_v63 = vpop.f32.mrf.mxu0 }
 0x4d8   : > { %v1805_v3 = vsel %vm1798_vm2, %v1769_v63, -inf }
 0x4d9   : > { %1809 = vmax.xlane.f32.xlu0 %v1808_v0  ;;  %v8084_v1 = vpop.f32.mrf.mxu0 }
 0x4da   : > { %v1814_v7 = vsel %vm1798_vm2, %v8084_v1, -inf }
 0x4db   : > { %v1779_v2 = vpop.f32.mrf.mxu0 }
 0x4dc   : > { %v1811_v4 = vsel %vm1798_vm2, %v1779_v2, -inf }
 0x4dd   : > { %1806 = vmax.xlane.f32.xlu0 %v1805_v3  ;;  %1812 = vmax.xlane.f32.xlu1 %v1811_v4  ;;  %v8087_v5 = vpop.f32.mrf.mxu0 }
 0x4de   : > { %v1820_v9 = vsel %vm1798_vm2, %v8087_v5, -inf }
 0x4df   : > { %v1789_v6 = vpop.f32.mrf.mxu0 }
 0x4e0   : > { %v1817_v8 = vsel %vm1798_vm2, %v1789_v6, -inf }
 0x4e1   : > { %1815 = vmax.xlane.f32.xlu0 %v1814_v7  ;;  %1818 = vmax.xlane.f32.xlu1 %v1817_v8 }
 0x4e5   : > { %1821 = vmax.xlane.f32.xlu0 %v1820_v9 }
 0x4f2   : > { %2064 = vrot.lane.b32.xlu1 %v9556_v34, %s11216_s23 }
 0x4fb   : > { %2066 = vrot.lane.b32.xlu0 %v9552_v31, %s11216_s23 }
 0x55c   : > { %v1804_v13 = vpop.xlane.xlu1 %1803 }
 0x55d   : > { %v1824_v16 = vsub.f32 %v8078_v58, %v1804_v13 }
 0x55e   : > { %v1801_v17 = vpop.xlane.xlu0 %1800 }
 0x55f   : > { %v1833_v20 = vmul.f32 1.442695, %v1824_v16  ;;  %v1823_v21 = vsub.f32 %v1759_v60, %v1801_v17 }
 0x561   : > { %8870 = vpow2.f32 %v1833_v20  ;;  %v1831_v24 = vmul.f32 1.442695, %v1823_v21 }
 0x562   : > { %v1810_v30 = vpop.xlane.xlu0 %1809 }
 0x563   : > { %8872 = vpow2.f32 %v1831_v24  ;;  %v1826_v42 = vsub.f32 %v8081_v62, %v1810_v30 }
 0x565   : > { %v1837_v46 = vmul.f32 1.442695, %v1826_v42 }
 0x566   : > { %v1807_v32 = vpop.xlane.xlu0 %1806  ;;  %v1813_v33 = vpop.xlane.xlu1 %1812 }
 0x567   : > { %v1825_v36 = vsub.f32 %v1769_v63, %v1807_v32  ;;  %v1827_v44 = vsub.f32 %v1779_v2, %v1813_v33 }
 0x569   : > { %v1835_v43 = vmul.f32 1.442695, %v1825_v36  ;;  %v1839_v49 = vmul.f32 1.442695, %v1827_v44 }
 0x56a   : > { %v1816_v41 = vpop.xlane.xlu0 %1815  ;;  %v1819_v45 = vpop.xlane.xlu1 %1818 }
 0x56b   : > { %v1828_v47 = vsub.f32 %v8084_v1, %v1816_v41  ;;  %8874 = vpow2.f32 %v1835_v43  ;;  %v1829_v50 = vsub.f32 %v1789_v6, %v1819_v45 }
 0x56c   : > { %8876 = vpow2.f32 %v1837_v46 }
 0x56d   : > { %v1841_v51 = vmul.f32 1.442695, %v1828_v47  ;;  %8878 = vpow2.f32 %v1839_v49  ;;  %v1843_v54 = vmul.f32 1.442695, %v1829_v50 }
 0x56e   : > { %v9650_v25 = vpop.eup %8870  ;;  %v1822_v48 = vpop.xlane.xlu0 %1821 }
 0x56f   : > { %v1850_v26 = vsel %vm1798_vm2, %v9650_v25, 0.0  ;;  %v1830_v52 = vsub.f32 %v8087_v5, %v1822_v48  ;;  %8880 = vpow2.f32 %v1841_v51  ;;  %v2065_v5 = vpop.permute.xlu1 %2064 }
 0x570   : > { %v9654_v28 = vpop.eup %8872  ;;  %1851 = vadd.xlane.f32.xlu0 %v1850_v26  ;;  %8882 = vpow2.f32 %v1843_v54 }
 0x571   : > { %v1847_v29 = vsel %vm1798_vm2, %v9654_v28, 0.0  ;;  %v1845_v55 = vmul.f32 1.442695, %v1830_v52 }
 0x572   : > { %1848 = vadd.xlane.f32.xlu1 %v1847_v29  ;;  %v2067_v4 = vpop.permute.xlu0 %2066 }
 0x573   : > { %8884 = vpow2.f32 %v1845_v55 }
 0x578   : > { %v9662_v56 = vpop.eup %8874 }
 0x579   : > { %v9664_v57 = vpop.eup %8876  ;;  %v1853_v58 = vsel %vm1798_vm2, %v9662_v56, 0.0 }
 0x57a   : > { %v9668_v59 = vpop.eup %8878  ;;  %v1856_v60 = vsel %vm1798_vm2, %v9664_v57, 0.0 }
 0x57b   : > { %v1859_v62 = vsel %vm1798_vm2, %v9668_v59, 0.0 }
 0x57c   : > { %v9672_v61 = vpop.eup %8880 }
 0x57d   : > { %v9676_v63 = vpop.eup %8882  ;;  %v1862_v0 = vsel %vm1798_vm2, %v9672_v61, 0.0 }
 0x57e   : > { %v1865_v2 = vsel %vm1798_vm2, %v9676_v63, 0.0 }
 0x580   : > { %v9680_v1 = vpop.eup %8884 }
 0x581   : > { %v1868_v3 = vsel %vm1798_vm2, %v9680_v1, 0.0 }
 0x583   : > { %2060 = vrot.lane.b32.xlu1 %v9564_v37, %s11216_s23 }
 0x586   : > { %2062 = vrot.lane.b32.xlu0 %v9572_v39, %s11216_s23 }
 0x5a5   : > { %1854 = vadd.xlane.f32.xlu0 %v1853_v58 }
 0x5a7   : > { %1857 = vadd.xlane.f32.xlu1 %v1856_v60 }
 0x5a9   : > { %1860 = vadd.xlane.f32.xlu0 %v1859_v62 }
 0x5ab   : > { %1863 = vadd.xlane.f32.xlu1 %v1862_v0 }
 0x5ad   : > { %1866 = vadd.xlane.f32.xlu0 %v1865_v2 }
 0x5af   : > { %1869 = vadd.xlane.f32.xlu1 %v1868_v3 }
 0x5c0   : > { %2056 = vrot.lane.b32.xlu1 %v9548_v27, %s11216_s23 }
 0x5c3   : > { %2058 = vrot.lane.b32.xlu0 %v9578_v40, %s11216_s23  ;;  %s11220_s23 = smov 56  }
 0x5c4   : > { %2042 = vrot.lane.b32.xlu1 %v9578_v40, %s11218_s28 }
 0x5c7   : > { %2040 = vrot.lane.b32.xlu0 %v9548_v27, %s11218_s28 }
 0x5c8   : > { %2046 = vrot.lane.b32.xlu1 %v9572_v39, %s11218_s28 }
 0x5cb   : > { %2044 = vrot.lane.b32.xlu0 %v9564_v37, %s11218_s28 }
 0x5cc   : > { %2050 = vrot.lane.b32.xlu1 %v9552_v31, %s11218_s28 }
 0x5cf   : > { %2048 = vrot.lane.b32.xlu0 %v9556_v34, %s11218_s28 }
 0x5d0   : > { %2054 = vrot.lane.b32.xlu1 %v9558_v35, %s11218_s28 }
 0x5d3   : > { %2052 = vrot.lane.b32.xlu0 %v9566_v38, %s11218_s28  ;;  %s11222_s28 = smov 80  }
 0x5d4   : > { %2311 = vrot.lane.b32.xlu1 %v9558_v35, %s11220_s23 }
 0x5d7   : > { %2309 = vrot.lane.b32.xlu0 %v9566_v38, %s11220_s23 }
 0x5d8   : > { %2307 = vrot.lane.b32.xlu1 %v9552_v31, %s11220_s23 }
 0x5db   : > { %2303 = vrot.lane.b32.xlu0 %v9572_v39, %s11220_s23 }
 0x5dc   : > { %2305 = vrot.lane.b32.xlu1 %v9556_v34, %s11220_s23 }
 0x5df   : > { %2299 = vrot.lane.b32.xlu0 %v9578_v40, %s11220_s23 }
 0x5e0   : > { %2301 = vrot.lane.b32.xlu1 %v9564_v37, %s11220_s23 }
 0x5e3   : > { %2480 = vrot.lane.b32.xlu0 %v9558_v35, %s11222_s28 }
 0x5e4   : > { %2297 = vrot.lane.b32.xlu1 %v9548_v27, %s11220_s23  ;;  %s11224_s23 = smov 112  }
 0x5e8   : > { %2478 = vrot.lane.b32.xlu1 %v9566_v38, %s11222_s28 }
 0x5f9   : > { %v1852_v6 = vpop.xlane.xlu0 %1851 }
 0x5fa   : > { %8886 = vrcp.f32 %v1852_v6 }
 0x5fb   : > { %v1849_v7 = vpop.xlane.xlu1 %1848 }
 0x5fc   : > { %8888 = vrcp.f32 %v1849_v7 }
 0x5fd   : > { %v2063_v17 = vpop.permute.xlu0 %2062 }
 0x5ff   : > { %v2061_v20 = vpop.permute.xlu1 %2060 }
 0x607   : > { %v8887_v8 = vpop.eup %8886 }
 0x608   : > { %v1880_v16 = vmul.f32 %v8887_v8, %v9650_v25 }
 0x609   : > { %v8889_v9 = vpop.eup %8888 }
 0x60a   : > { %v1879_v13 = vmul.f32 %v8889_v9, %v9654_v28 }
 0x60c   : > { %8104 = vmatprep.mubr.msk.f32.mxu1 %vm1798_vm2, %v1879_v13 }
 0x60d   : > { %8105 = vmatmul.mubr.msk.f32.vlgmr.msra.gmra.mxu1 %vm1798_vm2, %v1880_v16 }
 0x60e   : > { %8117 = vmatpush3.xpose.msk.msra.mxu1 %vm1070_vm0, %v9615_v53 }
 0x60f   : > { %8118 = vmatprep.subr.msk.mxu1 %vm1070_vm0, %v9648_v12 }
 0x612   : > { %8119 = vmatpush3.xpose.msk.msra.mxu1 %vm1070_vm0, %v9648_v12 }
 0x613   : > { %8120 = vmatprep.subr.msk.mxu1 %vm1070_vm0, %v2067_v4 }
 0x616   : > { %8121 = vmatpush3.xpose.msk.msra.mxu1 %vm1070_vm0, %v2067_v4 }
 0x617   : > { %8122 = vmatprep.subr.msk.mxu1 %vm1070_vm0, %v2065_v5 }
 0x61a   : > { %8123 = vmatpush3.xpose.msk.msra.mxu1 %vm1070_vm0, %v2065_v5 }
 0x61b   : > { %8124 = vmatprep.subr.msk.mxu1 %vm1070_vm0, %v2063_v17 }
 0x61e   : > { %8125 = vmatpush3.xpose.msk.msra.mxu1 %vm1070_vm0, %v2063_v17 }
 0x61f   : > { %8126 = vmatprep.subr.msk.mxu1 %vm1070_vm0, %v2061_v20 }
 0x622   : > { %8127 = vmatpush3.xpose.msk.msra.mxu1 %vm1070_vm0, %v2061_v20 }
 0x62e   : > { %v1855_v53 = vpop.xlane.xlu0 %1854 }
 0x62f   : > { %8890 = vrcp.f32 %v1855_v53 }
 0x630   : > { %v1858_v12 = vpop.xlane.xlu1 %1857 }
 0x631   : > { %8892 = vrcp.f32 %v1858_v12 }
 0x632   : > { %v1861_v21 = vpop.xlane.xlu0 %1860 }
 0x633   : > { %8894 = vrcp.f32 %v1861_v21 }
 0x634   : > { %v1864_v24 = vpop.xlane.xlu1 %1863 }
 0x635   : > { %8896 = vrcp.f32 %v1864_v24 }
 0x636   : > { %v1867_v25 = vpop.xlane.xlu0 %1866 }
 0x637   : > { %8898 = vrcp.f32 %v1867_v25 }
 0x638   : > { %v1870_v26 = vpop.xlane.xlu1 %1869 }
 0x639   : > { %8900 = vrcp.f32 %v1870_v26 }
 0x63a   : > { %v2059_v28 = vpop.permute.xlu0 %2058 }
 0x63b   : > { %8128 = vmatprep.subr.msk.mxu1 %vm1070_vm0, %v2059_v28 }
 0x63c   : > { %v8891_v29 = vpop.eup %8890  ;;  %8129 = vmatpush3.xpose.msk.msra.mxu1 %vm1070_vm0, %v2059_v28  ;;  %v2057_v30 = vpop.permute.xlu1 %2056 }
 0x63d   : > { %8130 = vmatprep.subr.msk.mxu1 %vm1070_vm0, %v2057_v30  ;;  %v1881_v32 = vmul.f32 %v8891_v29, %v9662_v56 }
 0x63e   : > { %v8893_v33 = vpop.eup %8892  ;;  %v2041_v36 = vpop.permute.xlu0 %2040 }
 0x63f   : > { %8107 = vmatprep.mubr.msk.f32.mxu1 %vm1798_vm2, %v1881_v32  ;;  %v1882_v41 = vmul.f32 %v8893_v33, %v9664_v57 }
 0x640   : > { %v8895_v42 = vpop.eup %8894  ;;  %8131 = vmatpush3.xpose.msk.msra.mxu1 %vm1070_vm0, %v2057_v30  ;;  %v2043_v43 = vpop.permute.xlu1 %2042 }
 0x641   : > { %8108 = vmatmul.mubr.msk.f32.gmra.mxu1 %vm1798_vm2, %v1882_v41  ;;  %v1883_v44 = vmul.f32 %v8895_v42, %v9668_v59 }
 0x642   : > { %v8897_v45 = vpop.eup %8896  ;;  %v2045_v46 = vpop.permute.xlu0 %2044 }
 0x643   : > { %8110 = vmatprep.mubr.msk.f32.mxu1 %vm1798_vm2, %v1883_v44  ;;  %v1884_v47 = vmul.f32 %v8897_v45, %v9672_v61 }
 0x644   : > { %v8899_v48 = vpop.eup %8898  ;;  %v2047_v49 = vpop.permute.xlu1 %2046 }
 0x645   : > { %8111 = vmatmul.mubr.msk.f32.gmra.mxu1 %vm1798_vm2, %v1884_v47  ;;  %v1885_v50 = vmul.f32 %v8899_v48, %v9676_v63 }
 0x646   : > { %v8901_v51 = vpop.eup %8900  ;;  %v2049_v52 = vpop.permute.xlu0 %2048 }
 0x647   : > { %8113 = vmatprep.mubr.msk.f32.mxu1 %vm1798_vm2, %v1885_v50  ;;  %v1886_v54 = vmul.f32 %v8901_v51, %v9680_v1 }
 0x648   : > { %v2051_v55 = vpop.permute.xlu1 %2050 }
 0x649   : > { %8114 = vmatmul.mubr.msk.f32.gmra.mxu1 %vm1798_vm2, %v1886_v54 }
 0x64a   : > { %v2053_v56 = vpop.permute.xlu0 %2052  ;;  %8132 = vmatprep.mubr.msk.f32.mxu1 %vm1070_vm0, %v2041_v36 }
 0x64c   : > { %v2055_v57 = vpop.permute.xlu1 %2054 }
 0x64d   : > { %8133 = vmatmul.mubr.msk.f32.vlgmr.msra.gmra.mxu1 %vm1070_vm0, %v2043_v43 }
 0x64e   : > { %8135 = vmatprep.mubr.msk.f32.mxu1 %vm1070_vm0, %v2045_v46  ;;  %v2310_v58 = vpop.permute.xlu0 %2309 }
 0x650   : > { %v2312_v59 = vpop.permute.xlu1 %2311 }
 0x651   : > { %8136 = vmatmul.mubr.msk.f32.gmra.mxu1 %vm1070_vm0, %v2047_v49  ;;  %8144 = vmatprep.subr.mxu0 %v2312_v59 }
 0x652   : > { %8138 = vmatprep.mubr.msk.f32.mxu1 %vm1070_vm0, %v2049_v52  ;;  %8145 = vmatpush3.msra.mxu0 %v2312_v59  ;;  %v2304_v61 = vpop.permute.xlu0 %2303 }
 0x653   : > { %8146 = vmatprep.subr.mxu0 %v2310_v58 }
 0x654   : > { %8147 = vmatpush3.msra.mxu0 %v2310_v58  ;;  %v2308_v60 = vpop.permute.xlu1 %2307 }
 0x655   : > { %8139 = vmatmul.mubr.msk.f32.gmra.mxu1 %vm1070_vm0, %v2051_v55  ;;  %8148 = vmatprep.subr.mxu0 %v2308_v60 }
 0x656   : > { %8141 = vmatprep.mubr.msk.f32.mxu1 %vm1070_vm0, %v2053_v56  ;;  %8149 = vmatpush3.msra.mxu0 %v2308_v60  ;;  %v2300_v63 = vpop.permute.xlu0 %2299 }
 0x658   : > { %v2306_v62 = vpop.permute.xlu1 %2305 }
 0x659   : > { %8142 = vmatmul.mubr.msk.f32.gmra.mxu1 %vm1070_vm0, %v2055_v57  ;;  %8150 = vmatprep.subr.mxu0 %v2306_v62 }
 0x65a   : > { %8151 = vmatpush3.msra.mxu0 %v2306_v62  ;;  %v9768_v2 = vpop.permute.xlu0 %2480 }
 0x65b   : > { %8152 = vmatprep.subr.mxu0 %v2304_v61 }
 0x65c   : > { %8153 = vmatpush3.msra.mxu0 %v2304_v61  ;;  %v2302_v0 = vpop.permute.xlu1 %2301 }
 0x65d   : > { %8154 = vmatprep.subr.mxu0 %v2302_v0 }
 0x65e   : > { %8155 = vmatpush3.msra.mxu0 %v2302_v0 }
 0x65f   : > { %8156 = vmatprep.subr.mxu0 %v2300_v63 }
 0x660   : > { %8157 = vmatpush3.msra.mxu0 %v2300_v63  ;;  %v2298_v1 = vpop.permute.xlu1 %2297 }
 0x661   : > { %8158 = vmatprep.subr.mxu0 %v2298_v1 }
 0x662   : > { %8159 = vmatpush3.msra.mxu0 %v2298_v1 }
 0x663   : > { %8172 = vmatprep.subr.msk.mxu0 %vm1070_vm0, %v9768_v2 }
 0x664   : > { %v9800_v42 = vpop.permute.xlu1 %2478 }
 0x6cd   : > { %v9772_v3 = vpop.f32.mrf.mxu1 }
 0x6cf   : > { %v9774_v4 = vpop.f32.mrf.mxu1 }
 0x701   : > { %v9776_v5 = vpop.f32.mrf.mxu1 }
 0x703   : > { %v9778_v6 = vpop.f32.mrf.mxu1 }
 0x705   : > { %v9780_v7 = vpop.f32.mrf.mxu1 }
 0x707   : > { %v9782_v8 = vpop.f32.mrf.mxu1 }
 0x709   : > { %v9784_v9 = vpop.f32.mrf.mxu1 }
 0x70b   : > { %v9786_v13 = vpop.f32.mrf.mxu1 }
 0x70d   : > { %v8134_v16 = vpop.f32.mrf.mxu1 }
 0x70e   : > { %v2212_v17 = vsel %vm1798_vm2, %v8134_v16, -inf }
 0x70f   : > { %2213 = vmax.xlane.f32.xlu1 %v2212_v17  ;;  %v2170_v20 = vpop.f32.mrf.mxu1 }
 0x710   : > { %v2209_v53 = vsel %vm1798_vm2, %v2170_v20, -inf }
 0x711   : > { %2210 = vmax.xlane.f32.xlu0 %v2209_v53  ;;  %v8137_v12 = vpop.f32.mrf.mxu1 }
 0x712   : > { %v2218_v24 = vsel %vm1798_vm2, %v8137_v12, -inf }
 0x713   : > { %v2180_v21 = vpop.f32.mrf.mxu1 }
 0x714   : > { %v2215_v28 = vsel %vm1798_vm2, %v2180_v21, -inf }
 0x715   : > { %2219 = vmax.xlane.f32.xlu0 %v2218_v24  ;;  %v8140_v25 = vpop.f32.mrf.mxu1 }
 0x716   : > { %v2224_v33 = vsel %vm1798_vm2, %v8140_v25, -inf }
 0x717   : > { %v2190_v26 = vpop.f32.mrf.mxu1 }
 0x718   : > { %v2221_v29 = vsel %vm1798_vm2, %v2190_v26, -inf }
 0x719   : > { %2216 = vmax.xlane.f32.xlu0 %v2215_v28  ;;  %2222 = vmax.xlane.f32.xlu1 %v2221_v29  ;;  %v8143_v30 = vpop.f32.mrf.mxu1 }
 0x71a   : > { %v2230_v41 = vsel %vm1798_vm2, %v8143_v30, -inf }
 0x71b   : > { %v2200_v32 = vpop.f32.mrf.mxu1 }
 0x71c   : > { %v2227_v36 = vsel %vm1798_vm2, %v2200_v32, -inf }
 0x71d   : > { %2225 = vmax.xlane.f32.xlu0 %v2224_v33  ;;  %2228 = vmax.xlane.f32.xlu1 %v2227_v36 }
 0x721   : > { %2231 = vmax.xlane.f32.xlu0 %v2230_v41 }
 0x72e   : > { %2474 = vrot.lane.b32.xlu1 %v9556_v34, %s11222_s28 }
 0x737   : > { %2476 = vrot.lane.b32.xlu0 %v9552_v31, %s11222_s28 }
 0x798   : > { %v2214_v43 = vpop.xlane.xlu1 %2213 }
 0x799   : > { %v2234_v44 = vsub.f32 %v8134_v16, %v2214_v43 }
 0x79a   : > { %v2211_v45 = vpop.xlane.xlu0 %2210 }
 0x79b   : > { %v2243_v46 = vmul.f32 1.442695, %v2234_v44  ;;  %v2233_v47 = vsub.f32 %v2170_v20, %v2211_v45 }
 0x79d   : > { %8902 = vpow2.f32 %v2243_v46  ;;  %v2241_v48 = vmul.f32 1.442695, %v2233_v47 }
 0x79e   : > { %v2220_v54 = vpop.xlane.xlu0 %2219 }
 0x79f   : > { %8904 = vpow2.f32 %v2241_v48  ;;  %v2236_v59 = vsub.f32 %v8137_v12, %v2220_v54 }
 0x7a1   : > { %v2247_v63 = vmul.f32 1.442695, %v2236_v59 }
 0x7a2   : > { %v2217_v55 = vpop.xlane.xlu0 %2216  ;;  %v2223_v56 = vpop.xlane.xlu1 %2222 }
 0x7a3   : > { %v2235_v57 = vsub.f32 %v2180_v21, %v2217_v55  ;;  %v2237_v61 = vsub.f32 %v2190_v26, %v2223_v56 }
 0x7a5   : > { %v2245_v60 = vmul.f32 1.442695, %v2235_v57  ;;  %v2249_v16 = vmul.f32 1.442695, %v2237_v61 }
 0x7a6   : > { %v2226_v58 = vpop.xlane.xlu0 %2225  ;;  %v2229_v62 = vpop.xlane.xlu1 %2228 }
 0x7a7   : > { %v2238_v0 = vsub.f32 %v8140_v25, %v2226_v58  ;;  %8906 = vpow2.f32 %v2245_v60  ;;  %v2239_v17 = vsub.f32 %v2200_v32, %v2229_v62 }
 0x7a8   : > { %8908 = vpow2.f32 %v2247_v63 }
 0x7a9   : > { %v2251_v20 = vmul.f32 1.442695, %v2238_v0  ;;  %8910 = vpow2.f32 %v2249_v16  ;;  %v2253_v24 = vmul.f32 1.442695, %v2239_v17 }
 0x7aa   : > { %v9802_v49 = vpop.eup %8902  ;;  %v2232_v1 = vpop.xlane.xlu0 %2231 }
 0x7ab   : > { %v2260_v50 = vsel %vm1798_vm2, %v9802_v49, 0.0  ;;  %v2240_v53 = vsub.f32 %v8143_v30, %v2232_v1  ;;  %8912 = vpow2.f32 %v2251_v20  ;;  %v2475_v46 = vpop.permute.xlu1 %2474 }
 0x7ac   : > { %v9806_v51 = vpop.eup %8904  ;;  %2261 = vadd.xlane.f32.xlu0 %v2260_v50  ;;  %8914 = vpow2.f32 %v2253_v24 }
 0x7ad   : > { %v2257_v52 = vsel %vm1798_vm2, %v9806_v51, 0.0  ;;  %v2255_v28 = vmul.f32 1.442695, %v2240_v53 }
 0x7ae   : > { %2258 = vadd.xlane.f32.xlu1 %v2257_v52  ;;  %v2477_v45 = vpop.permute.xlu0 %2476 }
 0x7af   : > { %8916 = vpow2.f32 %v2255_v28 }
 0x7b4   : > { %v9814_v21 = vpop.eup %8906 }
 0x7b5   : > { %v9816_v12 = vpop.eup %8908  ;;  %v2263_v25 = vsel %vm1798_vm2, %v9814_v21, 0.0 }
 0x7b6   : > { %v9820_v26 = vpop.eup %8910  ;;  %v2266_v29 = vsel %vm1798_vm2, %v9816_v12, 0.0 }
 0x7b7   : > { %v2269_v32 = vsel %vm1798_vm2, %v9820_v26, 0.0 }
 0x7b8   : > { %v9824_v30 = vpop.eup %8912 }
 0x7b9   : > { %v9828_v33 = vpop.eup %8914  ;;  %v2272_v36 = vsel %vm1798_vm2, %v9824_v30, 0.0 }
 0x7ba   : > { %v2275_v43 = vsel %vm1798_vm2, %v9828_v33, 0.0 }
 0x7bc   : > { %v9832_v41 = vpop.eup %8916 }
 0x7bd   : > { %v2278_v44 = vsel %vm1798_vm2, %v9832_v41, 0.0 }
 0x7bf   : > { %2470 = vrot.lane.b32.xlu1 %v9564_v37, %s11222_s28 }
 0x7c2   : > { %2472 = vrot.lane.b32.xlu0 %v9572_v39, %s11222_s28 }
 0x7e1   : > { %2264 = vadd.xlane.f32.xlu0 %v2263_v25 }
 0x7e3   : > { %2267 = vadd.xlane.f32.xlu1 %v2266_v29 }
 0x7e5   : > { %2270 = vadd.xlane.f32.xlu0 %v2269_v32 }
 0x7e7   : > { %2273 = vadd.xlane.f32.xlu1 %v2272_v36 }
 0x7e9   : > { %2276 = vadd.xlane.f32.xlu0 %v2275_v43 }
 0x7eb   : > { %2279 = vadd.xlane.f32.xlu1 %v2278_v44 }
 0x7fc   : > { %2466 = vrot.lane.b32.xlu1 %v9548_v27, %s11222_s28 }
 0x7ff   : > { %2468 = vrot.lane.b32.xlu0 %v9578_v40, %s11222_s28  ;;  %s11226_s28 = smov 48  }
 0x800   : > { %2452 = vrot.lane.b32.xlu1 %v9578_v40, %s11224_s23 }
 0x803   : > { %2450 = vrot.lane.b32.xlu0 %v9548_v27, %s11224_s23 }
 0x804   : > { %2456 = vrot.lane.b32.xlu1 %v9572_v39, %s11224_s23 }
 0x807   : > { %2454 = vrot.lane.b32.xlu0 %v9564_v37, %s11224_s23 }
 0x808   : > { %2460 = vrot.lane.b32.xlu1 %v9552_v31, %s11224_s23 }
 0x80b   : > { %2458 = vrot.lane.b32.xlu0 %v9556_v34, %s11224_s23 }
 0x80c   : > { %2464 = vrot.lane.b32.xlu1 %v9558_v35, %s11224_s23 }
 0x80f   : > { %2462 = vrot.lane.b32.xlu0 %v9566_v38, %s11224_s23  ;;  %s11230_s23 = smov 72  }
 0x810   : > { %2721 = vrot.lane.b32.xlu1 %v9558_v35, %s11226_s28 }
 0x813   : > { %2719 = vrot.lane.b32.xlu0 %v9566_v38, %s11226_s28 }
 0x814   : > { %2717 = vrot.lane.b32.xlu1 %v9552_v31, %s11226_s28 }
 0x817   : > { %2713 = vrot.lane.b32.xlu0 %v9572_v39, %s11226_s28 }
 0x818   : > { %2715 = vrot.lane.b32.xlu1 %v9556_v34, %s11226_s28 }
 0x81b   : > { %2709 = vrot.lane.b32.xlu0 %v9578_v40, %s11226_s28 }
 0x81c   : > { %2711 = vrot.lane.b32.xlu1 %v9564_v37, %s11226_s28 }
 0x81f   : > { %2890 = vrot.lane.b32.xlu0 %v9558_v35, %s11230_s23 }
 0x820   : > { %2707 = vrot.lane.b32.xlu1 %v9548_v27, %s11226_s28  ;;  %s11228_s28 = smov 104  }
 0x824   : > { %2888 = vrot.lane.b32.xlu1 %v9566_v38, %s11230_s23 }
 0x835   : > { %v2262_v47 = vpop.xlane.xlu0 %2261 }
 0x836   : > { %8918 = vrcp.f32 %v2262_v47 }
 0x837   : > { %v2259_v48 = vpop.xlane.xlu1 %2258 }
 0x838   : > { %8920 = vrcp.f32 %v2259_v48 }
 0x843   : > { %v8919_v50 = vpop.eup %8918 }
 0x844   : > { %v2290_v55 = vmul.f32 %v8919_v50, %v9802_v49  ;;  %v2473_v49 = vpop.permute.xlu0 %2472 }
 0x845   : > { %v8921_v52 = vpop.eup %8920 }
 0x846   : > { %v2289_v54 = vmul.f32 %v8921_v52, %v9806_v51  ;;  %v2471_v51 = vpop.permute.xlu1 %2470 }
 0x848   : > { %8160 = vmatprep.mubr.msk.f32.mxu0 %vm1798_vm2, %v2289_v54 }
 0x849   : > { %8161 = vmatmul.mubr.msk.f32.vlgmr.msra.gmra.mxu0 %vm1798_vm2, %v2290_v55 }
 0x84a   : > { %8173 = vmatpush3.xpose.msk.msra.mxu0 %vm1070_vm0, %v9768_v2 }
 0x84b   : > { %8174 = vmatprep.subr.msk.mxu0 %vm1070_vm0, %v9800_v42 }
 0x84e   : > { %8175 = vmatpush3.xpose.msk.msra.mxu0 %vm1070_vm0, %v9800_v42 }
 0x84f   : > { %8176 = vmatprep.subr.msk.mxu0 %vm1070_vm0, %v2477_v45 }
 0x852   : > { %8177 = vmatpush3.xpose.msk.msra.mxu0 %vm1070_vm0, %v2477_v45 }
 0x853   : > { %8178 = vmatprep.subr.msk.mxu0 %vm1070_vm0, %v2475_v46 }
 0x856   : > { %8179 = vmatpush3.xpose.msk.msra.mxu0 %vm1070_vm0, %v2475_v46 }
 0x857   : > { %8180 = vmatprep.subr.msk.mxu0 %vm1070_vm0, %v2473_v49 }
 0x85a   : > { %8181 = vmatpush3.xpose.msk.msra.mxu0 %vm1070_vm0, %v2473_v49 }
 0x85b   : > { %8182 = vmatprep.subr.msk.mxu0 %vm1070_vm0, %v2471_v51 }
 0x85e   : > { %8183 = vmatpush3.xpose.msk.msra.mxu0 %vm1070_vm0, %v2471_v51 }
 0x86a   : > { %v2265_v2 = vpop.xlane.xlu0 %2264 }
 0x86b   : > { %8922 = vrcp.f32 %v2265_v2 }
 0x86c   : > { %v2268_v42 = vpop.xlane.xlu1 %2267 }
 0x86d   : > { %8924 = vrcp.f32 %v2268_v42 }
 0x86e   : > { %v2271_v56 = vpop.xlane.xlu0 %2270 }
 0x86f   : > { %8926 = vrcp.f32 %v2271_v56 }
 0x870   : > { %v2274_v57 = vpop.xlane.xlu1 %2273 }
 0x871   : > { %8928 = vrcp.f32 %v2274_v57 }
 0x872   : > { %v2277_v58 = vpop.xlane.xlu0 %2276 }
 0x873   : > { %8930 = vrcp.f32 %v2277_v58 }
 0x874   : > { %v2280_v59 = vpop.xlane.xlu1 %2279 }
 0x875   : > { %8932 = vrcp.f32 %v2280_v59 }
 0x876   : > { %v2469_v60 = vpop.permute.xlu0 %2468 }
 0x877   : > { %8184 = vmatprep.subr.msk.mxu0 %vm1070_vm0, %v2469_v60 }
 0x878   : > { %v8923_v61 = vpop.eup %8922  ;;  %8185 = vmatpush3.xpose.msk.msra.mxu0 %vm1070_vm0, %v2469_v60  ;;  %v2467_v62 = vpop.permute.xlu1 %2466 }
 0x879   : > { %8186 = vmatprep.subr.msk.mxu0 %vm1070_vm0, %v2467_v62  ;;  %v2291_v63 = vmul.f32 %v8923_v61, %v9814_v21 }
 0x87a   : > { %v8925_v0 = vpop.eup %8924  ;;  %v2451_v1 = vpop.permute.xlu0 %2450 }
 0x87b   : > { %8163 = vmatprep.mubr.msk.f32.mxu0 %vm1798_vm2, %v2291_v63  ;;  %v2292_v16 = vmul.f32 %v8925_v0, %v9816_v12 }
 0x87c   : > { %v8927_v17 = vpop.eup %8926  ;;  %8187 = vmatpush3.xpose.msk.msra.mxu0 %vm1070_vm0, %v2467_v62  ;;  %v2453_v20 = vpop.permute.xlu1 %2452 }
 0x87d   : > { %8164 = vmatmul.mubr.msk.f32.gmra.mxu0 %vm1798_vm2, %v2292_v16  ;;  %v2293_v53 = vmul.f32 %v8927_v17, %v9820_v26 }
 0x87e   : > { %v8929_v24 = vpop.eup %8928  ;;  %v2455_v28 = vpop.permute.xlu0 %2454 }
 0x87f   : > { %8166 = vmatprep.mubr.msk.f32.mxu0 %vm1798_vm2, %v2293_v53  ;;  %v2294_v21 = vmul.f32 %v8929_v24, %v9824_v30 }
 0x880   : > { %v8931_v25 = vpop.eup %8930  ;;  %v2457_v29 = vpop.permute.xlu1 %2456 }
 0x881   : > { %8167 = vmatmul.mubr.msk.f32.gmra.mxu0 %vm1798_vm2, %v2294_v21  ;;  %v2295_v12 = vmul.f32 %v8931_v25, %v9828_v33 }
 0x882   : > { %v8933_v32 = vpop.eup %8932  ;;  %v2459_v36 = vpop.permute.xlu0 %2458 }
 0x883   : > { %8169 = vmatprep.mubr.msk.f32.mxu0 %vm1798_vm2, %v2295_v12  ;;  %v2296_v43 = vmul.f32 %v8933_v32, %v9832_v41 }
 0x884   : > { %v2461_v44 = vpop.permute.xlu1 %2460 }
 0x885   : > { %8170 = vmatmul.mubr.msk.f32.gmra.mxu0 %vm1798_vm2, %v2296_v43 }
 0x886   : > { %v2463_v26 = vpop.permute.xlu0 %2462  ;;  %8188 = vmatprep.mubr.msk.f32.mxu0 %vm1070_vm0, %v2451_v1 }
 0x888   : > { %v2465_v45 = vpop.permute.xlu1 %2464 }
 0x889   : > { %8189 = vmatmul.mubr.msk.f32.vlgmr.msra.gmra.mxu0 %vm1070_vm0, %v2453_v20 }
 0x88a   : > { %8191 = vmatprep.mubr.msk.f32.mxu0 %vm1070_vm0, %v2455_v28  ;;  %v2720_v30 = vpop.permute.xlu0 %2719 }
 0x88c   : > { %v2722_v46 = vpop.permute.xlu1 %2721 }
 0x88d   : > { %8192 = vmatmul.mubr.msk.f32.gmra.mxu0 %vm1070_vm0, %v2457_v29  ;;  %8200 = vmatprep.subr.mxu1 %v2722_v46 }
 0x88e   : > { %8194 = vmatprep.mubr.msk.f32.mxu0 %vm1070_vm0, %v2459_v36  ;;  %8201 = vmatpush3.msra.mxu1 %v2722_v46  ;;  %v2714_v41 = vpop.permute.xlu0 %2713 }
 0x88f   : > { %8202 = vmatprep.subr.mxu1 %v2720_v30 }
 0x890   : > { %8203 = vmatpush3.msra.mxu1 %v2720_v30  ;;  %v2718_v33 = vpop.permute.xlu1 %2717 }
 0x891   : > { %8195 = vmatmul.mubr.msk.f32.gmra.mxu0 %vm1070_vm0, %v2461_v44  ;;  %8204 = vmatprep.subr.mxu1 %v2718_v33 }
 0x892   : > { %8197 = vmatprep.mubr.msk.f32.mxu0 %vm1070_vm0, %v2463_v26  ;;  %8205 = vmatpush3.msra.mxu1 %v2718_v33  ;;  %v2710_v48 = vpop.permute.xlu0 %2709 }
 0x894   : > { %v2716_v47 = vpop.permute.xlu1 %2715 }
 0x895   : > { %8198 = vmatmul.mubr.msk.f32.gmra.mxu0 %vm1070_vm0, %v2465_v45  ;;  %8206 = vmatprep.subr.mxu1 %v2716_v47 }
 0x896   : > { %8207 = vmatpush3.msra.mxu1 %v2716_v47  ;;  %v9920_v54 = vpop.permute.xlu0 %2890 }
 0x897   : > { %8208 = vmatprep.subr.mxu1 %v2714_v41 }
 0x898   : > { %8209 = vmatpush3.msra.mxu1 %v2714_v41  ;;  %v2712_v50 = vpop.permute.xlu1 %2711 }
 0x899   : > { %8210 = vmatprep.subr.mxu1 %v2712_v50 }
 0x89a   : > { %8211 = vmatpush3.msra.mxu1 %v2712_v50 }
 0x89b   : > { %8212 = vmatprep.subr.mxu1 %v2710_v48 }
 0x89c   : > { %8213 = vmatpush3.msra.mxu1 %v2710_v48  ;;  %v2708_v52 = vpop.permute.xlu1 %2707 }
 0x89d   : > { %8214 = vmatprep.subr.mxu1 %v2708_v52 }
 0x89e   : > { %8215 = vmatpush3.msra.mxu1 %v2708_v52 }
 0x89f   : > { %8228 = vmatprep.subr.msk.mxu1 %vm1070_vm0, %v9920_v54 }
 0x8a0   : > { %v9952_v12 = vpop.permute.xlu1 %2888 }
 0x909   : > { %v9924_v55 = vpop.f32.mrf.mxu0 }
 0x90b   : > { %v9926_v49 = vpop.f32.mrf.mxu0 }
 0x93d   : > { %v9928_v51 = vpop.f32.mrf.mxu0 }
 0x93f   : > { %v9930_v2 = vpop.f32.mrf.mxu0 }
 0x941   : > { %v9932_v42 = vpop.f32.mrf.mxu0 }
 0x943   : > { %v9934_v56 = vpop.f32.mrf.mxu0 }
 0x945   : > { %v9936_v57 = vpop.f32.mrf.mxu0 }
 0x947   : > { %v9938_v58 = vpop.f32.mrf.mxu0 }
 0x949   : > { %v8190_v59 = vpop.f32.mrf.mxu0 }
 0x94a   : > { %v2622_v60 = vsel %vm1798_vm2, %v8190_v59, -inf }
 0x94b   : > { %2623 = vmax.xlane.f32.xlu1 %v2622_v60  ;;  %v2580_v61 = vpop.f32.mrf.mxu0 }
 0x94c   : > { %v2619_v62 = vsel %vm1798_vm2, %v2580_v61, -inf }
 0x94d   : > { %2620 = vmax.xlane.f32.xlu0 %v2619_v62  ;;  %v8193_v63 = vpop.f32.mrf.mxu0 }
 0x94e   : > { %v2628_v1 = vsel %vm1798_vm2, %v8193_v63, -inf }
 0x94f   : > { %v2590_v0 = vpop.f32.mrf.mxu0 }
 0x950   : > { %v2625_v20 = vsel %vm1798_vm2, %v2590_v0, -inf }
 0x951   : > { %2629 = vmax.xlane.f32.xlu0 %v2628_v1  ;;  %v8196_v16 = vpop.f32.mrf.mxu0 }
 0x952   : > { %v2634_v21 = vsel %vm1798_vm2, %v8196_v16, -inf }
 0x953   : > { %v2600_v17 = vpop.f32.mrf.mxu0 }
 0x954   : > { %v2631_v53 = vsel %vm1798_vm2, %v2600_v17, -inf }
 0x955   : > { %2626 = vmax.xlane.f32.xlu0 %v2625_v20  ;;  %2632 = vmax.xlane.f32.xlu1 %v2631_v53  ;;  %v8199_v24 = vpop.f32.mrf.mxu0 }
 0x956   : > { %v2640_v29 = vsel %vm1798_vm2, %v8199_v24, -inf }
 0x957   : > { %v2610_v28 = vpop.f32.mrf.mxu0 }
 0x958   : > { %v2637_v25 = vsel %vm1798_vm2, %v2610_v28, -inf }
 0x959   : > { %2635 = vmax.xlane.f32.xlu0 %v2634_v21  ;;  %2638 = vmax.xlane.f32.xlu1 %v2637_v25 }
 0x95d   : > { %2641 = vmax.xlane.f32.xlu0 %v2640_v29 }
 0x96a   : > { %2884 = vrot.lane.b32.xlu1 %v9556_v34, %s11230_s23 }
 0x973   : > { %2886 = vrot.lane.b32.xlu0 %v9552_v31, %s11230_s23 }
 0x9d4   : > { %v2624_v32 = vpop.xlane.xlu1 %2623 }
 0x9d5   : > { %v2644_v36 = vsub.f32 %v8190_v59, %v2624_v32 }
 0x9d6   : > { %v2621_v43 = vpop.xlane.xlu0 %2620 }
 0x9d7   : > { %v2653_v44 = vmul.f32 1.442695, %v2644_v36  ;;  %v2643_v26 = vsub.f32 %v2580_v61, %v2621_v43 }
 0x9d9   : > { %8934 = vpow2.f32 %v2653_v44  ;;  %v2651_v45 = vmul.f32 1.442695, %v2643_v26 }
 0x9da   : > { %v2630_v47 = vpop.xlane.xlu0 %2629 }
 0x9db   : > { %8936 = vpow2.f32 %v2651_v45  ;;  %v2646_v60 = vsub.f32 %v8193_v63, %v2630_v47 }
 0x9dd   : > { %v2657_v20 = vmul.f32 1.442695, %v2646_v60 }
 0x9de   : > { %v2627_v48 = vpop.xlane.xlu0 %2626  ;;  %v2633_v50 = vpop.xlane.xlu1 %2632 }
 0x9df   : > { %v2645_v52 = vsub.f32 %v2590_v0, %v2627_v48  ;;  %v2647_v62 = vsub.f32 %v2600_v17, %v2633_v50 }
 0x9e1   : > { %v2655_v61 = vmul.f32 1.442695, %v2645_v52  ;;  %v2659_v25 = vmul.f32 1.442695, %v2647_v62 }
 0x9e2   : > { %v2636_v59 = vpop.xlane.xlu0 %2635  ;;  %v2639_v1 = vpop.xlane.xlu1 %2638 }
 0x9e3   : > { %v2648_v53 = vsub.f32 %v8196_v16, %v2636_v59  ;;  %8938 = vpow2.f32 %v2655_v61  ;;  %v2649_v29 = vsub.f32 %v2610_v28, %v2639_v1 }
 0x9e4   : > { %8940 = vpow2.f32 %v2657_v20 }
 0x9e5   : > { %v2661_v32 = vmul.f32 1.442695, %v2648_v53  ;;  %8942 = vpow2.f32 %v2659_v25  ;;  %v2663_v43 = vmul.f32 1.442695, %v2649_v29 }
 0x9e6   : > { %v9954_v30 = vpop.eup %8934  ;;  %v2642_v21 = vpop.xlane.xlu0 %2641 }
 0x9e7   : > { %v2670_v46 = vsel %vm1798_vm2, %v9954_v30, 0.0  ;;  %v2650_v36 = vsub.f32 %v8199_v24, %v2642_v21  ;;  %8944 = vpow2.f32 %v2661_v32  ;;  %v2885_v52 = vpop.permute.xlu1 %2884 }
 0x9e8   : > { %v9958_v33 = vpop.eup %8936  ;;  %2671 = vadd.xlane.f32.xlu0 %v2670_v46  ;;  %8946 = vpow2.f32 %v2663_v43 }
 0x9e9   : > { %v2667_v41 = vsel %vm1798_vm2, %v9958_v33, 0.0  ;;  %v2665_v44 = vmul.f32 1.442695, %v2650_v36 }
 0x9ea   : > { %2668 = vadd.xlane.f32.xlu1 %v2667_v41  ;;  %v2887_v50 = vpop.permute.xlu0 %2886 }
 0x9eb   : > { %8948 = vpow2.f32 %v2665_v44 }
 0x9f0   : > { %v9966_v0 = vpop.eup %8938 }
 0x9f1   : > { %v9968_v63 = vpop.eup %8940  ;;  %v2673_v16 = vsel %vm1798_vm2, %v9966_v0, 0.0 }
 0x9f2   : > { %v9972_v17 = vpop.eup %8942  ;;  %v2676_v28 = vsel %vm1798_vm2, %v9968_v63, 0.0 }
 0x9f3   : > { %v2679_v26 = vsel %vm1798_vm2, %v9972_v17, 0.0 }
 0x9f4   : > { %v9976_v24 = vpop.eup %8944 }
 0x9f5   : > { %v9980_v45 = vpop.eup %8946  ;;  %v2682_v46 = vsel %vm1798_vm2, %v9976_v24, 0.0 }
 0x9f6   : > { %v2685_v47 = vsel %vm1798_vm2, %v9980_v45, 0.0 }
 0x9f8   : > { %v9984_v41 = vpop.eup %8948 }
 0x9f9   : > { %v2688_v48 = vsel %vm1798_vm2, %v9984_v41, 0.0 }
 0x9fb   : > { %2880 = vrot.lane.b32.xlu1 %v9564_v37, %s11230_s23 }
 0x9fe   : > { %2882 = vrot.lane.b32.xlu0 %v9572_v39, %s11230_s23 }
 0xa1d   : > { %2674 = vadd.xlane.f32.xlu0 %v2673_v16 }
 0xa1f   : > { %2677 = vadd.xlane.f32.xlu1 %v2676_v28 }
 0xa21   : > { %2680 = vadd.xlane.f32.xlu0 %v2679_v26 }
 0xa23   : > { %2683 = vadd.xlane.f32.xlu1 %v2682_v46 }
 0xa25   : > { %2686 = vadd.xlane.f32.xlu0 %v2685_v47 }
 0xa27   : > { %2689 = vadd.xlane.f32.xlu1 %v2688_v48 }
 0xa38   : > { %2876 = vrot.lane.b32.xlu1 %v9548_v27, %s11230_s23 }
 0xa3b   : > { %2878 = vrot.lane.b32.xlu0 %v9578_v40, %s11230_s23  ;;  %s11240_s23 = smov 8  }
 0xa3c   : > { %2862 = vrot.lane.b32.xlu1 %v9578_v40, %s11228_s28 }
 0xa3f   : > { %2860 = vrot.lane.b32.xlu0 %v9548_v27, %s11228_s28 }
 0xa40   : > { %2866 = vrot.lane.b32.xlu1 %v9572_v39, %s11228_s28 }
 0xa43   : > { %2864 = vrot.lane.b32.xlu0 %v9564_v37, %s11228_s28 }
 0xa44   : > { %2870 = vrot.lane.b32.xlu1 %v9552_v31, %s11228_s28 }
 0xa47   : > { %2868 = vrot.lane.b32.xlu0 %v9556_v34, %s11228_s28 }
 0xa48   : > { %2874 = vrot.lane.b32.xlu1 %v9558_v35, %s11228_s28 }
 0xa4b   : > { %2872 = vrot.lane.b32.xlu0 %v9566_v38, %s11228_s28  ;;  %s11242_s28 = smov 40  }
 0xa71   : > { %v2672_v59 = vpop.xlane.xlu0 %2671 }
 0xa72   : > { %8950 = vrcp.f32 %v2672_v59 }
 0xa73   : > { %v2669_v60 = vpop.xlane.xlu1 %2668 }
 0xa74   : > { %8952 = vrcp.f32 %v2669_v60 }
 0xa7f   : > { %v8951_v61 = vpop.eup %8950 }
 0xa80   : > { %v2700_v20 = vmul.f32 %v8951_v61, %v9954_v30  ;;  %v2883_v30 = vpop.permute.xlu0 %2882 }
 0xa81   : > { %v8953_v62 = vpop.eup %8952 }
 0xa82   : > { %v2699_v1 = vmul.f32 %v8953_v62, %v9958_v33  ;;  %v2881_v33 = vpop.permute.xlu1 %2880 }
 0xa84   : > { %8216 = vmatprep.mubr.msk.f32.mxu1 %vm1798_vm2, %v2699_v1 }
 0xa85   : > { %8217 = vmatmul.mubr.msk.f32.vlgmr.msra.gmra.mxu1 %vm1798_vm2, %v2700_v20 }
 0xa86   : > { %8229 = vmatpush3.xpose.msk.msra.mxu1 %vm1070_vm0, %v9920_v54 }
 0xa87   : > { %8230 = vmatprep.subr.msk.mxu1 %vm1070_vm0, %v9952_v12 }
 0xa8a   : > { %8231 = vmatpush3.xpose.msk.msra.mxu1 %vm1070_vm0, %v9952_v12 }
 0xa8b   : > { %8232 = vmatprep.subr.msk.mxu1 %vm1070_vm0, %v2887_v50 }
 0xa8e   : > { %8233 = vmatpush3.xpose.msk.msra.mxu1 %vm1070_vm0, %v2887_v50 }
 0xa8f   : > { %8234 = vmatprep.subr.msk.mxu1 %vm1070_vm0, %v2885_v52 }
 0xa92   : > { %8235 = vmatpush3.xpose.msk.msra.mxu1 %vm1070_vm0, %v2885_v52 }
 0xa93   : > { %8236 = vmatprep.subr.msk.mxu1 %vm1070_vm0, %v2883_v30 }
 0xa96   : > { %8237 = vmatpush3.xpose.msk.msra.mxu1 %vm1070_vm0, %v2883_v30 }
 0xa97   : > { %8238 = vmatprep.subr.msk.mxu1 %vm1070_vm0, %v2881_v33 }
 0xa9a   : > { %8239 = vmatpush3.xpose.msk.msra.mxu1 %vm1070_vm0, %v2881_v33 }
 0xaa6   : > { %v2675_v54 = vpop.xlane.xlu0 %2674 }
 0xaa7   : > { %8954 = vrcp.f32 %v2675_v54 }
 0xaa8   : > { %v2678_v12 = vpop.xlane.xlu1 %2677 }
 0xaa9   : > { %8956 = vrcp.f32 %v2678_v12 }
 0xaaa   : > { %v2681_v53 = vpop.xlane.xlu0 %2680 }
 0xaab   : > { %8958 = vrcp.f32 %v2681_v53 }
 0xaac   : > { %v2684_v21 = vpop.xlane.xlu1 %2683 }
 0xaad   : > { %8960 = vrcp.f32 %v2684_v21 }
 0xaae   : > { %v2687_v25 = vpop.xlane.xlu0 %2686 }
 0xaaf   : > { %8962 = vrcp.f32 %v2687_v25 }
 0xab0   : > { %v2690_v29 = vpop.xlane.xlu1 %2689 }
 0xab1   : > { %8964 = vrcp.f32 %v2690_v29 }
 0xab2   : > { %v2879_v32 = vpop.permute.xlu0 %2878 }
 0xab3   : > { %8240 = vmatprep.subr.msk.mxu1 %vm1070_vm0, %v2879_v32 }
 0xab4   : > { %v8955_v36 = vpop.eup %8954  ;;  %8241 = vmatpush3.xpose.msk.msra.mxu1 %vm1070_vm0, %v2879_v32  ;;  %v2877_v43 = vpop.permute.xlu1 %2876 }
 0xab5   : > { %8242 = vmatprep.subr.msk.mxu1 %vm1070_vm0, %v2877_v43  ;;  %v2701_v44 = vmul.f32 %v8955_v36, %v9966_v0 }
 0xab6   : > { %v8957_v16 = vpop.eup %8956  ;;  %v2861_v48 = vpop.permute.xlu0 %2860 }
 0xab7   : > { %8219 = vmatprep.mubr.msk.f32.mxu1 %vm1798_vm2, %v2701_v44  ;;  %v2702_v28 = vmul.f32 %v8957_v16, %v9968_v63 }
 0xab8   : > { %v8959_v26 = vpop.eup %8958  ;;  %8243 = vmatpush3.xpose.msk.msra.mxu1 %vm1070_vm0, %v2877_v43  ;;  %v2863_v63 = vpop.permute.xlu1 %2862 }
 0xab9   : > { %8220 = vmatmul.mubr.msk.f32.gmra.mxu1 %vm1798_vm2, %v2702_v28  ;;  %v2703_v46 = vmul.f32 %v8959_v26, %v9972_v17 }
 0xaba   : > { %v8961_v47 = vpop.eup %8960  ;;  %v2865_v61 = vpop.permute.xlu0 %2864 }
 0xabb   : > { %8222 = vmatprep.mubr.msk.f32.mxu1 %vm1798_vm2, %v2703_v46  ;;  %v2704_v50 = vmul.f32 %v8961_v47, %v9976_v24 }
 0xabc   : > { %v8963_v52 = vpop.eup %8962  ;;  %v2867_v17 = vpop.permute.xlu1 %2866 }
 0xabd   : > { %8223 = vmatmul.mubr.msk.f32.gmra.mxu1 %vm1798_vm2, %v2704_v50  ;;  %v2705_v0 = vmul.f32 %v8963_v52, %v9980_v45 }
 0xabe   : > { %v8965_v59 = vpop.eup %8964  ;;  %v2869_v24 = vpop.permute.xlu0 %2868 }
 0xabf   : > { %8225 = vmatprep.mubr.msk.f32.mxu1 %vm1798_vm2, %v2705_v0  ;;  %v2706_v60 = vmul.f32 %v8965_v59, %v9984_v41 }
 0xac0   : > { %v2871_v45 = vpop.permute.xlu1 %2870 }
 0xac1   : > { %8226 = vmatmul.mubr.msk.f32.gmra.mxu1 %vm1798_vm2, %v2706_v60 }
 0xac2   : > { %8244 = vmatprep.mubr.msk.f32.mxu1 %vm1070_vm0, %v2861_v48  ;;  %v2873_v62 = vpop.permute.xlu0 %2872 }
 0xac4   : > { %v2875_v41 = vpop.permute.xlu1 %2874 }
 0xac5   : > { %8245 = vmatmul.mubr.msk.f32.vlgmr.msra.gmra.mxu1 %vm1070_vm0, %v2863_v63 }
 0xac6   : > { %8247 = vmatprep.mubr.msk.f32.mxu1 %vm1070_vm0, %v2865_v61 }
 0xac9   : > { %8248 = vmatmul.mubr.msk.f32.gmra.mxu1 %vm1070_vm0, %v2867_v17 }
 0xaca   : > { %8250 = vmatprep.mubr.msk.f32.mxu1 %vm1070_vm0, %v2869_v24 }
 0xacd   : > { %8251 = vmatmul.mubr.msk.f32.gmra.mxu1 %vm1070_vm0, %v2871_v45 }
 0xace   : > { %8253 = vmatprep.mubr.msk.f32.mxu1 %vm1070_vm0, %v2873_v62 }
 0xad1   : > { %8254 = vmatmul.mubr.msk.f32.gmra.mxu1 %vm1070_vm0, %v2875_v41 }
 0xb45   : > { %v10052_v1 = vpop.f32.mrf.mxu1 }
 0xb47   : > { %v10054_v20 = vpop.f32.mrf.mxu1 }
 0xb79   : > { %v10056_v30 = vpop.f32.mrf.mxu1 }
 0xb7b   : > { %v10058_v33 = vpop.f32.mrf.mxu1 }
 0xb7d   : > { %v10060_v54 = vpop.f32.mrf.mxu1 }
 0xb7f   : > { %v10062_v12 = vpop.f32.mrf.mxu1 }
 0xb81   : > { %v10064_v53 = vpop.f32.mrf.mxu1 }
 0xb83   : > { %v10066_v21 = vpop.f32.mrf.mxu1 }
 0xb85   : > { %v8246_v25 = vpop.f32.mrf.mxu1 }
 0xb86   : > { %v3032_v29 = vsel %vm1798_vm2, %v8246_v25, -inf }
 0xb87   : > { %3033 = vmax.xlane.f32.xlu1 %v3032_v29  ;;  %v2990_v32 = vpop.f32.mrf.mxu1 }
 0xb88   : > { %v3029_v36 = vsel %vm1798_vm2, %v2990_v32, -inf }
 0xb89   : > { %3030 = vmax.xlane.f32.xlu0 %v3029_v36  ;;  %v8249_v43 = vpop.f32.mrf.mxu1 }
 0xb8a   : > { %v3038_v46 = vsel %vm1798_vm2, %v8249_v43, -inf }
 0xb8b   : > { %v3000_v44 = vpop.f32.mrf.mxu1 }
 0xb8c   : > { %v3035_v16 = vsel %vm1798_vm2, %v3000_v44, -inf }
 0xb8d   : > { %3036 = vmax.xlane.f32.xlu0 %v3035_v16  ;;  %v8252_v28 = vpop.f32.mrf.mxu1 }
 0xb8e   : > { %v3044_v48 = vsel %vm1798_vm2, %v8252_v28, -inf }
 0xb8f   : > { %v3010_v26 = vpop.f32.mrf.mxu1 }
 0xb90   : > { %v3041_v47 = vsel %vm1798_vm2, %v3010_v26, -inf }
 0xb91   : > { %3039 = vmax.xlane.f32.xlu0 %v3038_v46  ;;  %3042 = vmax.xlane.f32.xlu1 %v3041_v47  ;;  %v8255_v50 = vpop.f32.mrf.mxu1 }
 0xb92   : > { %v3050_v52 = vsel %vm1798_vm2, %v8255_v50, -inf }
 0xb93   : > { %v10083_v0 = vpop.f32.mrf.mxu1 }
 0xb94   : > { %v3047_v59 = vsel %vm1798_vm2, %v10083_v0, -inf }
 0xb95   : > { %3045 = vmax.xlane.f32.xlu0 %v3044_v48 }
 0xb99   : > { %3051 = vmax.xlane.f32.xlu0 %v3050_v52 }
 0xba2   : > { %3131 = vrot.lane.b32.xlu1 %v9558_v35, %s11242_s28 }
 0xba6   : > { %3127 = vrot.lane.b32.xlu1 %v9552_v31, %s11242_s28 }
 0xbaf   : > { %3129 = vrot.lane.b32.xlu0 %v9566_v38, %s11242_s28 }
 0xbb3   : > { %3123 = vrot.lane.b32.xlu0 %v9572_v39, %s11242_s28 }
 0xbca   : > { %3048 = vmax.xlane.f32.xlu1 %v3047_v59 }
 0xbdb   : > { %3125 = vrot.lane.b32.xlu1 %v9556_v34, %s11242_s28 }
 0xbdf   : > { %3121 = vrot.lane.b32.xlu1 %v9564_v37, %s11242_s28 }
 0xc10   : > { %v3034_v35 = vpop.xlane.xlu1 %3033 }
 0xc11   : > { %v3054_v31 = vsub.f32 %v8246_v25, %v3034_v35 }
 0xc12   : > { %v3031_v63 = vpop.xlane.xlu0 %3030 }
 0xc13   : > { %v3063_v60 = vmul.f32 1.442695, %v3054_v31  ;;  %v3053_v38 = vsub.f32 %v2990_v32, %v3031_v63 }
 0xc15   : > { %8966 = vpow2.f32 %v3063_v60  ;;  %v3061_v61 = vmul.f32 1.442695, %v3053_v38 }
 0xc16   : > { %v3037_v39 = vpop.xlane.xlu0 %3036 }
 0xc17   : > { %8968 = vpow2.f32 %v3061_v61  ;;  %v3055_v17 = vsub.f32 %v3000_v44, %v3037_v39 }
 0xc19   : > { %v3065_v24 = vmul.f32 1.442695, %v3055_v17 }
 0xc1a   : > { %v3040_v45 = vpop.xlane.xlu0 %3039  ;;  %v3043_v62 = vpop.xlane.xlu1 %3042 }
 0xc1b   : > { %8970 = vpow2.f32 %v3065_v24  ;;  %v3056_v41 = vsub.f32 %v8249_v43, %v3040_v45  ;;  %v3057_v29 = vsub.f32 %v3010_v26, %v3043_v62 }
 0xc1d   : > { %v3067_v34 = vmul.f32 1.442695, %v3056_v41  ;;  %v3069_v36 = vmul.f32 1.442695, %v3057_v29 }
 0xc1e   : > { %v3046_v16 = vpop.xlane.xlu0 %3045  ;;  %v3132_v37 = vpop.permute.xlu1 %3131 }
 0xc1f   : > { %8972 = vpow2.f32 %v3067_v34  ;;  %v3058_v25 = vsub.f32 %v8252_v28, %v3046_v16  ;;  %8256 = vmatprep.subr.mxu0 %v3132_v37 }
 0xc20   : > { %8974 = vpow2.f32 %v3069_v36  ;;  %8257 = vmatpush3.msra.mxu0 %v3132_v37 }
 0xc21   : > { %v3071_v32 = vmul.f32 1.442695, %v3058_v25 }
 0xc22   : > { %v10091_v46 = vpop.eup %8966  ;;  %v3052_v47 = vpop.xlane.xlu0 %3051 }
 0xc23   : > { %8976 = vpow2.f32 %v3071_v32  ;;  %v3060_v44 = vsub.f32 %v8255_v50, %v3052_v47  ;;  %v3080_v48 = vsel %vm1798_vm2, %v10091_v46, 0.0  ;;  %v3128_v35 = vpop.permute.xlu1 %3127 }
 0xc24   : > { %v10095_v43 = vpop.eup %8968  ;;  %3081 = vadd.xlane.f32.xlu0 %v3080_v48 }
 0xc25   : > { %v3075_v26 = vmul.f32 1.442695, %v3060_v44  ;;  %v3077_v52 = vsel %vm1798_vm2, %v10095_v43, 0.0 }
 0xc26   : > { %v3130_v28 = vpop.permute.xlu0 %3129  ;;  %3078 = vadd.xlane.f32.xlu1 %v3077_v52  ;;  %v3394_v52 = vld [vmem:[%s11280_s14 + $0x10] sm:$0xff] }
 0xc27   : > { %8978 = vpow2.f32 %v3075_v26  ;;  %8258 = vmatprep.subr.mxu0 %v3130_v28  ;;  %v3395_v26 = vld [vmem:[%s11280_s14 + $0x18] sm:$0xff] }
 0xc28   : > { %v10099_v59 = vpop.eup %8970  ;;  %8259 = vmatpush3.msra.mxu0 %v3130_v28  ;;  %v3393_v28 = vld [vmem:[%s11280_s14 + $0x8] sm:$0xff] }
 0xc29   : > { %8260 = vmatprep.subr.mxu0 %v3128_v35  ;;  %v3083_v50 = vsel %vm1798_vm2, %v10099_v59, 0.0 }
 0xc2a   : > { %3084 = vadd.xlane.f32.xlu1 %v3083_v50  ;;  %8261 = vmatpush3.msra.mxu0 %v3128_v35  ;;  %v3124_v34 = vpop.permute.xlu0 %3123 }
 0xc2c   : > { %v10103_v31 = vpop.eup %8972 }
 0xc2d   : > { %v10105_v63 = vpop.eup %8974  ;;  %v3086_v60 = vsel %vm1798_vm2, %v10103_v31, 0.0 }
 0xc2e   : > { %3087 = vadd.xlane.f32.xlu0 %v3086_v60  ;;  %v3089_v38 = vsel %vm1798_vm2, %v10105_v63, 0.0 }
 0xc2f   : > { %3090 = vadd.xlane.f32.xlu1 %v3089_v38 }
 0xc30   : > { %v10111_v61 = vpop.eup %8976 }
 0xc31   : > { %v3092_v39 = vsel %vm1798_vm2, %v10111_v61, 0.0 }
 0xc32   : > { %3093 = vadd.xlane.f32.xlu0 %v3092_v39 }
 0xc34   : > { %v10115_v17 = vpop.eup %8978 }
 0xc35   : > { %v3098_v24 = vsel %vm1798_vm2, %v10115_v17, 0.0 }
 0xc36   : > { %3099 = vadd.xlane.f32.xlu0 %v3098_v24 }
 0xc4c   : > { %3119 = vrot.lane.b32.xlu0 %v9578_v40, %s11242_s28 }
 0xc50   : > { %3278 = vrot.lane.b32.xlu0 %v9926_v49, %s11240_s23 }
 0xc53   : > { %v3049_v45 = vpop.xlane.xlu1 %3048 }
 0xc54   : > { %v3059_v62 = vsub.f32 %v10083_v0, %v3049_v45  ;;  %3310 = vrot.lane.b32.xlu0 %v10054_v20, %s11234_s1 }
 0xc56   : > { %v3073_v41 = vmul.f32 1.442695, %v3059_v62 }
 0xc57   : > { %v3126_v29 = vpop.permute.xlu1 %3125 }
 0xc58   : > { %8980 = vpow2.f32 %v3073_v41  ;;  %3282 = vrot.lane.b32.xlu0 %v9930_v2, %s11240_s23  ;;  %8262 = vmatprep.subr.mxu0 %v3126_v29 }
 0xc59   : > { %8263 = vmatpush3.msra.mxu0 %v3126_v29 }
 0xc5a   : > { %8264 = vmatprep.subr.mxu0 %v3124_v34 }
 0xc5b   : > { %8265 = vmatpush3.msra.mxu0 %v3124_v34  ;;  %v3122_v40 = vpop.permute.xlu1 %3121 }
 0xc5c   : > { %3314 = vrot.lane.b32.xlu0 %v10058_v33, %s11234_s1  ;;  %8266 = vmatprep.subr.mxu0 %v3122_v40 }
 0xc5d   : > { %8267 = vmatpush3.msra.mxu0 %v3122_v40 }
 0xc60   : > { %3286 = vrot.lane.b32.xlu0 %v9934_v56, %s11240_s23 }
 0xc64   : > { %3318 = vrot.lane.b32.xlu0 %v10062_v12, %s11234_s1 }
 0xc65   : > { %v8981_v49 = vpop.eup %8980 }
 0xc66   : > { %v3095_v2 = vsel %vm1798_vm2, %v8981_v49, 0.0 }
 0xc67   : > { %3096 = vadd.xlane.f32.xlu1 %v3095_v2 }
 0xc68   : > { %3290 = vrot.lane.b32.xlu0 %v9938_v58, %s11240_s23 }
 0xc6c   : > { %3322 = vrot.lane.b32.xlu0 %v10066_v21, %s11234_s1 }
 0xc78   : > { %3117 = vrot.lane.b32.xlu1 %v9548_v27, %s11242_s28  ;;  %s11295_s28 = smov 88  }
 0xc7c   : > { %3280 = vrot.lane.b32.xlu1 %v9924_v55, %s11240_s23 }
 0xc80   : > { %3312 = vrot.lane.b32.xlu1 %v10052_v1, %s11234_s1 }
 0xc84   : > { %3284 = vrot.lane.b32.xlu1 %v9928_v51, %s11240_s23 }
 0xc88   : > { %3316 = vrot.lane.b32.xlu1 %v10056_v30, %s11234_s1 }
 0xc8c   : > { %3288 = vrot.lane.b32.xlu1 %v9932_v42, %s11240_s23 }
 0xc90   : > { %3320 = vrot.lane.b32.xlu1 %v10060_v54, %s11234_s1 }
 0xc94   : > { %3292 = vrot.lane.b32.xlu1 %v9936_v57, %s11240_s23  ;;  %s11293_s23 = smov 96  }
 0xc98   : > { %3324 = vrot.lane.b32.xlu1 %v10064_v53, %s11234_s1  ;;  %s11236_s1 = smov 24  }
 0xcad   : > { %v3082_v55 = vpop.xlane.xlu0 %3081 }
 0xcaf   : > { %v3079_v27 = vpop.xlane.xlu1 %3078 }
 0xcb0   : > { %8982 = vrcp.f32 %v3079_v27 }
 0xcb1   : > { %8984 = vrcp.f32 %v3082_v55 }
 0xcb3   : > { %v3085_v30 = vpop.xlane.xlu1 %3084 }
 0xcb4   : > { %8986 = vrcp.f32 %v3085_v30 }
 0xcb7   : > { %v3088_v56 = vpop.xlane.xlu0 %3087 }
 0xcb8   : > { %v3091_v57 = vpop.xlane.xlu1 %3090  ;;  %8988 = vrcp.f32 %v3088_v56 }
 0xcb9   : > { %8990 = vrcp.f32 %v3091_v57 }
 0xcbb   : > { %v3094_v51 = vpop.xlane.xlu0 %3093 }
 0xcbc   : > { %8992 = vrcp.f32 %v3094_v51 }
 0xcbd   : > { %v8983_v58 = vpop.eup %8982 }
 0xcbe   : > { %v3109_v1 = vmul.f32 %v8983_v58, %v10095_v43  ;;  %v8985_v54 = vpop.eup %8984 }
 0xcbf   : > { %v3100_v20 = vpop.xlane.xlu0 %3099  ;;  %v3110_v21 = vmul.f32 %v8985_v54, %v10091_v46 }
 0xcc0   : > { %8272 = vmatprep.mubr.msk.f32.mxu0 %vm1798_vm2, %v3109_v1  ;;  %8994 = vrcp.f32 %v3100_v20 }
 0xcc1   : > { %v8987_v12 = vpop.eup %8986 }
 0xcc2   : > { %v3111_v36 = vmul.f32 %v8987_v12, %v10099_v59  ;;  %v3392_v59 = vld [vmem:[%s11280_s14] sm:$0xff] }
 0xcc3   : > { %v3120_v42 = vpop.permute.xlu0 %3119 }
 0xcc4   : > { %8268 = vmatprep.subr.mxu0 %v3120_v42 }
 0xcc5   : > { %8269 = vmatpush3.msra.mxu0 %v3120_v42  ;;  %v8989_v0 = vpop.eup %8988 }
 0xcc6   : > { %v8991_v16 = vpop.eup %8990  ;;  %v3112_v37 = vmul.f32 %v8989_v0, %v10103_v31 }
 0xcc7   : > { %v3113_v32 = vmul.f32 %v8991_v16, %v10105_v63  ;;  %v3279_v24 = vpop.permute.xlu0 %3278 }
 0xcc8   : > { %v3366_v42 = vsel %vm1070_vm0, %v9774_v4, %v3279_v24 }
 0xcc9   : > { %v8993_v25 = vpop.eup %8992 }
 0xcca   : > { %v3114_v47 = vmul.f32 %v8993_v25, %v10111_v61 }
 0xccb   : > { %v3311_v62 = vpop.permute.xlu0 %3310 }
 0xccc   : > { %v3375_v30 = vsel %vm3374_vm3, %v3366_v42, %v3311_v62 }
 0xccd   : > { %v8995_v46 = vpop.eup %8994 }
 0xcce   : > { %v3116_v43 = vmul.f32 %v8995_v46, %v10115_v17 }
 0xccf   : > { %v3283_v29 = vpop.permute.xlu0 %3282 }
 0xcd0   : > { %v3368_v0 = vsel %vm1070_vm0, %v9778_v6, %v3283_v29 }
 0xcd3   : > { %v3315_v40 = vpop.permute.xlu0 %3314 }
 0xcd4   : > { %v3377_v4 = vsel %vm3374_vm3, %v3368_v0, %v3315_v40 }
 0xcd7   : > { %v3287_v2 = vpop.permute.xlu0 %3286 }
 0xcd8   : > { %v3370_v6 = vsel %vm1070_vm0, %v9782_v8, %v3287_v2  ;;  %v3730_v2 = vld [vmem:[%s11281_s6 + $0x30] sm:$0xff] }
 0xcdb   : > { %v3319_v55 = vpop.permute.xlu0 %3318 }
 0xcdc   : > { %v3379_v46 = vsel %vm3374_vm3, %v3370_v6, %v3319_v55 }
 0xcdf   : > { %v3291_v51 = vpop.permute.xlu0 %3290 }
 0xce0   : > { %v3372_v8 = vsel %vm1070_vm0, %v9786_v13, %v3291_v51  ;;  %v3579_v13 = vld [vmem:[%s9302_s24 + $0x38] sm:$0xff] }
 0xce1   : > { %8304 = vmatprep.subr.mxu1 %v3579_v13 }
 0xce2   : > { %8305 = vmatpush3.msra.mxu1 %v3579_v13 }
 0xce3   : > { %v3323_v1 = vpop.permute.xlu0 %3322 }
 0xcf0   : > { %v3097_v33 = vpop.xlane.xlu1 %3096 }
 0xcf1   : > { %8996 = vrcp.f32 %v3097_v33 }
 0xcf4   : > { %v3118_v53 = vpop.permute.xlu1 %3117 }
 0xcf5   : > { %8270 = vmatprep.subr.mxu0 %v3118_v53 }
 0xcf6   : > { %8271 = vmatpush3.msra.mxu0 %v3118_v53 }
 0xcf7   : > { %8273 = vmatmul.mubr.msk.f32.vlgmr.msra.gmra.mxu0 %vm1798_vm2, %v3110_v21  ;;  %8284 = vmatprep.subr.mxu0 %v3395_v26 }
 0xcf8   : > { %8275 = vmatprep.mubr.msk.f32.mxu0 %vm1798_vm2, %v3111_v36  ;;  %8285 = vmatpush3.msra.mxu0 %v3395_v26  ;;  %v3281_v17 = vpop.permute.xlu1 %3280 }
 0xcf9   : > { %8286 = vmatprep.subr.mxu0 %v3394_v52  ;;  %v3367_v57 = vsel %vm1070_vm0, %v9772_v3, %v3281_v17  ;;  %v7305_v17 = vld [vmem:[%s11289_s19] ss:$0 sm:$0xff]  ;;  %s9132_s19 = scalar_lea.vmem %s9131_s17, 1024 }
 0xcfa   : > { %8287 = vmatpush3.msra.mxu0 %v3394_v52 }
 0xcfb   : > { %8276 = vmatmul.mubr.msk.f32.gmra.mxu0 %vm1798_vm2, %v3112_v37  ;;  %8288 = vmatprep.subr.mxu0 %v3393_v28 }
 0xcfc   : > { %8278 = vmatprep.mubr.msk.f32.mxu0 %vm1798_vm2, %v3113_v32  ;;  %8289 = vmatpush3.msra.mxu0 %v3393_v28  ;;  %v3313_v45 = vpop.permute.xlu1 %3312 }
 0xcfd   : > { %8290 = vmatprep.subr.mxu0 %v3392_v59  ;;  %v3376_v54 = vsel %vm3374_vm3, %v3367_v57, %v3313_v45 }
 0xcfe   : > { %v8997_v44 = vpop.eup %8996  ;;  %8291 = vmatpush3.msra.mxu0 %v3392_v59 }
 0xcff   : > { %8279 = vmatmul.mubr.msk.f32.gmra.mxu0 %vm1798_vm2, %v3114_v47  ;;  %v3115_v48 = vmul.f32 %v8997_v44, %v8981_v49 }
 0xd00   : > { %v3285_v41 = vpop.permute.xlu1 %3284 }
 0xd01   : > { %8281 = vmatprep.mubr.msk.f32.mxu0 %vm1798_vm2, %v3115_v48  ;;  %v3369_v3 = vsel %vm1070_vm0, %v9776_v5, %v3285_v41 }
 0xd03   : > { %8282 = vmatmul.mubr.msk.f32.gmra.mxu0 %vm1798_vm2, %v3116_v43 }
 0xd04   : > { %v3317_v34 = vpop.permute.xlu1 %3316 }
 0xd05   : > { %v3378_v16 = vsel %vm3374_vm3, %v3369_v3, %v3317_v34 }
 0xd08   : > { %v3289_v49 = vpop.permute.xlu1 %3288 }
 0xd09   : > { %v3371_v5 = vsel %vm1070_vm0, %v9780_v7, %v3289_v49  ;;  %v3381_v7 = vsel %vm3374_vm3, %v3372_v8, %v3323_v1  ;;  %v3731_v49 = vld [vmem:[%s11281_s6 + $0x38] sm:$0xff]  ;;  %v3728_v1 = vld [vmem:[%s11281_s6 + $0x20] sm:$0xff] }
 0xd0a   : > { %8332 = vmatprep.subr.mxu0 %v3731_v49  ;;  %v3724_v8 = vld [vmem:[%s11281_s6] sm:$0xff] }
 0xd0c   : > { %v3321_v27 = vpop.permute.xlu1 %3320 }
 0xd0d   : > { %v3380_v44 = vsel %vm3374_vm3, %v3371_v5, %v3321_v27 }
 0xd10   : > { %v3293_v56 = vpop.permute.xlu1 %3292 }
 0xd11   : > { %v3373_v52 = vsel %vm1070_vm0, %v9784_v9, %v3293_v56  ;;  %v3576_v9 = vld [vmem:[%s9302_s24 + $0x20] sm:$0xff]  ;;  %v3729_v56 = vld [vmem:[%s11281_s6 + $0x28] sm:$0xff] }
 0xd14   : > { %v3325_v58 = vpop.permute.xlu1 %3324 }
 0xd15   : > { %v3382_v59 = vsel %vm3374_vm3, %v3373_v52, %v3325_v58 }
 0xdb7   : > { %v8274_v35 = vpop.f32.mrf.mxu0 }
 0xdb8   : > { %3344 = vrot.lane.b32.xlu1 %v8274_v35, %s11236_s1 }
 0xdb9   : > { %v3231_v50 = vpop.f32.mrf.mxu0 }
 0xdba   : > { %3342 = vrot.lane.b32.xlu0 %v3231_v50, %s11236_s1 }
 0xdbb   : > { %v8277_v31 = vpop.f32.mrf.mxu0 }
 0xdbc   : > { %3348 = vrot.lane.b32.xlu1 %v8277_v31, %s11236_s1  ;;  %v3578_v31 = vld [vmem:[%s9302_s24 + $0x30] sm:$0xff] }
 0xdbd   : > { %v3241_v63 = vpop.f32.mrf.mxu0  ;;  %8306 = vmatprep.subr.mxu1 %v3578_v31 }
 0xdbe   : > { %3346 = vrot.lane.b32.xlu0 %v3241_v63, %s11236_s1  ;;  %v3577_v63 = vld [vmem:[%s9302_s24 + $0x28] sm:$0xff]  ;;  %8307 = vmatpush3.msra.mxu1 %v3578_v31 }
 0xdbf   : > { %v8280_v60 = vpop.f32.mrf.mxu0  ;;  %8308 = vmatprep.subr.mxu1 %v3577_v63 }
 0xdc0   : > { %3352 = vrot.lane.b32.xlu1 %v8280_v60, %s11236_s1  ;;  %8309 = vmatpush3.msra.mxu1 %v3577_v63  ;;  %v3575_v60 = vld [vmem:[%s9302_s24 + $0x18] sm:$0xff] }
 0xdc1   : > { %v3251_v38 = vpop.f32.mrf.mxu0  ;;  %8310 = vmatprep.subr.mxu1 %v3576_v9 }
 0xdc2   : > { %3350 = vrot.lane.b32.xlu0 %v3251_v38, %s11236_s1  ;;  %8311 = vmatpush3.msra.mxu1 %v3576_v9  ;;  %v3574_v38 = vld [vmem:[%s9302_s24 + $0x10] sm:$0xff] }
 0xdc3   : > { %v8283_v61 = vpop.f32.mrf.mxu0  ;;  %8312 = vmatprep.subr.mxu1 %v3575_v60 }
 0xdc4   : > { %3356 = vrot.lane.b32.xlu1 %v8283_v61, %s11236_s1  ;;  %8313 = vmatpush3.msra.mxu1 %v3575_v60  ;;  %v3573_v61 = vld [vmem:[%s9302_s24 + $0x8] sm:$0xff] }
 0xdc5   : > { %v3261_v39 = vpop.f32.mrf.mxu0  ;;  %8314 = vmatprep.subr.mxu1 %v3574_v38 }
 0xdc6   : > { %3354 = vrot.lane.b32.xlu0 %v3261_v39, %s11236_s1  ;;  %8315 = vmatpush3.msra.mxu1 %v3574_v38  ;;  %v3572_v39 = vld [vmem:[%s9302_s24] sm:$0xff]  ;;  %s11238_s1 = smov 32  }
 0xdc7   : > { %8316 = vmatprep.subr.mxu1 %v3573_v61 }
 0xdc8   : > { %8317 = vmatpush3.msra.mxu1 %v3573_v61 }
 0xdc9   : > { %8318 = vmatprep.subr.mxu1 %v3572_v39 }
 0xdca   : > { %8319 = vmatpush3.msra.mxu1 %v3572_v39 }
 0xe2a   : > { %v3345_v20 = vpop.permute.xlu1 %3344 }
 0xe2b   : > { %v3385_v53 = vsel %vm3383_vm4, %v3376_v54, %v3345_v20 }
 0xe2c   : > { %v3343_v33 = vpop.permute.xlu0 %3342 }
 0xe2d   : > { %v3384_v12 = vsel %vm3383_vm4, %v3375_v30, %v3343_v33 }
 0xe2e   : > { %8292 = vmatprep.mubr.msk.f32.mxu0 %vm1219_vm1, %v3384_v12  ;;  %v3349_v21 = vpop.permute.xlu1 %3348 }
 0xe2f   : > { %8293 = vmatmul.mubr.msk.f32.vlgmr.msra.gmra.mxu0 %vm1219_vm1, %v3385_v53  ;;  %v3387_v25 = vsel %vm3383_vm4, %v3378_v16, %v3349_v21 }
 0xe30   : > { %v3347_v36 = vpop.permute.xlu0 %3346  ;;  %8333 = vmatpush3.msra.mxu0 %v3731_v49 }
 0xe31   : > { %v3386_v37 = vsel %vm3383_vm4, %v3377_v4, %v3347_v36  ;;  %8334 = vmatprep.subr.mxu0 %v3730_v2 }
 0xe32   : > { %8295 = vmatprep.mubr.msk.f32.mxu0 %vm1219_vm1, %v3386_v37  ;;  %v3353_v32 = vpop.permute.xlu1 %3352  ;;  %8335 = vmatpush3.msra.mxu0 %v3730_v2 }
 0xe33   : > { %8296 = vmatmul.mubr.msk.f32.gmra.mxu0 %vm1219_vm1, %v3387_v25  ;;  %v3389_v43 = vsel %vm3383_vm4, %v3380_v44, %v3353_v32  ;;  %8336 = vmatprep.subr.mxu0 %v3729_v56  ;;  %v3727_v44 = vld [vmem:[%s11281_s6 + $0x18] sm:$0xff] }
 0xe34   : > { %v3351_v47 = vpop.permute.xlu0 %3350  ;;  %8337 = vmatpush3.msra.mxu0 %v3729_v56  ;;  %v3877_v56 = vld [vmem:[%s9322_s20 + $0x8] sm:$0xff] }
 0xe35   : > { %v3388_v48 = vsel %vm3383_vm4, %v3379_v46, %v3351_v47  ;;  %8338 = vmatprep.subr.mxu0 %v3728_v1 }
 0xe36   : > { %8298 = vmatprep.mubr.msk.f32.mxu0 %vm1219_vm1, %v3388_v48  ;;  %v3357_v26 = vpop.permute.xlu1 %3356  ;;  %8339 = vmatpush3.msra.mxu0 %v3728_v1  ;;  %v3726_v48 = vld [vmem:[%s11281_s6 + $0x10] sm:$0xff] }
 0xe37   : > { %8299 = vmatmul.mubr.msk.f32.gmra.mxu0 %vm1219_vm1, %v3389_v43  ;;  %v3391_v50 = vsel %vm3383_vm4, %v3382_v59, %v3357_v26  ;;  %8340 = vmatprep.subr.mxu0 %v3727_v44  ;;  %v3725_v43 = vld [vmem:[%s11281_s6 + $0x8] sm:$0xff]  ;;  %v3879_v26 = vld [vmem:[%s9322_s20 + $0x18] sm:$0xff]  ;;  %s11311_s6 = smov 32  }
 0xe38   : > { %v3355_v28 = vpop.permute.xlu0 %3354  ;;  %8341 = vmatpush3.msra.mxu0 %v3727_v44  ;;  %8360 = vmatprep.subr.mxu1 %v3879_v26 }
 0xe39   : > { %v3390_v35 = vsel %vm3383_vm4, %v3381_v7, %v3355_v28  ;;  %8342 = vmatprep.subr.mxu0 %v3726_v48  ;;  %v3878_v7 = vld [vmem:[%s9322_s20 + $0x10] sm:$0xff] }
 0xe3a   : > { %8301 = vmatprep.mubr.msk.f32.mxu0 %vm1219_vm1, %v3390_v35  ;;  %8343 = vmatpush3.msra.mxu0 %v3726_v48 }
 0xe3b   : > { %8302 = vmatmul.mubr.msk.f32.gmra.mxu0 %vm1219_vm1, %v3391_v50  ;;  %8344 = vmatprep.subr.mxu0 %v3725_v43 }
 0xe3c   : > { %8345 = vmatpush3.msra.mxu0 %v3725_v43 }
 0xe3d   : > { %8346 = vmatprep.subr.mxu0 %v3724_v8 }
 0xe3e   : > { %8347 = vmatpush3.msra.mxu0 %v3724_v8 }
 0xeef   : > { %v8294_v24 = vpop.f32.mrf.mxu0 }
 0xef0   : > { %v3499_v45 = vadd.f32 %v8294_v24, %v7305_v17 }
 0xef1   : > { %v3493_v62 = vpop.f32.mrf.mxu0 }
 0xef2   : > { %v3494_v41 = vadd.f32 %v7305_v17, %v3493_v62  ;;  %3542 = vrot.lane.b32.xlu1 %v3499_v45, %s11238_s1 }
 0xef3   : > { %v8297_v29 = vpop.f32.mrf.mxu0 }
 0xef4   : > { %v3509_v34 = vadd.f32 %v8297_v29, %v7305_v17  ;;  %3540 = vrot.lane.b32.xlu0 %v3494_v41, %s11238_s1 }
 0xef5   : > { %v3503_v40 = vpop.f32.mrf.mxu0 }
 0xef6   : > { %v3504_v27 = vadd.f32 %v7305_v17, %v3503_v40  ;;  %3546 = vrot.lane.b32.xlu1 %v3509_v34, %s11238_s1 }
 0xef7   : > { %v8300_v55 = vpop.f32.mrf.mxu0 }
 0xef8   : > { %v3519_v51 = vadd.f32 %v8300_v55, %v7305_v17  ;;  %3544 = vrot.lane.b32.xlu0 %v3504_v27, %s11238_s1 }
 0xef9   : > { %v3513_v58 = vpop.f32.mrf.mxu0 }
 0xefa   : > { %v3514_v20 = vadd.f32 %v7305_v17, %v3513_v58  ;;  %3550 = vrot.lane.b32.xlu1 %v3519_v51, %s11238_s1  ;;  %v3876_v51 = vld [vmem:[%s9322_s20] sm:$0xff] }
 0xefb   : > { %v8303_v42 = vpop.f32.mrf.mxu0 }
 0xefc   : > { %v3529_v30 = vadd.f32 %v8303_v42, %v7305_v17  ;;  %3548 = vrot.lane.b32.xlu0 %v3514_v20, %s11238_s1 }
 0xefd   : > { %v3523_v57 = vpop.f32.mrf.mxu0 }
 0xefe   : > { %v3524_v33 = vadd.f32 %v7305_v17, %v3523_v57  ;;  %3554 = vrot.lane.b32.xlu1 %v3529_v30, %s11238_s1 }
 0xf00   : > { %3552 = vrot.lane.b32.xlu0 %v3524_v33, %s11238_s1  ;;  %s11290_s1 = sld [smem:[#allocation13_spill]] }
 0xf06   : > { %v7314_v52 = vld [vmem:[%s11290_s1] ss:$0 sm:$0xff]  ;;  %s11291_s1 = sld [smem:[#allocation15_spill]] }
 0xf0c   : > { %v7323_v58 = vld [vmem:[%s11291_s1] ss:$0 sm:$0xff]  ;;  %s11292_s1 = sld [smem:[#allocation16_spill]] }
 0xf64   : > { %v3543_v54 = vpop.permute.xlu1 %3542 }
 0xf65   : > { %v3565_v21 = vsel %vm1219_vm1, %v9517_v11, %v3543_v54 }
 0xf66   : > { %v3541_v12 = vpop.permute.xlu0 %3540 }
 0xf67   : > { %v3564_v53 = vsel %vm1219_vm1, %v9515_v10, %v3541_v12 }
 0xf68   : > { %8320 = vmatprep.mubr.msk.f32.mxu1 %vm1798_vm2, %v3564_v53  ;;  %v3547_v0 = vpop.permute.xlu1 %3546 }
 0xf69   : > { %8321 = vmatmul.mubr.msk.f32.vlgmr.msra.gmra.mxu1 %vm1798_vm2, %v3565_v21  ;;  %v3567_v36 = vsel %vm1219_vm1, %v9525_v15, %v3547_v0 }
 0xf6a   : > { %v3545_v4 = vpop.permute.xlu0 %3544  ;;  %8361 = vmatpush3.msra.mxu1 %v3879_v26 }
 0xf6b   : > { %v3566_v3 = vsel %vm1219_vm1, %v9523_v14, %v3545_v4  ;;  %8362 = vmatprep.subr.mxu1 %v3878_v7 }
 0xf6c   : > { %8323 = vmatprep.mubr.msk.f32.mxu1 %vm1798_vm2, %v3566_v3  ;;  %v3551_v16 = vpop.permute.xlu1 %3550  ;;  %8363 = vmatpush3.msra.mxu1 %v3878_v7 }
 0xf6d   : > { %8324 = vmatmul.mubr.msk.f32.gmra.mxu1 %vm1798_vm2, %v3567_v36  ;;  %v3569_v32 = vsel %vm1219_vm1, %v9533_v19, %v3551_v16  ;;  %8364 = vmatprep.subr.mxu1 %v3877_v56 }
 0xf6e   : > { %v3549_v37 = vpop.permute.xlu0 %3548  ;;  %8365 = vmatpush3.msra.mxu1 %v3877_v56 }
 0xf6f   : > { %v3568_v25 = vsel %vm1219_vm1, %v9531_v18, %v3549_v37  ;;  %8366 = vmatprep.subr.mxu1 %v3876_v51 }
 0xf70   : > { %8326 = vmatprep.mubr.msk.f32.mxu1 %vm1798_vm2, %v3568_v25  ;;  %v3555_v6 = vpop.permute.xlu1 %3554  ;;  %8367 = vmatpush3.msra.mxu1 %v3876_v51 }
 0xf71   : > { %8327 = vmatmul.mubr.msk.f32.gmra.mxu1 %vm1798_vm2, %v3569_v32  ;;  %v3571_v47 = vsel %vm1219_vm1, %v9541_v23, %v3555_v6 }
 0xf72   : > { %v3553_v46 = vpop.permute.xlu0 %3552 }
 0xf73   : > { %v3570_v5 = vsel %vm1219_vm1, %v9539_v22, %v3553_v46 }
 0xf74   : > { %8329 = vmatprep.mubr.msk.f32.mxu1 %vm1798_vm2, %v3570_v5 }
 0xf75   : > { %8330 = vmatmul.mubr.msk.f32.gmra.mxu1 %vm1798_vm2, %v3571_v47 }
0x1029   : > { %v8322_v28 = vpop.f32.mrf.mxu1 }
0x102a   : > { %v3683_v59 = vadd.f32 %v8322_v28, %v7314_v52 }
0x102b   : > { %v3677_v35 = vpop.f32.mrf.mxu1 }
0x102c   : > { %v3678_v50 = vadd.f32 %v7314_v52, %v3677_v35  ;;  %v3717_v63 = vmax.f32 %v3683_v59, 0.0 }
0x102d   : > { %v8325_v13 = vpop.f32.mrf.mxu1 }
0x102e   : > { %v3716_v31 = vmax.f32 %v3678_v50, 0.0  ;;  %v3693_v9 = vadd.f32 %v8325_v13, %v7314_v52 }
0x102f   : > { %v3687_v60 = vpop.f32.mrf.mxu1 }
0x1030   : > { %v3688_v38 = vadd.f32 %v7314_v52, %v3687_v60  ;;  %8348 = vmatprep.mubr.msk.f32.mxu0 %vm1798_vm2, %v3716_v31  ;;  %v3719_v17 = vmax.f32 %v3693_v9, 0.0 }
0x1031   : > { %v8328_v61 = vpop.f32.mrf.mxu1  ;;  %8349 = vmatmul.mubr.msk.f32.vlgmr.msra.gmra.mxu0 %vm1798_vm2, %v3717_v63 }
0x1032   : > { %v3718_v39 = vmax.f32 %v3688_v38, 0.0  ;;  %v3703_v24 = vadd.f32 %v8328_v61, %v7314_v52 }
0x1033   : > { %v3697_v45 = vpop.f32.mrf.mxu1 }
0x1034   : > { %v3698_v62 = vadd.f32 %v7314_v52, %v3697_v45  ;;  %8351 = vmatprep.mubr.msk.f32.mxu0 %vm1798_vm2, %v3718_v39  ;;  %v3721_v34 = vmax.f32 %v3703_v24, 0.0 }
0x1035   : > { %v8331_v41 = vpop.f32.mrf.mxu1  ;;  %8352 = vmatmul.mubr.msk.f32.gmra.mxu0 %vm1798_vm2, %v3719_v17 }
0x1036   : > { %v3720_v29 = vmax.f32 %v3698_v62, 0.0  ;;  %v3713_v40 = vadd.f32 %v8331_v41, %v7314_v52 }
0x1037   : > { %v3707_v49 = vpop.f32.mrf.mxu1 }
0x1038   : > { %v3708_v2 = vadd.f32 %v7314_v52, %v3707_v49  ;;  %8354 = vmatprep.mubr.msk.f32.mxu0 %vm1798_vm2, %v3720_v29  ;;  %v3723_v55 = vmax.f32 %v3713_v40, 0.0 }
0x1039   : > { %8355 = vmatmul.mubr.msk.f32.gmra.mxu0 %vm1798_vm2, %v3721_v34 }
0x103a   : > { %v3722_v27 = vmax.f32 %v3708_v2, 0.0 }
0x103c   : > { %8357 = vmatprep.mubr.msk.f32.mxu0 %vm1798_vm2, %v3722_v27 }
0x103d   : > { %8358 = vmatmul.mubr.msk.f32.gmra.mxu0 %vm1798_vm2, %v3723_v55 }
0x10f1   : > { %v8350_v1 = vpop.f32.mrf.mxu0 }
0x10f2   : > { %v3835_v20 = vadd.f32 %v8350_v1, %v7323_v58 }
0x10f3   : > { %v3829_v42 = vpop.f32.mrf.mxu0 }
0x10f4   : > { %v3830_v30 = vadd.f32 %v7323_v58, %v3829_v42  ;;  %v10291_v54 = vadd.f32 %v3835_v20, %v9517_v11 }
0x10f5   : > { %v8353_v57 = vpop.f32.mrf.mxu0 }
0x10f6   : > { %v10288_v33 = vadd.f32 %v3830_v30, %v9515_v10  ;;  %v3845_v12 = vadd.f32 %v8353_v57, %v7323_v58 }
0x10f7   : > { %v3839_v53 = vpop.f32.mrf.mxu0 }
0x10f8   : > { %v3840_v21 = vadd.f32 %v7323_v58, %v3839_v53  ;;  %8368 = vmatprep.mubr.msk.f32.mxu1 %vm1219_vm1, %v10288_v33  ;;  %v10301_v3 = vadd.f32 %v3845_v12, %v9525_v15 }
0x10f9   : > { %v8356_v0 = vpop.f32.mrf.mxu0  ;;  %8369 = vmatmul.mubr.msk.f32.vlgmr.msra.gmra.mxu1 %vm1219_vm1, %v10291_v54 }
0x10fa   : > { %v10298_v4 = vadd.f32 %v3840_v21, %v9523_v14  ;;  %v3855_v10 = vadd.f32 %v8356_v0, %v7323_v58 }
0x10fb   : > { %v3849_v36 = vpop.f32.mrf.mxu0 }
0x10fc   : > { %v3850_v11 = vadd.f32 %v7323_v58, %v3849_v36  ;;  %8371 = vmatprep.mubr.msk.f32.mxu1 %vm1219_vm1, %v10298_v4  ;;  %v10311_v14 = vadd.f32 %v3855_v10, %v9533_v19  ;;  %v7332_v19 = vld [vmem:[%s11292_s1] ss:$0 sm:$0xff]  ;;  %s11294_s1 = smov 64  }
0x10fd   : > { %v8359_v16 = vpop.f32.mrf.mxu0  ;;  %8372 = vmatmul.mubr.msk.f32.gmra.mxu1 %vm1219_vm1, %v10301_v3 }
0x10fe   : > { %v10308_v37 = vadd.f32 %v3850_v11, %v9531_v18  ;;  %v3865_v25 = vadd.f32 %v8359_v16, %v7323_v58 }
0x10ff   : > { %v3859_v15 = vpop.f32.mrf.mxu0 }
0x1100   : > { %v3860_v32 = vadd.f32 %v7323_v58, %v3859_v15  ;;  %8374 = vmatprep.mubr.msk.f32.mxu1 %vm1219_vm1, %v10308_v37  ;;  %v10321_v46 = vadd.f32 %v3865_v25, %v9541_v23 }
0x1101   : > { %8375 = vmatmul.mubr.msk.f32.gmra.mxu1 %vm1219_vm1, %v10311_v14 }
0x1102   : > { %v10318_v6 = vadd.f32 %v3860_v32, %v9539_v22 }
0x1104   : > { %8377 = vmatprep.mubr.msk.f32.mxu1 %vm1219_vm1, %v10318_v6 }
0x1105   : > { %8378 = vmatmul.mubr.msk.f32.gmra.mxu1 %vm1219_vm1, %v10321_v46 }
0x11b9   : > { %v8370_v18 = vpop.f32.mrf.mxu1 }
0x11ba   : > { %v10354_v50 = vadd.f32 %v8370_v18, %v7332_v19 }
0x11bb   : > { %v3977_v5 = vpop.f32.mrf.mxu1 }
0x11bc   : > { %v10328_v47 = vadd.f32 %v7332_v19, %v3977_v5 }
0x11bd   : > { %v8373_v44 = vpop.f32.mrf.mxu1 }
0x11be   : > { %8396 = vmatprep.mubr.msk.f32.mxu0 %vm1070_vm0, %v10328_v47  ;;  %v10346_v59 = vadd.f32 %v8373_v44, %v7332_v19 }
0x11bf   : > { %v3987_v22 = vpop.f32.mrf.mxu1 }
0x11c0   : > { %v10350_v35 = vadd.f32 %v7332_v19, %v3987_v22 }
0x11c1   : > { %v8376_v48 = vpop.f32.mrf.mxu1 }
0x11c2   : > { %v10338_v52 = vadd.f32 %v8376_v48, %v7332_v19 }
0x11c3   : > { %v3997_v43 = vpop.f32.mrf.mxu1 }
0x11c4   : > { %v10342_v28 = vadd.f32 %v7332_v19, %v3997_v43 }
0x11c5   : > { %v8379_v23 = vpop.f32.mrf.mxu1 }
0x11c6   : > { %v10332_v8 = vadd.f32 %v8379_v23, %v7332_v19 }
0x11c7   : > { %v4007_v26 = vpop.f32.mrf.mxu1 }
0x11c8   : > { %v10334_v7 = vadd.f32 %v7332_v19, %v4007_v26  ;;  %4038 = vrot.lane.b32.xlu0 %v10332_v8, %s11293_s23 }
0x11ca   : > { %4036 = vrot.lane.b32.xlu1 %v10334_v7, %s11293_s23 }
0x11cc   : > { %4034 = vrot.lane.b32.xlu0 %v10338_v52, %s11293_s23 }
0x11ce   : > { %4032 = vrot.lane.b32.xlu1 %v10342_v28, %s11293_s23 }
0x11d0   : > { %4030 = vrot.lane.b32.xlu0 %v10346_v59, %s11293_s23 }
0x11d2   : > { %4028 = vrot.lane.b32.xlu1 %v10350_v35, %s11293_s23 }
0x11d4   : > { %4026 = vrot.lane.b32.xlu0 %v10354_v50, %s11293_s23 }
0x11d6   : > { %4024 = vrot.lane.b32.xlu1 %v10328_v47, %s11293_s23  ;;  %s11296_s23 = smov 120  }
0x11d8   : > { %4271 = vrot.lane.b32.xlu0 %v10346_v59, %s11294_s1 }
0x11da   : > { %4279 = vrot.lane.b32.xlu1 %v10332_v8, %s11294_s1 }
0x11dc   : > { %4267 = vrot.lane.b32.xlu0 %v10354_v50, %s11294_s1 }
0x11de   : > { %4275 = vrot.lane.b32.xlu1 %v10338_v52, %s11294_s1 }
0x11e0   : > { %4448 = vrot.lane.b32.xlu0 %v10332_v8, %s11295_s28 }
0x11e2   : > { %4273 = vrot.lane.b32.xlu1 %v10342_v28, %s11294_s1 }
0x11e4   : > { %4277 = vrot.lane.b32.xlu0 %v10334_v7, %s11294_s1 }
0x11e6   : > { %4269 = vrot.lane.b32.xlu1 %v10350_v35, %s11294_s1 }
0x11ea   : > { %4265 = vrot.lane.b32.xlu1 %v10328_v47, %s11294_s1  ;;  %s11298_s1 = smov 80  }
0x11ee   : > { %4446 = vrot.lane.b32.xlu1 %v10334_v7, %s11295_s28 }
0x123a   : > { %v4039_v13 = vpop.permute.xlu0 %4038 }
0x123b   : > { %8380 = vmatprep.subr.msk.mxu0 %vm1070_vm0, %v4039_v13 }
0x123c   : > { %8381 = vmatpush3.xpose.msk.msra.mxu0 %vm1070_vm0, %v4039_v13  ;;  %v4037_v31 = vpop.permute.xlu1 %4036 }
0x123d   : > { %8382 = vmatprep.subr.msk.mxu0 %vm1070_vm0, %v4037_v31 }
0x123e   : > { %v4035_v63 = vpop.permute.xlu0 %4034 }
0x1240   : > { %8383 = vmatpush3.xpose.msk.msra.mxu0 %vm1070_vm0, %v4037_v31  ;;  %v4033_v9 = vpop.permute.xlu1 %4032 }
0x1241   : > { %8384 = vmatprep.subr.msk.mxu0 %vm1070_vm0, %v4035_v63 }
0x1242   : > { %v4031_v60 = vpop.permute.xlu0 %4030 }
0x1244   : > { %8385 = vmatpush3.xpose.msk.msra.mxu0 %vm1070_vm0, %v4035_v63  ;;  %v4029_v38 = vpop.permute.xlu1 %4028 }
0x1245   : > { %8386 = vmatprep.subr.msk.mxu0 %vm1070_vm0, %v4033_v9 }
0x1246   : > { %v4027_v61 = vpop.permute.xlu0 %4026 }
0x1248   : > { %8387 = vmatpush3.xpose.msk.msra.mxu0 %vm1070_vm0, %v4033_v9  ;;  %v4025_v39 = vpop.permute.xlu1 %4024 }
0x1249   : > { %8388 = vmatprep.subr.msk.mxu0 %vm1070_vm0, %v4031_v60 }
0x124a   : > { %v4272_v17 = vpop.permute.xlu0 %4271 }
0x124c   : > { %8389 = vmatpush3.xpose.msk.msra.mxu0 %vm1070_vm0, %v4031_v60  ;;  %v4280_v24 = vpop.permute.xlu1 %4279 }
0x124d   : > { %8390 = vmatprep.subr.msk.mxu0 %vm1070_vm0, %v4029_v38  ;;  %8408 = vmatprep.subr.mxu1 %v4280_v24 }
0x124e   : > { %v4268_v45 = vpop.permute.xlu0 %4267  ;;  %8409 = vmatpush3.msra.mxu1 %v4280_v24 }
0x1250   : > { %8391 = vmatpush3.xpose.msk.msra.mxu0 %vm1070_vm0, %v4029_v38  ;;  %v4276_v62 = vpop.permute.xlu1 %4275 }
0x1251   : > { %8392 = vmatprep.subr.msk.mxu0 %vm1070_vm0, %v4027_v61 }
0x1252   : > { %v10395_v41 = vpop.permute.xlu0 %4448 }
0x1254   : > { %8393 = vmatpush3.xpose.msk.msra.mxu0 %vm1070_vm0, %v4027_v61  ;;  %v4274_v29 = vpop.permute.xlu1 %4273 }
0x1255   : > { %8394 = vmatprep.subr.msk.mxu0 %vm1070_vm0, %v4025_v39 }
0x1256   : > { %v4278_v34 = vpop.permute.xlu0 %4277 }
0x1257   : > { %8410 = vmatprep.subr.mxu1 %v4278_v34 }
0x1258   : > { %8395 = vmatpush3.xpose.msk.msra.mxu0 %vm1070_vm0, %v4025_v39  ;;  %8411 = vmatpush3.msra.mxu1 %v4278_v34  ;;  %v4270_v40 = vpop.permute.xlu1 %4269 }
0x1259   : > { %8412 = vmatprep.subr.mxu1 %v4276_v62 }
0x125a   : > { %8413 = vmatpush3.msra.mxu1 %v4276_v62 }
0x125b   : > { %8397 = vmatmul.mubr.msk.f32.vlgmr.msra.gmra.mxu0 %vm1070_vm0, %v10354_v50  ;;  %8414 = vmatprep.subr.mxu1 %v4274_v29 }
0x125c   : > { %8399 = vmatprep.mubr.msk.f32.mxu0 %vm1070_vm0, %v10350_v35  ;;  %8415 = vmatpush3.msra.mxu1 %v4274_v29  ;;  %v4266_v49 = vpop.permute.xlu1 %4265 }
0x125d   : > { %8416 = vmatprep.subr.mxu1 %v4272_v17 }
0x125e   : > { %8417 = vmatpush3.msra.mxu1 %v4272_v17 }
0x125f   : > { %8400 = vmatmul.mubr.msk.f32.gmra.mxu0 %vm1070_vm0, %v10346_v59  ;;  %8418 = vmatprep.subr.mxu1 %v4270_v40 }
0x1260   : > { %8402 = vmatprep.mubr.msk.f32.mxu0 %vm1070_vm0, %v10342_v28  ;;  %8419 = vmatpush3.msra.mxu1 %v4270_v40  ;;  %v10428_v36 = vpop.permute.xlu1 %4446 }
0x1261   : > { %8420 = vmatprep.subr.mxu1 %v4268_v45 }
0x1262   : > { %8421 = vmatpush3.msra.mxu1 %v4268_v45 }
0x1263   : > { %8403 = vmatmul.mubr.msk.f32.gmra.mxu0 %vm1070_vm0, %v10338_v52  ;;  %8422 = vmatprep.subr.mxu1 %v4266_v49 }
0x1264   : > { %8405 = vmatprep.mubr.msk.f32.mxu0 %vm1070_vm0, %v10334_v7  ;;  %8423 = vmatpush3.msra.mxu1 %v4266_v49 }
0x1265   : > { %8436 = vmatprep.subr.msk.mxu1 %vm1070_vm0, %v10395_v41 }
0x1267   : > { %8406 = vmatmul.mubr.msk.f32.gmra.mxu0 %vm1070_vm0, %v10332_v8 }
0x131b   : > { %v8398_v2 = vpop.f32.mrf.mxu0 }
0x131c   : > { %v4180_v27 = vsel %vm1798_vm2, %v8398_v2, -inf }
0x131d   : > { %4181 = vmax.xlane.f32.xlu1 %v4180_v27  ;;  %v4138_v55 = vpop.f32.mrf.mxu0 }
0x131e   : > { %v4177_v56 = vsel %vm1798_vm2, %v4138_v55, -inf }
0x131f   : > { %4178 = vmax.xlane.f32.xlu0 %v4177_v56  ;;  %v8401_v51 = vpop.f32.mrf.mxu0 }
0x1320   : > { %v4186_v1 = vsel %vm1798_vm2, %v8401_v51, -inf }
0x1321   : > { %v4148_v58 = vpop.f32.mrf.mxu0 }
0x1322   : > { %v4183_v30 = vsel %vm1798_vm2, %v4148_v58, -inf }
0x1323   : > { %4187 = vmax.xlane.f32.xlu0 %v4186_v1  ;;  %v8404_v20 = vpop.f32.mrf.mxu0 }
0x1324   : > { %v4192_v21 = vsel %vm1798_vm2, %v8404_v20, -inf }
0x1325   : > { %v4158_v42 = vpop.f32.mrf.mxu0 }
0x1326   : > { %v4189_v57 = vsel %vm1798_vm2, %v4158_v42, -inf }
0x1327   : > { %4184 = vmax.xlane.f32.xlu0 %v4183_v30  ;;  %4190 = vmax.xlane.f32.xlu1 %v4189_v57  ;;  %v8407_v12 = vpop.f32.mrf.mxu0 }
0x1328   : > { %v4198_v10 = vsel %vm1798_vm2, %v8407_v12, -inf }
0x1329   : > { %v4168_v53 = vpop.f32.mrf.mxu0 }
0x132a   : > { %v4195_v0 = vsel %vm1798_vm2, %v4168_v53, -inf }
0x132b   : > { %4193 = vmax.xlane.f32.xlu0 %v4192_v21  ;;  %4196 = vmax.xlane.f32.xlu1 %v4195_v0 }
0x132f   : > { %4199 = vmax.xlane.f32.xlu0 %v4198_v10 }
0x133c   : > { %4442 = vrot.lane.b32.xlu1 %v10342_v28, %s11295_s28 }
0x1345   : > { %4444 = vrot.lane.b32.xlu0 %v10338_v52, %s11295_s28 }
0x13a6   : > { %v4182_v11 = vpop.xlane.xlu1 %4181 }
0x13a7   : > { %v4202_v16 = vsub.f32 %v8398_v2, %v4182_v11 }
0x13a8   : > { %v4179_v25 = vpop.xlane.xlu0 %4178 }
0x13a9   : > { %v4211_v15 = vmul.f32 1.442695, %v4202_v16  ;;  %v4201_v32 = vsub.f32 %v4138_v55, %v4179_v25 }
0x13ab   : > { %8998 = vpow2.f32 %v4211_v15  ;;  %v4209_v18 = vmul.f32 1.442695, %v4201_v32 }
0x13ac   : > { %v4188_v48 = vpop.xlane.xlu0 %4187 }
0x13ad   : > { %9000 = vpow2.f32 %v4209_v18  ;;  %v4204_v31 = vsub.f32 %v8401_v51, %v4188_v48 }
0x13af   : > { %v4215_v38 = vmul.f32 1.442695, %v4204_v31 }
0x13b0   : > { %v4185_v43 = vpop.xlane.xlu0 %4184  ;;  %v4191_v23 = vpop.xlane.xlu1 %4190 }
0x13b1   : > { %v4203_v26 = vsub.f32 %v4148_v58, %v4185_v43  ;;  %v4205_v9 = vsub.f32 %v4158_v42, %v4191_v23 }
0x13b3   : > { %v4213_v63 = vmul.f32 1.442695, %v4203_v26  ;;  %v4217_v17 = vmul.f32 1.442695, %v4205_v9 }
0x13b4   : > { %v4194_v13 = vpop.xlane.xlu0 %4193  ;;  %v4197_v60 = vpop.xlane.xlu1 %4196 }
0x13b5   : > { %v4206_v61 = vsub.f32 %v8404_v20, %v4194_v13  ;;  %9002 = vpow2.f32 %v4213_v63  ;;  %v4207_v24 = vsub.f32 %v4168_v53, %v4197_v60 }
0x13b6   : > { %9004 = vpow2.f32 %v4215_v38 }
0x13b7   : > { %v4219_v45 = vmul.f32 1.442695, %v4206_v61  ;;  %9006 = vpow2.f32 %v4217_v17  ;;  %v4221_v29 = vmul.f32 1.442695, %v4207_v24 }
0x13b8   : > { %v10430_v19 = vpop.eup %8998  ;;  %v4200_v39 = vpop.xlane.xlu0 %4199 }
0x13b9   : > { %v4228_v5 = vsel %vm1798_vm2, %v10430_v19, 0.0  ;;  %v4208_v62 = vsub.f32 %v8407_v12, %v4200_v39  ;;  %9008 = vpow2.f32 %v4219_v45  ;;  %v4443_v12 = vpop.permute.xlu1 %4442 }
0x13ba   : > { %v10434_v44 = vpop.eup %9000  ;;  %4229 = vadd.xlane.f32.xlu0 %v4228_v5  ;;  %9010 = vpow2.f32 %v4221_v29 }
0x13bb   : > { %v4225_v22 = vsel %vm1798_vm2, %v10434_v44, 0.0  ;;  %v4223_v34 = vmul.f32 1.442695, %v4208_v62 }
0x13bc   : > { %4226 = vadd.xlane.f32.xlu1 %v4225_v22  ;;  %v4445_v57 = vpop.permute.xlu0 %4444 }
0x13bd   : > { %9012 = vpow2.f32 %v4223_v34 }
0x13c2   : > { %v10442_v40 = vpop.eup %9002 }
0x13c3   : > { %v10444_v49 = vpop.eup %9004  ;;  %v4231_v2 = vsel %vm1798_vm2, %v10442_v40, 0.0 }
0x13c4   : > { %v10448_v27 = vpop.eup %9006  ;;  %v4234_v55 = vsel %vm1798_vm2, %v10444_v49, 0.0 }
0x13c5   : > { %v4237_v51 = vsel %vm1798_vm2, %v10448_v27, 0.0 }
0x13c6   : > { %v10452_v56 = vpop.eup %9008 }
0x13c7   : > { %v10456_v58 = vpop.eup %9010  ;;  %v4240_v1 = vsel %vm1798_vm2, %v10452_v56, 0.0 }
0x13c8   : > { %v4243_v42 = vsel %vm1798_vm2, %v10456_v58, 0.0 }
0x13ca   : > { %v10460_v20 = vpop.eup %9012 }
0x13cb   : > { %v4246_v30 = vsel %vm1798_vm2, %v10460_v20, 0.0 }
0x13cd   : > { %4438 = vrot.lane.b32.xlu1 %v10350_v35, %s11295_s28 }
0x13d0   : > { %4440 = vrot.lane.b32.xlu0 %v10346_v59, %s11295_s28 }
0x13ef   : > { %4232 = vadd.xlane.f32.xlu0 %v4231_v2 }
0x13f1   : > { %4235 = vadd.xlane.f32.xlu1 %v4234_v55 }
0x13f3   : > { %4238 = vadd.xlane.f32.xlu0 %v4237_v51 }
0x13f5   : > { %4241 = vadd.xlane.f32.xlu1 %v4240_v1 }
0x13f7   : > { %4244 = vadd.xlane.f32.xlu0 %v4243_v42 }
0x13f9   : > { %4247 = vadd.xlane.f32.xlu1 %v4246_v30 }
0x140a   : > { %4434 = vrot.lane.b32.xlu1 %v10328_v47, %s11295_s28 }
0x140d   : > { %4436 = vrot.lane.b32.xlu0 %v10354_v50, %s11295_s28  ;;  %s11297_s28 = smov 56  }
0x140e   : > { %4420 = vrot.lane.b32.xlu1 %v10354_v50, %s11296_s23 }
0x1411   : > { %4418 = vrot.lane.b32.xlu0 %v10328_v47, %s11296_s23 }
0x1412   : > { %4424 = vrot.lane.b32.xlu1 %v10346_v59, %s11296_s23 }
0x1415   : > { %4422 = vrot.lane.b32.xlu0 %v10350_v35, %s11296_s23 }
0x1416   : > { %4428 = vrot.lane.b32.xlu1 %v10338_v52, %s11296_s23 }
0x1419   : > { %4426 = vrot.lane.b32.xlu0 %v10342_v28, %s11296_s23 }
0x141a   : > { %4432 = vrot.lane.b32.xlu1 %v10332_v8, %s11296_s23 }
0x141d   : > { %4430 = vrot.lane.b32.xlu0 %v10334_v7, %s11296_s23  ;;  %s11299_s23 = smov 112  }
0x141e   : > { %4689 = vrot.lane.b32.xlu1 %v10332_v8, %s11297_s28 }
0x1421   : > { %4687 = vrot.lane.b32.xlu0 %v10334_v7, %s11297_s28 }
0x1422   : > { %4685 = vrot.lane.b32.xlu1 %v10338_v52, %s11297_s28 }
0x1425   : > { %4681 = vrot.lane.b32.xlu0 %v10346_v59, %s11297_s28 }
0x1426   : > { %4683 = vrot.lane.b32.xlu1 %v10342_v28, %s11297_s28 }
0x1429   : > { %4677 = vrot.lane.b32.xlu0 %v10354_v50, %s11297_s28 }
0x142a   : > { %4679 = vrot.lane.b32.xlu1 %v10350_v35, %s11297_s28 }
0x142d   : > { %4858 = vrot.lane.b32.xlu0 %v10332_v8, %s11298_s1 }
0x142e   : > { %4675 = vrot.lane.b32.xlu1 %v10328_v47, %s11297_s28  ;;  %s11300_s28 = smov 48  }
0x1432   : > { %4856 = vrot.lane.b32.xlu1 %v10334_v7, %s11298_s1 }
0x1443   : > { %v4230_v53 = vpop.xlane.xlu0 %4229 }
0x1444   : > { %9014 = vrcp.f32 %v4230_v53 }
0x1445   : > { %v4227_v21 = vpop.xlane.xlu1 %4226 }
0x1446   : > { %9016 = vrcp.f32 %v4227_v21 }
0x1447   : > { %v4441_v25 = vpop.permute.xlu0 %4440 }
0x1449   : > { %v4439_v15 = vpop.permute.xlu1 %4438 }
0x1451   : > { %v9015_v0 = vpop.eup %9014 }
0x1452   : > { %v4258_v16 = vmul.f32 %v9015_v0, %v10430_v19 }
0x1453   : > { %v9017_v10 = vpop.eup %9016 }
0x1454   : > { %v4257_v11 = vmul.f32 %v9017_v10, %v10434_v44 }
0x1456   : > { %8424 = vmatprep.mubr.msk.f32.mxu1 %vm1798_vm2, %v4257_v11 }
0x1457   : > { %8425 = vmatmul.mubr.msk.f32.vlgmr.msra.gmra.mxu1 %vm1798_vm2, %v4258_v16 }
0x1458   : > { %8437 = vmatpush3.xpose.msk.msra.mxu1 %vm1070_vm0, %v10395_v41 }
0x1459   : > { %8438 = vmatprep.subr.msk.mxu1 %vm1070_vm0, %v10428_v36 }
0x145c   : > { %8439 = vmatpush3.xpose.msk.msra.mxu1 %vm1070_vm0, %v10428_v36 }
0x145d   : > { %8440 = vmatprep.subr.msk.mxu1 %vm1070_vm0, %v4445_v57 }
0x1460   : > { %8441 = vmatpush3.xpose.msk.msra.mxu1 %vm1070_vm0, %v4445_v57 }
0x1461   : > { %8442 = vmatprep.subr.msk.mxu1 %vm1070_vm0, %v4443_v12 }
0x1464   : > { %8443 = vmatpush3.xpose.msk.msra.mxu1 %vm1070_vm0, %v4443_v12 }
0x1465   : > { %8444 = vmatprep.subr.msk.mxu1 %vm1070_vm0, %v4441_v25 }
0x1468   : > { %8445 = vmatpush3.xpose.msk.msra.mxu1 %vm1070_vm0, %v4441_v25 }
0x1469   : > { %8446 = vmatprep.subr.msk.mxu1 %vm1070_vm0, %v4439_v15 }
0x146c   : > { %8447 = vmatpush3.xpose.msk.msra.mxu1 %vm1070_vm0, %v4439_v15 }
0x1478   : > { %v4233_v41 = vpop.xlane.xlu0 %4232 }
0x1479   : > { %9018 = vrcp.f32 %v4233_v41 }
0x147a   : > { %v4236_v36 = vpop.xlane.xlu1 %4235 }
0x147b   : > { %9020 = vrcp.f32 %v4236_v36 }
0x147c   : > { %v4239_v32 = vpop.xlane.xlu0 %4238 }
0x147d   : > { %9022 = vrcp.f32 %v4239_v32 }
0x147e   : > { %v4242_v18 = vpop.xlane.xlu1 %4241 }
0x147f   : > { %9024 = vrcp.f32 %v4242_v18 }
0x1480   : > { %v4245_v19 = vpop.xlane.xlu0 %4244 }
0x1481   : > { %9026 = vrcp.f32 %v4245_v19 }
0x1482   : > { %v4248_v5 = vpop.xlane.xlu1 %4247 }
0x1483   : > { %9028 = vrcp.f32 %v4248_v5 }
0x1484   : > { %v4437_v44 = vpop.permute.xlu0 %4436 }
0x1485   : > { %8448 = vmatprep.subr.msk.mxu1 %vm1070_vm0, %v4437_v44 }
0x1486   : > { %v9019_v22 = vpop.eup %9018  ;;  %8449 = vmatpush3.xpose.msk.msra.mxu1 %vm1070_vm0, %v4437_v44  ;;  %v4435_v48 = vpop.permute.xlu1 %4434 }
0x1487   : > { %8450 = vmatprep.subr.msk.mxu1 %vm1070_vm0, %v4435_v48  ;;  %v4259_v43 = vmul.f32 %v9019_v22, %v10442_v40 }
0x1488   : > { %v9021_v23 = vpop.eup %9020  ;;  %v4419_v26 = vpop.permute.xlu0 %4418 }
0x1489   : > { %8427 = vmatprep.mubr.msk.f32.mxu1 %vm1798_vm2, %v4259_v43  ;;  %v4260_v13 = vmul.f32 %v9021_v23, %v10444_v49 }
0x148a   : > { %v9023_v31 = vpop.eup %9022  ;;  %8451 = vmatpush3.xpose.msk.msra.mxu1 %vm1070_vm0, %v4435_v48  ;;  %v4421_v63 = vpop.permute.xlu1 %4420 }
0x148b   : > { %8428 = vmatmul.mubr.msk.f32.gmra.mxu1 %vm1798_vm2, %v4260_v13  ;;  %v4261_v9 = vmul.f32 %v9023_v31, %v10448_v27 }
0x148c   : > { %v9025_v60 = vpop.eup %9024  ;;  %v4423_v38 = vpop.permute.xlu0 %4422 }
0x148d   : > { %8430 = vmatprep.mubr.msk.f32.mxu1 %vm1798_vm2, %v4261_v9  ;;  %v4262_v61 = vmul.f32 %v9025_v60, %v10452_v56 }
0x148e   : > { %v9027_v39 = vpop.eup %9026  ;;  %v4425_v17 = vpop.permute.xlu1 %4424 }
0x148f   : > { %8431 = vmatmul.mubr.msk.f32.gmra.mxu1 %vm1798_vm2, %v4262_v61  ;;  %v4263_v24 = vmul.f32 %v9027_v39, %v10456_v58 }
0x1490   : > { %v9029_v45 = vpop.eup %9028  ;;  %v4427_v62 = vpop.permute.xlu0 %4426 }
0x1491   : > { %8433 = vmatprep.mubr.msk.f32.mxu1 %vm1798_vm2, %v4263_v24  ;;  %v4264_v29 = vmul.f32 %v9029_v45, %v10460_v20 }
0x1492   : > { %v4429_v34 = vpop.permute.xlu1 %4428 }
0x1493   : > { %8434 = vmatmul.mubr.msk.f32.gmra.mxu1 %vm1798_vm2, %v4264_v29 }
0x1494   : > { %v4431_v40 = vpop.permute.xlu0 %4430  ;;  %8452 = vmatprep.mubr.msk.f32.mxu1 %vm1070_vm0, %v4419_v26 }
0x1496   : > { %v4433_v49 = vpop.permute.xlu1 %4432 }
0x1497   : > { %8453 = vmatmul.mubr.msk.f32.vlgmr.msra.gmra.mxu1 %vm1070_vm0, %v4421_v63 }
0x1498   : > { %8455 = vmatprep.mubr.msk.f32.mxu1 %vm1070_vm0, %v4423_v38  ;;  %v4688_v2 = vpop.permute.xlu0 %4687 }
0x149a   : > { %v4690_v27 = vpop.permute.xlu1 %4689 }
0x149b   : > { %8456 = vmatmul.mubr.msk.f32.gmra.mxu1 %vm1070_vm0, %v4425_v17  ;;  %8464 = vmatprep.subr.mxu0 %v4690_v27 }
0x149c   : > { %8458 = vmatprep.mubr.msk.f32.mxu1 %vm1070_vm0, %v4427_v62  ;;  %8465 = vmatpush3.msra.mxu0 %v4690_v27  ;;  %v4682_v56 = vpop.permute.xlu0 %4681 }
0x149d   : > { %8466 = vmatprep.subr.mxu0 %v4688_v2 }
0x149e   : > { %8467 = vmatpush3.msra.mxu0 %v4688_v2  ;;  %v4686_v55 = vpop.permute.xlu1 %4685 }
0x149f   : > { %8459 = vmatmul.mubr.msk.f32.gmra.mxu1 %vm1070_vm0, %v4429_v34  ;;  %8468 = vmatprep.subr.mxu0 %v4686_v55 }
0x14a0   : > { %8461 = vmatprep.mubr.msk.f32.mxu1 %vm1070_vm0, %v4431_v40  ;;  %8469 = vmatpush3.msra.mxu0 %v4686_v55  ;;  %v4678_v58 = vpop.permute.xlu0 %4677 }
0x14a2   : > { %v4684_v51 = vpop.permute.xlu1 %4683 }
0x14a3   : > { %8462 = vmatmul.mubr.msk.f32.gmra.mxu1 %vm1070_vm0, %v4433_v49  ;;  %8470 = vmatprep.subr.mxu0 %v4684_v51 }
0x14a4   : > { %8471 = vmatpush3.msra.mxu0 %v4684_v51  ;;  %v10548_v42 = vpop.permute.xlu0 %4858 }
0x14a5   : > { %8472 = vmatprep.subr.mxu0 %v4682_v56 }
0x14a6   : > { %8473 = vmatpush3.msra.mxu0 %v4682_v56  ;;  %v4680_v1 = vpop.permute.xlu1 %4679 }
0x14a7   : > { %8474 = vmatprep.subr.mxu0 %v4680_v1 }
0x14a8   : > { %8475 = vmatpush3.msra.mxu0 %v4680_v1 }
0x14a9   : > { %8476 = vmatprep.subr.mxu0 %v4678_v58 }
0x14aa   : > { %8477 = vmatpush3.msra.mxu0 %v4678_v58  ;;  %v4676_v20 = vpop.permute.xlu1 %4675 }
0x14ab   : > { %8478 = vmatprep.subr.mxu0 %v4676_v20 }
0x14ac   : > { %8479 = vmatpush3.msra.mxu0 %v4676_v20 }
0x14ad   : > { %8492 = vmatprep.subr.msk.mxu0 %vm1070_vm0, %v10548_v42 }
0x14ae   : > { %v10580_v31 = vpop.permute.xlu1 %4856 }
0x1517   : > { %v10552_v30 = vpop.f32.mrf.mxu1 }
0x1519   : > { %v10554_v57 = vpop.f32.mrf.mxu1 }
0x154b   : > { %v10556_v12 = vpop.f32.mrf.mxu1 }
0x154d   : > { %v10558_v53 = vpop.f32.mrf.mxu1 }
0x154f   : > { %v10560_v21 = vpop.f32.mrf.mxu1 }
0x1551   : > { %v10562_v0 = vpop.f32.mrf.mxu1 }
0x1553   : > { %v10564_v10 = vpop.f32.mrf.mxu1 }
0x1555   : > { %v10566_v11 = vpop.f32.mrf.mxu1 }
0x1557   : > { %v8454_v16 = vpop.f32.mrf.mxu1 }
0x1558   : > { %v4590_v25 = vsel %vm1798_vm2, %v8454_v16, -inf }
0x1559   : > { %4591 = vmax.xlane.f32.xlu1 %v4590_v25  ;;  %v4548_v15 = vpop.f32.mrf.mxu1 }
0x155a   : > { %v4587_v41 = vsel %vm1798_vm2, %v4548_v15, -inf }
0x155b   : > { %4588 = vmax.xlane.f32.xlu0 %v4587_v41  ;;  %v8457_v36 = vpop.f32.mrf.mxu1 }
0x155c   : > { %v4596_v18 = vsel %vm1798_vm2, %v8457_v36, -inf }
0x155d   : > { %v4558_v32 = vpop.f32.mrf.mxu1 }
0x155e   : > { %v4593_v44 = vsel %vm1798_vm2, %v4558_v32, -inf }
0x155f   : > { %4597 = vmax.xlane.f32.xlu0 %v4596_v18  ;;  %v8460_v19 = vpop.f32.mrf.mxu1 }
0x1560   : > { %v4602_v23 = vsel %vm1798_vm2, %v8460_v19, -inf }
0x1561   : > { %v4568_v5 = vpop.f32.mrf.mxu1 }
0x1562   : > { %v4599_v22 = vsel %vm1798_vm2, %v4568_v5, -inf }
0x1563   : > { %4594 = vmax.xlane.f32.xlu0 %v4593_v44  ;;  %4600 = vmax.xlane.f32.xlu1 %v4599_v22  ;;  %v8463_v48 = vpop.f32.mrf.mxu1 }
0x1564   : > { %v4608_v13 = vsel %vm1798_vm2, %v8463_v48, -inf }
0x1565   : > { %v4578_v43 = vpop.f32.mrf.mxu1 }
0x1566   : > { %v4605_v26 = vsel %vm1798_vm2, %v4578_v43, -inf }
0x1567   : > { %4603 = vmax.xlane.f32.xlu0 %v4602_v23  ;;  %4606 = vmax.xlane.f32.xlu1 %v4605_v26 }
0x156b   : > { %4609 = vmax.xlane.f32.xlu0 %v4608_v13 }
0x1578   : > { %4852 = vrot.lane.b32.xlu1 %v10342_v28, %s11298_s1 }
0x1581   : > { %4854 = vrot.lane.b32.xlu0 %v10338_v52, %s11298_s1 }
0x15e2   : > { %v4592_v63 = vpop.xlane.xlu1 %4591 }
0x15e3   : > { %v4612_v9 = vsub.f32 %v8454_v16, %v4592_v63 }
0x15e4   : > { %v4589_v60 = vpop.xlane.xlu0 %4588 }
0x15e5   : > { %v4621_v38 = vmul.f32 1.442695, %v4612_v9  ;;  %v4611_v61 = vsub.f32 %v4548_v15, %v4589_v60 }
0x15e7   : > { %9030 = vpow2.f32 %v4621_v38  ;;  %v4619_v39 = vmul.f32 1.442695, %v4611_v61 }
0x15e8   : > { %v4598_v29 = vpop.xlane.xlu0 %4597 }
0x15e9   : > { %9032 = vpow2.f32 %v4619_v39  ;;  %v4614_v27 = vsub.f32 %v8457_v36, %v4598_v29 }
0x15eb   : > { %v4625_v58 = vmul.f32 1.442695, %v4614_v27 }
0x15ec   : > { %v4595_v34 = vpop.xlane.xlu0 %4594  ;;  %v4601_v40 = vpop.xlane.xlu1 %4600 }
0x15ed   : > { %v4613_v49 = vsub.f32 %v4558_v32, %v4595_v34  ;;  %v4615_v56 = vsub.f32 %v4568_v5, %v4601_v40 }
0x15ef   : > { %v4623_v55 = vmul.f32 1.442695, %v4613_v49  ;;  %v4627_v16 = vmul.f32 1.442695, %v4615_v56 }
0x15f0   : > { %v4604_v2 = vpop.xlane.xlu0 %4603  ;;  %v4607_v51 = vpop.xlane.xlu1 %4606 }
0x15f1   : > { %v4616_v1 = vsub.f32 %v8460_v19, %v4604_v2  ;;  %9034 = vpow2.f32 %v4623_v55  ;;  %v4617_v25 = vsub.f32 %v4578_v43, %v4607_v51 }
0x15f2   : > { %9036 = vpow2.f32 %v4625_v58 }
0x15f3   : > { %v4629_v15 = vmul.f32 1.442695, %v4616_v1  ;;  %9038 = vpow2.f32 %v4627_v16  ;;  %v4631_v18 = vmul.f32 1.442695, %v4617_v25 }
0x15f4   : > { %v10582_v17 = vpop.eup %9030  ;;  %v4610_v20 = vpop.xlane.xlu0 %4609 }
0x15f5   : > { %v4638_v24 = vsel %vm1798_vm2, %v10582_v17, 0.0  ;;  %v4618_v41 = vsub.f32 %v8463_v48, %v4610_v20  ;;  %9040 = vpow2.f32 %v4629_v15  ;;  %v4853_v38 = vpop.permute.xlu1 %4852 }
0x15f6   : > { %v10586_v45 = vpop.eup %9032  ;;  %4639 = vadd.xlane.f32.xlu0 %v4638_v24  ;;  %9042 = vpow2.f32 %v4631_v18 }
0x15f7   : > { %v4635_v62 = vsel %vm1798_vm2, %v10586_v45, 0.0  ;;  %v4633_v44 = vmul.f32 1.442695, %v4618_v41 }
0x15f8   : > { %4636 = vadd.xlane.f32.xlu1 %v4635_v62  ;;  %v4855_v60 = vpop.permute.xlu0 %4854 }
0x15f9   : > { %9044 = vpow2.f32 %v4633_v44 }
0x15fe   : > { %v10594_v32 = vpop.eup %9034 }
0x15ff   : > { %v10596_v36 = vpop.eup %9036  ;;  %v4641_v19 = vsel %vm1798_vm2, %v10594_v32, 0.0 }
0x1600   : > { %v10600_v5 = vpop.eup %9038  ;;  %v4644_v22 = vsel %vm1798_vm2, %v10596_v36, 0.0 }
0x1601   : > { %v4647_v43 = vsel %vm1798_vm2, %v10600_v5, 0.0 }
0x1602   : > { %v10604_v48 = vpop.eup %9040 }
0x1603   : > { %v10608_v23 = vpop.eup %9042  ;;  %v4650_v26 = vsel %vm1798_vm2, %v10604_v48, 0.0 }
0x1604   : > { %v4653_v63 = vsel %vm1798_vm2, %v10608_v23, 0.0 }
0x1606   : > { %v10612_v13 = vpop.eup %9044 }
0x1607   : > { %v4656_v9 = vsel %vm1798_vm2, %v10612_v13, 0.0 }
0x1609   : > { %4848 = vrot.lane.b32.xlu1 %v10350_v35, %s11298_s1 }
0x160c   : > { %4850 = vrot.lane.b32.xlu0 %v10346_v59, %s11298_s1 }
0x162b   : > { %4642 = vadd.xlane.f32.xlu0 %v4641_v19 }
0x162d   : > { %4645 = vadd.xlane.f32.xlu1 %v4644_v22 }
0x162f   : > { %4648 = vadd.xlane.f32.xlu0 %v4647_v43 }
0x1631   : > { %4651 = vadd.xlane.f32.xlu1 %v4650_v26 }
0x1633   : > { %4654 = vadd.xlane.f32.xlu0 %v4653_v63 }
0x1635   : > { %4657 = vadd.xlane.f32.xlu1 %v4656_v9 }
0x1646   : > { %4844 = vrot.lane.b32.xlu1 %v10328_v47, %s11298_s1 }
0x1649   : > { %4846 = vrot.lane.b32.xlu0 %v10354_v50, %s11298_s1  ;;  %s11301_s1 = smov 72  }
0x164a   : > { %4830 = vrot.lane.b32.xlu1 %v10354_v50, %s11299_s23 }
0x164d   : > { %4828 = vrot.lane.b32.xlu0 %v10328_v47, %s11299_s23 }
0x164e   : > { %4834 = vrot.lane.b32.xlu1 %v10346_v59, %s11299_s23 }
0x1651   : > { %4832 = vrot.lane.b32.xlu0 %v10350_v35, %s11299_s23 }
0x1652   : > { %4838 = vrot.lane.b32.xlu1 %v10338_v52, %s11299_s23 }
0x1655   : > { %4836 = vrot.lane.b32.xlu0 %v10342_v28, %s11299_s23 }
0x1656   : > { %4842 = vrot.lane.b32.xlu1 %v10332_v8, %s11299_s23 }
0x1659   : > { %4840 = vrot.lane.b32.xlu0 %v10334_v7, %s11299_s23  ;;  %s11302_s23 = smov 104  }
0x165a   : > { %5099 = vrot.lane.b32.xlu1 %v10332_v8, %s11300_s28 }
0x165d   : > { %5097 = vrot.lane.b32.xlu0 %v10334_v7, %s11300_s28 }
0x165e   : > { %5095 = vrot.lane.b32.xlu1 %v10338_v52, %s11300_s28 }
0x1661   : > { %5091 = vrot.lane.b32.xlu0 %v10346_v59, %s11300_s28 }
0x1662   : > { %5093 = vrot.lane.b32.xlu1 %v10342_v28, %s11300_s28 }
0x1665   : > { %5087 = vrot.lane.b32.xlu0 %v10354_v50, %s11300_s28 }
0x1666   : > { %5089 = vrot.lane.b32.xlu1 %v10350_v35, %s11300_s28 }
0x1669   : > { %5268 = vrot.lane.b32.xlu0 %v10332_v8, %s11301_s1 }
0x166a   : > { %5085 = vrot.lane.b32.xlu1 %v10328_v47, %s11300_s28  ;;  %s11303_s28 = smov 40  }
0x166e   : > { %5266 = vrot.lane.b32.xlu1 %v10334_v7, %s11301_s1 }
0x167f   : > { %v4640_v61 = vpop.xlane.xlu0 %4639 }
0x1680   : > { %9046 = vrcp.f32 %v4640_v61 }
0x1681   : > { %v4637_v39 = vpop.xlane.xlu1 %4636 }
0x1682   : > { %9048 = vrcp.f32 %v4637_v39 }
0x168d   : > { %v9047_v24 = vpop.eup %9046 }
0x168e   : > { %v4668_v34 = vmul.f32 %v9047_v24, %v10582_v17  ;;  %v4851_v17 = vpop.permute.xlu0 %4850 }
0x168f   : > { %v9049_v62 = vpop.eup %9048 }
0x1690   : > { %v4667_v29 = vmul.f32 %v9049_v62, %v10586_v45  ;;  %v4849_v45 = vpop.permute.xlu1 %4848 }
0x1692   : > { %8480 = vmatprep.mubr.msk.f32.mxu0 %vm1798_vm2, %v4667_v29 }
0x1693   : > { %8481 = vmatmul.mubr.msk.f32.vlgmr.msra.gmra.mxu0 %vm1798_vm2, %v4668_v34 }
0x1694   : > { %8493 = vmatpush3.xpose.msk.msra.mxu0 %vm1070_vm0, %v10548_v42 }
0x1695   : > { %8494 = vmatprep.subr.msk.mxu0 %vm1070_vm0, %v10580_v31 }
0x1698   : > { %8495 = vmatpush3.xpose.msk.msra.mxu0 %vm1070_vm0, %v10580_v31 }
0x1699   : > { %8496 = vmatprep.subr.msk.mxu0 %vm1070_vm0, %v4855_v60 }
0x169c   : > { %8497 = vmatpush3.xpose.msk.msra.mxu0 %vm1070_vm0, %v4855_v60 }
0x169d   : > { %8498 = vmatprep.subr.msk.mxu0 %vm1070_vm0, %v4853_v38 }
0x16a0   : > { %8499 = vmatpush3.xpose.msk.msra.mxu0 %vm1070_vm0, %v4853_v38 }
0x16a1   : > { %8500 = vmatprep.subr.msk.mxu0 %vm1070_vm0, %v4851_v17 }
0x16a4   : > { %8501 = vmatpush3.xpose.msk.msra.mxu0 %vm1070_vm0, %v4851_v17 }
0x16a5   : > { %8502 = vmatprep.subr.msk.mxu0 %vm1070_vm0, %v4849_v45 }
0x16a8   : > { %8503 = vmatpush3.xpose.msk.msra.mxu0 %vm1070_vm0, %v4849_v45 }
0x16b4   : > { %v4643_v42 = vpop.xlane.xlu0 %4642 }
0x16b5   : > { %9050 = vrcp.f32 %v4643_v42 }
0x16b6   : > { %v4646_v31 = vpop.xlane.xlu1 %4645 }
0x16b7   : > { %9052 = vrcp.f32 %v4646_v31 }
0x16b8   : > { %v4649_v40 = vpop.xlane.xlu0 %4648 }
0x16b9   : > { %9054 = vrcp.f32 %v4649_v40 }
0x16ba   : > { %v4652_v49 = vpop.xlane.xlu1 %4651 }
0x16bb   : > { %9056 = vrcp.f32 %v4652_v49 }
0x16bc   : > { %v4655_v2 = vpop.xlane.xlu0 %4654 }
0x16bd   : > { %9058 = vrcp.f32 %v4655_v2 }
0x16be   : > { %v4658_v27 = vpop.xlane.xlu1 %4657 }
0x16bf   : > { %9060 = vrcp.f32 %v4658_v27 }
0x16c0   : > { %v4847_v55 = vpop.permute.xlu0 %4846 }
0x16c1   : > { %8504 = vmatprep.subr.msk.mxu0 %vm1070_vm0, %v4847_v55 }
0x16c2   : > { %v9051_v56 = vpop.eup %9050  ;;  %8505 = vmatpush3.xpose.msk.msra.mxu0 %vm1070_vm0, %v4847_v55  ;;  %v4845_v51 = vpop.permute.xlu1 %4844 }
0x16c3   : > { %8506 = vmatprep.subr.msk.mxu0 %vm1070_vm0, %v4845_v51  ;;  %v4669_v58 = vmul.f32 %v9051_v56, %v10594_v32 }
0x16c4   : > { %v9053_v1 = vpop.eup %9052  ;;  %v4829_v20 = vpop.permute.xlu0 %4828 }
0x16c5   : > { %8483 = vmatprep.mubr.msk.f32.mxu0 %vm1798_vm2, %v4669_v58  ;;  %v4670_v16 = vmul.f32 %v9053_v1, %v10596_v36 }
0x16c6   : > { %v9055_v25 = vpop.eup %9054  ;;  %8507 = vmatpush3.xpose.msk.msra.mxu0 %vm1070_vm0, %v4845_v51  ;;  %v4831_v15 = vpop.permute.xlu1 %4830 }
0x16c7   : > { %8484 = vmatmul.mubr.msk.f32.gmra.mxu0 %vm1798_vm2, %v4670_v16  ;;  %v4671_v41 = vmul.f32 %v9055_v25, %v10600_v5 }
0x16c8   : > { %v9057_v18 = vpop.eup %9056  ;;  %v4833_v44 = vpop.permute.xlu0 %4832 }
0x16c9   : > { %8486 = vmatprep.mubr.msk.f32.mxu0 %vm1798_vm2, %v4671_v41  ;;  %v4672_v32 = vmul.f32 %v9057_v18, %v10604_v48 }
0x16ca   : > { %v9059_v19 = vpop.eup %9058  ;;  %v4835_v22 = vpop.permute.xlu1 %4834 }
0x16cb   : > { %8487 = vmatmul.mubr.msk.f32.gmra.mxu0 %vm1798_vm2, %v4672_v32  ;;  %v4673_v36 = vmul.f32 %v9059_v19, %v10608_v23 }
0x16cc   : > { %v9061_v43 = vpop.eup %9060  ;;  %v4837_v26 = vpop.permute.xlu0 %4836 }
0x16cd   : > { %8489 = vmatprep.mubr.msk.f32.mxu0 %vm1798_vm2, %v4673_v36  ;;  %v4674_v63 = vmul.f32 %v9061_v43, %v10612_v13 }
0x16ce   : > { %v4839_v9 = vpop.permute.xlu1 %4838 }
0x16cf   : > { %8490 = vmatmul.mubr.msk.f32.gmra.mxu0 %vm1798_vm2, %v4674_v63 }
0x16d0   : > { %v4841_v5 = vpop.permute.xlu0 %4840  ;;  %8508 = vmatprep.mubr.msk.f32.mxu0 %vm1070_vm0, %v4829_v20 }
0x16d2   : > { %v4843_v60 = vpop.permute.xlu1 %4842 }
0x16d3   : > { %8509 = vmatmul.mubr.msk.f32.vlgmr.msra.gmra.mxu0 %vm1070_vm0, %v4831_v15 }
0x16d4   : > { %8511 = vmatprep.mubr.msk.f32.mxu0 %vm1070_vm0, %v4833_v44  ;;  %v5098_v48 = vpop.permute.xlu0 %5097 }
0x16d6   : > { %v5100_v38 = vpop.permute.xlu1 %5099 }
0x16d7   : > { %8512 = vmatmul.mubr.msk.f32.gmra.mxu0 %vm1070_vm0, %v4835_v22  ;;  %8520 = vmatprep.subr.mxu1 %v5100_v38 }
0x16d8   : > { %8514 = vmatprep.mubr.msk.f32.mxu0 %vm1070_vm0, %v4837_v26  ;;  %8521 = vmatpush3.msra.mxu1 %v5100_v38  ;;  %v5092_v13 = vpop.permute.xlu0 %5091 }
0x16d9   : > { %8522 = vmatprep.subr.mxu1 %v5098_v48 }
0x16da   : > { %8523 = vmatpush3.msra.mxu1 %v5098_v48  ;;  %v5096_v23 = vpop.permute.xlu1 %5095 }
0x16db   : > { %8515 = vmatmul.mubr.msk.f32.gmra.mxu0 %vm1070_vm0, %v4839_v9  ;;  %8524 = vmatprep.subr.mxu1 %v5096_v23 }
0x16dc   : > { %8517 = vmatprep.mubr.msk.f32.mxu0 %vm1070_vm0, %v4841_v5  ;;  %8525 = vmatpush3.msra.mxu1 %v5096_v23  ;;  %v5088_v39 = vpop.permute.xlu0 %5087 }
0x16de   : > { %v5094_v61 = vpop.permute.xlu1 %5093 }
0x16df   : > { %8518 = vmatmul.mubr.msk.f32.gmra.mxu0 %vm1070_vm0, %v4843_v60  ;;  %8526 = vmatprep.subr.mxu1 %v5094_v61 }
0x16e0   : > { %8527 = vmatpush3.msra.mxu1 %v5094_v61  ;;  %v10700_v29 = vpop.permute.xlu0 %5268 }
0x16e1   : > { %8528 = vmatprep.subr.mxu1 %v5092_v13 }
0x16e2   : > { %8529 = vmatpush3.msra.mxu1 %v5092_v13  ;;  %v5090_v24 = vpop.permute.xlu1 %5089 }
0x16e3   : > { %8530 = vmatprep.subr.mxu1 %v5090_v24 }
0x16e4   : > { %8531 = vmatpush3.msra.mxu1 %v5090_v24 }
0x16e5   : > { %8532 = vmatprep.subr.mxu1 %v5088_v39 }
0x16e6   : > { %8533 = vmatpush3.msra.mxu1 %v5088_v39  ;;  %v5086_v62 = vpop.permute.xlu1 %5085 }
0x16e7   : > { %8534 = vmatprep.subr.mxu1 %v5086_v62 }
0x16e8   : > { %8535 = vmatpush3.msra.mxu1 %v5086_v62 }
0x16e9   : > { %8548 = vmatprep.subr.msk.mxu1 %vm1070_vm0, %v10700_v29 }
0x16ea   : > { %v10732_v36 = vpop.permute.xlu1 %5266 }
0x1753   : > { %v10704_v34 = vpop.f32.mrf.mxu0 }
0x1755   : > { %v10706_v17 = vpop.f32.mrf.mxu0 }
0x1787   : > { %v10708_v45 = vpop.f32.mrf.mxu0 }
0x1789   : > { %v10710_v42 = vpop.f32.mrf.mxu0 }
0x178b   : > { %v10712_v31 = vpop.f32.mrf.mxu0 }
0x178d   : > { %v10714_v40 = vpop.f32.mrf.mxu0 }
0x178f   : > { %v10716_v49 = vpop.f32.mrf.mxu0 }
0x1791   : > { %v10718_v2 = vpop.f32.mrf.mxu0 }
0x1793   : > { %v8510_v27 = vpop.f32.mrf.mxu0 }
0x1794   : > { %v5000_v55 = vsel %vm1798_vm2, %v8510_v27, -inf }
0x1795   : > { %5001 = vmax.xlane.f32.xlu1 %v5000_v55  ;;  %v4958_v56 = vpop.f32.mrf.mxu0 }
0x1796   : > { %v4997_v51 = vsel %vm1798_vm2, %v4958_v56, -inf }
0x1797   : > { %4998 = vmax.xlane.f32.xlu0 %v4997_v51  ;;  %v8513_v58 = vpop.f32.mrf.mxu0 }
0x1798   : > { %v5006_v20 = vsel %vm1798_vm2, %v8513_v58, -inf }
0x1799   : > { %v4968_v1 = vpop.f32.mrf.mxu0 }
0x179a   : > { %v5003_v15 = vsel %vm1798_vm2, %v4968_v1, -inf }
0x179b   : > { %5007 = vmax.xlane.f32.xlu0 %v5006_v20  ;;  %v8516_v16 = vpop.f32.mrf.mxu0 }
0x179c   : > { %v5012_v32 = vsel %vm1798_vm2, %v8516_v16, -inf }
0x179d   : > { %v4978_v25 = vpop.f32.mrf.mxu0 }
0x179e   : > { %v5009_v41 = vsel %vm1798_vm2, %v4978_v25, -inf }
0x179f   : > { %5004 = vmax.xlane.f32.xlu0 %v5003_v15  ;;  %5010 = vmax.xlane.f32.xlu1 %v5009_v41  ;;  %v8519_v18 = vpop.f32.mrf.mxu0 }
0x17a0   : > { %v5018_v22 = vsel %vm1798_vm2, %v8519_v18, -inf }
0x17a1   : > { %v4988_v44 = vpop.f32.mrf.mxu0 }
0x17a2   : > { %v5015_v19 = vsel %vm1798_vm2, %v4988_v44, -inf }
0x17a3   : > { %5013 = vmax.xlane.f32.xlu0 %v5012_v32  ;;  %5016 = vmax.xlane.f32.xlu1 %v5015_v19 }
0x17a7   : > { %5019 = vmax.xlane.f32.xlu0 %v5018_v22 }
0x17b4   : > { %5262 = vrot.lane.b32.xlu1 %v10342_v28, %s11301_s1 }
0x17bd   : > { %5264 = vrot.lane.b32.xlu0 %v10338_v52, %s11301_s1 }
0x181e   : > { %v5002_v43 = vpop.xlane.xlu1 %5001 }
0x181f   : > { %v5022_v26 = vsub.f32 %v8510_v27, %v5002_v43 }
0x1820   : > { %v4999_v63 = vpop.xlane.xlu0 %4998 }
0x1821   : > { %v5031_v9 = vmul.f32 1.442695, %v5022_v26  ;;  %v5021_v5 = vsub.f32 %v4958_v56, %v4999_v63 }
0x1823   : > { %9062 = vpow2.f32 %v5031_v9  ;;  %v5029_v60 = vmul.f32 1.442695, %v5021_v5 }
0x1824   : > { %v5008_v61 = vpop.xlane.xlu0 %5007 }
0x1825   : > { %9064 = vpow2.f32 %v5029_v60  ;;  %v5024_v55 = vsub.f32 %v8513_v58, %v5008_v61 }
0x1827   : > { %v5035_v15 = vmul.f32 1.442695, %v5024_v55 }
0x1828   : > { %v5005_v39 = vpop.xlane.xlu0 %5004  ;;  %v5011_v24 = vpop.xlane.xlu1 %5010 }
0x1829   : > { %v5023_v62 = vsub.f32 %v4968_v1, %v5005_v39  ;;  %v5025_v51 = vsub.f32 %v4978_v25, %v5011_v24 }
0x182b   : > { %v5033_v56 = vmul.f32 1.442695, %v5023_v62  ;;  %v5037_v19 = vmul.f32 1.442695, %v5025_v51 }
0x182c   : > { %v5014_v27 = vpop.xlane.xlu0 %5013  ;;  %v5017_v20 = vpop.xlane.xlu1 %5016 }
0x182d   : > { %v5026_v41 = vsub.f32 %v8516_v16, %v5014_v27  ;;  %9066 = vpow2.f32 %v5033_v56  ;;  %v5027_v22 = vsub.f32 %v4988_v44, %v5017_v20 }
0x182e   : > { %9068 = vpow2.f32 %v5035_v15 }
0x182f   : > { %v5039_v43 = vmul.f32 1.442695, %v5026_v41  ;;  %9070 = vpow2.f32 %v5037_v19  ;;  %v5041_v63 = vmul.f32 1.442695, %v5027_v22 }
0x1830   : > { %v10734_v48 = vpop.eup %9062  ;;  %v5020_v32 = vpop.xlane.xlu0 %5019 }
0x1831   : > { %v5048_v38 = vsel %vm1798_vm2, %v10734_v48, 0.0  ;;  %v5028_v26 = vsub.f32 %v8519_v18, %v5020_v32  ;;  %9072 = vpow2.f32 %v5039_v43  ;;  %v5263_v62 = vpop.permute.xlu1 %5262 }
0x1832   : > { %v10738_v23 = vpop.eup %9064  ;;  %5049 = vadd.xlane.f32.xlu0 %v5048_v38  ;;  %9074 = vpow2.f32 %v5041_v63 }
0x1833   : > { %v5045_v13 = vsel %vm1798_vm2, %v10738_v23, 0.0  ;;  %v5043_v9 = vmul.f32 1.442695, %v5028_v26 }
0x1834   : > { %5046 = vadd.xlane.f32.xlu1 %v5045_v13  ;;  %v5265_v24 = vpop.permute.xlu0 %5264 }
0x1835   : > { %9076 = vpow2.f32 %v5043_v9 }
0x183a   : > { %v10746_v1 = vpop.eup %9066 }
0x183b   : > { %v10748_v58 = vpop.eup %9068  ;;  %v5051_v16 = vsel %vm1798_vm2, %v10746_v1, 0.0 }
0x183c   : > { %v10752_v25 = vpop.eup %9070  ;;  %v5054_v44 = vsel %vm1798_vm2, %v10748_v58, 0.0 }
0x183d   : > { %v5057_v5 = vsel %vm1798_vm2, %v10752_v25, 0.0 }
0x183e   : > { %v10756_v18 = vpop.eup %9072 }
0x183f   : > { %v10760_v60 = vpop.eup %9074  ;;  %v5060_v38 = vsel %vm1798_vm2, %v10756_v18, 0.0 }
0x1840   : > { %v5063_v61 = vsel %vm1798_vm2, %v10760_v60, 0.0 }
0x1842   : > { %v10764_v13 = vpop.eup %9076 }
0x1843   : > { %v5066_v39 = vsel %vm1798_vm2, %v10764_v13, 0.0 }
0x1845   : > { %5258 = vrot.lane.b32.xlu1 %v10350_v35, %s11301_s1 }
0x1848   : > { %5260 = vrot.lane.b32.xlu0 %v10346_v59, %s11301_s1 }
0x1867   : > { %5052 = vadd.xlane.f32.xlu0 %v5051_v16 }
0x1869   : > { %5055 = vadd.xlane.f32.xlu1 %v5054_v44 }
0x186b   : > { %5058 = vadd.xlane.f32.xlu0 %v5057_v5 }
0x186d   : > { %5061 = vadd.xlane.f32.xlu1 %v5060_v38 }
0x186f   : > { %5064 = vadd.xlane.f32.xlu0 %v5063_v61 }
0x1871   : > { %5067 = vadd.xlane.f32.xlu1 %v5066_v39 }
0x1882   : > { %5254 = vrot.lane.b32.xlu1 %v10328_v47, %s11301_s1 }
0x1885   : > { %5256 = vrot.lane.b32.xlu0 %v10354_v50, %s11301_s1  ;;  %s11304_s1 = smov 8  }
0x1886   : > { %5240 = vrot.lane.b32.xlu1 %v10354_v50, %s11302_s23 }
0x1889   : > { %5238 = vrot.lane.b32.xlu0 %v10328_v47, %s11302_s23 }
0x188a   : > { %5244 = vrot.lane.b32.xlu1 %v10346_v59, %s11302_s23 }
0x188d   : > { %5242 = vrot.lane.b32.xlu0 %v10350_v35, %s11302_s23 }
0x188e   : > { %5248 = vrot.lane.b32.xlu1 %v10338_v52, %s11302_s23 }
0x1891   : > { %5246 = vrot.lane.b32.xlu0 %v10342_v28, %s11302_s23 }
0x1892   : > { %5252 = vrot.lane.b32.xlu1 %v10332_v8, %s11302_s23 }
0x1895   : > { %5250 = vrot.lane.b32.xlu0 %v10334_v7, %s11302_s23  ;;  %s11305_s23 = smov 16  }
0x18bb   : > { %v5050_v27 = vpop.xlane.xlu0 %5049 }
0x18bc   : > { %9078 = vrcp.f32 %v5050_v27 }
0x18bd   : > { %v5047_v55 = vpop.xlane.xlu1 %5046 }
0x18be   : > { %9080 = vrcp.f32 %v5047_v55 }
0x18c9   : > { %v9079_v56 = vpop.eup %9078 }
0x18ca   : > { %v5078_v15 = vmul.f32 %v9079_v56, %v10734_v48  ;;  %v5261_v48 = vpop.permute.xlu0 %5260 }
0x18cb   : > { %v9081_v51 = vpop.eup %9080 }
0x18cc   : > { %v5077_v20 = vmul.f32 %v9081_v51, %v10738_v23  ;;  %v5259_v23 = vpop.permute.xlu1 %5258 }
0x18ce   : > { %8536 = vmatprep.mubr.msk.f32.mxu1 %vm1798_vm2, %v5077_v20 }
0x18cf   : > { %8537 = vmatmul.mubr.msk.f32.vlgmr.msra.gmra.mxu1 %vm1798_vm2, %v5078_v15 }
0x18d0   : > { %8549 = vmatpush3.xpose.msk.msra.mxu1 %vm1070_vm0, %v10700_v29 }
0x18d1   : > { %8550 = vmatprep.subr.msk.mxu1 %vm1070_vm0, %v10732_v36 }
0x18d4   : > { %8551 = vmatpush3.xpose.msk.msra.mxu1 %vm1070_vm0, %v10732_v36 }
0x18d5   : > { %8552 = vmatprep.subr.msk.mxu1 %vm1070_vm0, %v5265_v24 }
0x18d8   : > { %8553 = vmatpush3.xpose.msk.msra.mxu1 %vm1070_vm0, %v5265_v24 }
0x18d9   : > { %8554 = vmatprep.subr.msk.mxu1 %vm1070_vm0, %v5263_v62 }
0x18dc   : > { %8555 = vmatpush3.xpose.msk.msra.mxu1 %vm1070_vm0, %v5263_v62 }
0x18dd   : > { %8556 = vmatprep.subr.msk.mxu1 %vm1070_vm0, %v5261_v48 }
0x18e0   : > { %8557 = vmatpush3.xpose.msk.msra.mxu1 %vm1070_vm0, %v5261_v48 }
0x18e1   : > { %8558 = vmatprep.subr.msk.mxu1 %vm1070_vm0, %v5259_v23 }
0x18e4   : > { %8559 = vmatpush3.xpose.msk.msra.mxu1 %vm1070_vm0, %v5259_v23 }
0x18f0   : > { %v5053_v29 = vpop.xlane.xlu0 %5052 }
0x18f1   : > { %9082 = vrcp.f32 %v5053_v29 }
0x18f2   : > { %v5056_v36 = vpop.xlane.xlu1 %5055 }
0x18f3   : > { %9084 = vrcp.f32 %v5056_v36 }
0x18f4   : > { %v5059_v41 = vpop.xlane.xlu0 %5058 }
0x18f5   : > { %9086 = vrcp.f32 %v5059_v41 }
0x18f6   : > { %v5062_v32 = vpop.xlane.xlu1 %5061 }
0x18f7   : > { %9088 = vrcp.f32 %v5062_v32 }
0x18f8   : > { %v5065_v19 = vpop.xlane.xlu0 %5064 }
0x18f9   : > { %9090 = vrcp.f32 %v5065_v19 }
0x18fa   : > { %v5068_v22 = vpop.xlane.xlu1 %5067 }
0x18fb   : > { %9092 = vrcp.f32 %v5068_v22 }
0x18fc   : > { %v5257_v43 = vpop.permute.xlu0 %5256 }
0x18fd   : > { %8560 = vmatprep.subr.msk.mxu1 %vm1070_vm0, %v5257_v43 }
0x18fe   : > { %v9083_v26 = vpop.eup %9082  ;;  %8561 = vmatpush3.xpose.msk.msra.mxu1 %vm1070_vm0, %v5257_v43  ;;  %v5255_v63 = vpop.permute.xlu1 %5254 }
0x18ff   : > { %8562 = vmatprep.subr.msk.mxu1 %vm1070_vm0, %v5255_v63  ;;  %v5079_v9 = vmul.f32 %v9083_v26, %v10746_v1 }
0x1900   : > { %v9085_v16 = vpop.eup %9084  ;;  %v5239_v39 = vpop.permute.xlu0 %5238 }
0x1901   : > { %8539 = vmatprep.mubr.msk.f32.mxu1 %vm1798_vm2, %v5079_v9  ;;  %v5080_v44 = vmul.f32 %v9085_v16, %v10748_v58 }
0x1902   : > { %v9087_v5 = vpop.eup %9086  ;;  %8563 = vmatpush3.xpose.msk.msra.mxu1 %vm1070_vm0, %v5255_v63  ;;  %v5241_v58 = vpop.permute.xlu1 %5240 }
0x1903   : > { %8540 = vmatmul.mubr.msk.f32.gmra.mxu1 %vm1798_vm2, %v5080_v44  ;;  %v5081_v38 = vmul.f32 %v9087_v5, %v10752_v25 }
0x1904   : > { %v9089_v61 = vpop.eup %9088  ;;  %v5243_v56 = vpop.permute.xlu0 %5242 }
0x1905   : > { %8542 = vmatprep.mubr.msk.f32.mxu1 %vm1798_vm2, %v5081_v38  ;;  %v5082_v24 = vmul.f32 %v9089_v61, %v10756_v18 }
0x1906   : > { %v9091_v62 = vpop.eup %9090  ;;  %v5245_v25 = vpop.permute.xlu1 %5244 }
0x1907   : > { %8543 = vmatmul.mubr.msk.f32.gmra.mxu1 %vm1798_vm2, %v5082_v24  ;;  %v5083_v1 = vmul.f32 %v9091_v62, %v10760_v60 }
0x1908   : > { %v9093_v27 = vpop.eup %9092  ;;  %v5247_v18 = vpop.permute.xlu0 %5246 }
0x1909   : > { %8545 = vmatprep.mubr.msk.f32.mxu1 %vm1798_vm2, %v5083_v1  ;;  %v5084_v55 = vmul.f32 %v9093_v27, %v10764_v13 }
0x190a   : > { %v5249_v60 = vpop.permute.xlu1 %5248 }
0x190b   : > { %8546 = vmatmul.mubr.msk.f32.gmra.mxu1 %vm1798_vm2, %v5084_v55 }
0x190c   : > { %8564 = vmatprep.mubr.msk.f32.mxu1 %vm1070_vm0, %v5239_v39  ;;  %v5251_v51 = vpop.permute.xlu0 %5250 }
0x190e   : > { %v5253_v13 = vpop.permute.xlu1 %5252 }
0x190f   : > { %8565 = vmatmul.mubr.msk.f32.vlgmr.msra.gmra.mxu1 %vm1070_vm0, %v5241_v58 }
0x1910   : > { %8567 = vmatprep.mubr.msk.f32.mxu1 %vm1070_vm0, %v5243_v56 }
0x1913   : > { %8568 = vmatmul.mubr.msk.f32.gmra.mxu1 %vm1070_vm0, %v5245_v25 }
0x1914   : > { %8570 = vmatprep.mubr.msk.f32.mxu1 %vm1070_vm0, %v5247_v18 }
0x1917   : > { %8571 = vmatmul.mubr.msk.f32.gmra.mxu1 %vm1070_vm0, %v5249_v60 }
0x1918   : > { %8573 = vmatprep.mubr.msk.f32.mxu1 %vm1070_vm0, %v5251_v51 }
0x191b   : > { %8574 = vmatmul.mubr.msk.f32.gmra.mxu1 %vm1070_vm0, %v5253_v13 }
0x198f   : > { %v10832_v20 = vpop.f32.mrf.mxu1 }
0x1991   : > { %v10834_v15 = vpop.f32.mrf.mxu1 }
0x19c3   : > { %v10836_v48 = vpop.f32.mrf.mxu1 }
0x19c5   : > { %v10838_v23 = vpop.f32.mrf.mxu1 }
0x19c7   : > { %v10840_v29 = vpop.f32.mrf.mxu1 }
0x19c9   : > { %v10842_v36 = vpop.f32.mrf.mxu1 }
0x19cb   : > { %v10844_v41 = vpop.f32.mrf.mxu1 }
0x19cd   : > { %v10846_v32 = vpop.f32.mrf.mxu1 }
0x19cf   : > { %v8566_v19 = vpop.f32.mrf.mxu1 }
0x19d0   : > { %v5410_v22 = vsel %vm1798_vm2, %v8566_v19, -inf }
0x19d1   : > { %5411 = vmax.xlane.f32.xlu1 %v5410_v22  ;;  %v5368_v43 = vpop.f32.mrf.mxu1 }
0x19d2   : > { %v5407_v26 = vsel %vm1798_vm2, %v5368_v43, -inf }
0x19d3   : > { %5408 = vmax.xlane.f32.xlu0 %v5407_v26  ;;  %v8569_v63 = vpop.f32.mrf.mxu1 }
0x19d4   : > { %v5416_v38 = vsel %vm1798_vm2, %v8569_v63, -inf }
0x19d5   : > { %v5378_v9 = vpop.f32.mrf.mxu1 }
0x19d6   : > { %v5413_v16 = vsel %vm1798_vm2, %v5378_v9, -inf }
0x19d7   : > { %5414 = vmax.xlane.f32.xlu0 %v5413_v16  ;;  %v8572_v44 = vpop.f32.mrf.mxu1 }
0x19d8   : > { %v5422_v39 = vsel %vm1798_vm2, %v8572_v44, -inf }
0x19d9   : > { %v5388_v5 = vpop.f32.mrf.mxu1 }
0x19da   : > { %v5419_v61 = vsel %vm1798_vm2, %v5388_v5, -inf }
0x19db   : > { %5417 = vmax.xlane.f32.xlu0 %v5416_v38  ;;  %5420 = vmax.xlane.f32.xlu1 %v5419_v61  ;;  %v8575_v24 = vpop.f32.mrf.mxu1 }
0x19dc   : > { %v5428_v62 = vsel %vm1798_vm2, %v8575_v24, -inf }
0x19dd   : > { %v10863_v1 = vpop.f32.mrf.mxu1 }
0x19de   : > { %v5425_v27 = vsel %vm1798_vm2, %v10863_v1, -inf }
0x19df   : > { %5423 = vmax.xlane.f32.xlu0 %v5422_v39 }
0x19e3   : > { %5429 = vmax.xlane.f32.xlu0 %v5428_v62 }
0x19ec   : > { %5509 = vrot.lane.b32.xlu1 %v10332_v8, %s11303_s28 }
0x19f0   : > { %5505 = vrot.lane.b32.xlu1 %v10338_v52, %s11303_s28 }
0x19f9   : > { %5507 = vrot.lane.b32.xlu0 %v10334_v7, %s11303_s28 }
0x19fd   : > { %5501 = vrot.lane.b32.xlu0 %v10346_v59, %s11303_s28 }
0x1a14   : > { %5426 = vmax.xlane.f32.xlu1 %v5425_v27 }
0x1a25   : > { %5503 = vrot.lane.b32.xlu1 %v10342_v28, %s11303_s28 }
0x1a29   : > { %5499 = vrot.lane.b32.xlu1 %v10350_v35, %s11303_s28 }
0x1a5a   : > { %v5412_v8 = vpop.xlane.xlu1 %5411 }
0x1a5b   : > { %v5432_v52 = vsub.f32 %v8566_v19, %v5412_v8 }
0x1a5c   : > { %v5409_v58 = vpop.xlane.xlu0 %5408 }
0x1a5d   : > { %v5441_v55 = vmul.f32 1.442695, %v5432_v52  ;;  %v5431_v7 = vsub.f32 %v5368_v43, %v5409_v58 }
0x1a5f   : > { %9094 = vpow2.f32 %v5441_v55  ;;  %v5439_v56 = vmul.f32 1.442695, %v5431_v7 }
0x1a60   : > { %v5415_v59 = vpop.xlane.xlu0 %5414 }
0x1a61   : > { %9096 = vpow2.f32 %v5439_v56  ;;  %v5433_v25 = vsub.f32 %v5378_v9, %v5415_v59 }
0x1a63   : > { %v5443_v18 = vmul.f32 1.442695, %v5433_v25 }
0x1a64   : > { %v5418_v60 = vpop.xlane.xlu0 %5417  ;;  %v5421_v51 = vpop.xlane.xlu1 %5420 }
0x1a65   : > { %9098 = vpow2.f32 %v5443_v18  ;;  %v5434_v13 = vsub.f32 %v8569_v63, %v5418_v60  ;;  %v5435_v22 = vsub.f32 %v5388_v5, %v5421_v51 }
0x1a67   : > { %v5445_v28 = vmul.f32 1.442695, %v5434_v13  ;;  %v5447_v26 = vmul.f32 1.442695, %v5435_v22 }
0x1a68   : > { %v5424_v16 = vpop.xlane.xlu0 %5423  ;;  %v5510_v35 = vpop.permute.xlu1 %5509 }
0x1a69   : > { %9100 = vpow2.f32 %v5445_v28  ;;  %v5436_v19 = vsub.f32 %v8572_v44, %v5424_v16  ;;  %8576 = vmatprep.subr.mxu0 %v5510_v35 }
0x1a6a   : > { %9102 = vpow2.f32 %v5447_v26  ;;  %8577 = vmatpush3.msra.mxu0 %v5510_v35 }
0x1a6b   : > { %v5449_v43 = vmul.f32 1.442695, %v5436_v19 }
0x1a6c   : > { %v10871_v38 = vpop.eup %9094  ;;  %v5430_v61 = vpop.xlane.xlu0 %5429 }
0x1a6d   : > { %9104 = vpow2.f32 %v5449_v43  ;;  %v5438_v9 = vsub.f32 %v8575_v24, %v5430_v61  ;;  %v5458_v39 = vsel %vm1798_vm2, %v10871_v38, 0.0  ;;  %v5506_v8 = vpop.permute.xlu1 %5505 }
0x1a6e   : > { %v10875_v63 = vpop.eup %9096  ;;  %5459 = vadd.xlane.f32.xlu0 %v5458_v39 }
0x1a6f   : > { %v5453_v5 = vmul.f32 1.442695, %v5438_v9  ;;  %v5455_v62 = vsel %vm1798_vm2, %v10875_v63, 0.0 }
0x1a70   : > { %v5508_v44 = vpop.permute.xlu0 %5507  ;;  %5456 = vadd.xlane.f32.xlu1 %v5455_v62 }
0x1a71   : > { %9106 = vpow2.f32 %v5453_v5  ;;  %8578 = vmatprep.subr.mxu0 %v5508_v44 }
0x1a72   : > { %v10879_v27 = vpop.eup %9098  ;;  %8579 = vmatpush3.msra.mxu0 %v5508_v44 }
0x1a73   : > { %8580 = vmatprep.subr.mxu0 %v5506_v8  ;;  %v5461_v24 = vsel %vm1798_vm2, %v10879_v27, 0.0 }
0x1a74   : > { %5462 = vadd.xlane.f32.xlu1 %v5461_v24  ;;  %8581 = vmatpush3.msra.mxu0 %v5506_v8  ;;  %v5502_v28 = vpop.permute.xlu0 %5501 }
0x1a76   : > { %v10883_v52 = vpop.eup %9100 }
0x1a77   : > { %v10885_v58 = vpop.eup %9102  ;;  %v5464_v55 = vsel %vm1798_vm2, %v10883_v52, 0.0 }
0x1a78   : > { %5465 = vadd.xlane.f32.xlu0 %v5464_v55  ;;  %v5467_v7 = vsel %vm1798_vm2, %v10885_v58, 0.0 }
0x1a79   : > { %5468 = vadd.xlane.f32.xlu1 %v5467_v7 }
0x1a7a   : > { %v10891_v56 = vpop.eup %9104 }
0x1a7b   : > { %v5470_v59 = vsel %vm1798_vm2, %v10891_v56, 0.0 }
0x1a7c   : > { %5471 = vadd.xlane.f32.xlu0 %v5470_v59 }
0x1a7e   : > { %v10895_v25 = vpop.eup %9106 }
0x1a7f   : > { %v5476_v18 = vsel %vm1798_vm2, %v10895_v25, 0.0 }
0x1a80   : > { %5477 = vadd.xlane.f32.xlu0 %v5476_v18 }
0x1a96   : > { %5497 = vrot.lane.b32.xlu0 %v10354_v50, %s11303_s28 }
0x1a9a   : > { %5656 = vrot.lane.b32.xlu0 %v10706_v17, %s11304_s1 }
0x1a9d   : > { %v5427_v60 = vpop.xlane.xlu1 %5426 }
0x1a9e   : > { %v5437_v51 = vsub.f32 %v10863_v1, %v5427_v60  ;;  %5688 = vrot.lane.b32.xlu0 %v10834_v15, %s11305_s23 }
0x1aa0   : > { %v5451_v13 = vmul.f32 1.442695, %v5437_v51 }
0x1aa1   : > { %v5504_v22 = vpop.permute.xlu1 %5503 }
0x1aa2   : > { %9108 = vpow2.f32 %v5451_v13  ;;  %5660 = vrot.lane.b32.xlu0 %v10710_v42, %s11304_s1  ;;  %8582 = vmatprep.subr.mxu0 %v5504_v22 }
0x1aa3   : > { %8583 = vmatpush3.msra.mxu0 %v5504_v22 }
0x1aa4   : > { %8584 = vmatprep.subr.mxu0 %v5502_v28 }
0x1aa5   : > { %8585 = vmatpush3.msra.mxu0 %v5502_v28  ;;  %v5500_v50 = vpop.permute.xlu1 %5499 }
0x1aa6   : > { %5692 = vrot.lane.b32.xlu0 %v10838_v23, %s11305_s23  ;;  %8586 = vmatprep.subr.mxu0 %v5500_v50 }
0x1aa7   : > { %8587 = vmatpush3.msra.mxu0 %v5500_v50 }
0x1aaa   : > { %5664 = vrot.lane.b32.xlu0 %v10714_v40, %s11304_s1 }
0x1aae   : > { %5696 = vrot.lane.b32.xlu0 %v10842_v36, %s11305_s23 }
0x1aaf   : > { %v9109_v17 = vpop.eup %9108 }
0x1ab0   : > { %v5473_v42 = vsel %vm1798_vm2, %v9109_v17, 0.0 }
0x1ab1   : > { %5474 = vadd.xlane.f32.xlu1 %v5473_v42 }
0x1ab2   : > { %5668 = vrot.lane.b32.xlu0 %v10718_v2, %s11304_s1 }
0x1ab6   : > { %5700 = vrot.lane.b32.xlu0 %v10846_v32, %s11305_s23 }
0x1ac2   : > { %5495 = vrot.lane.b32.xlu1 %v10328_v47, %s11303_s28  ;;  %s11306_s28 = sld [smem:[#allocation17_spill]] }
0x1ac6   : > { %5658 = vrot.lane.b32.xlu1 %v10704_v34, %s11304_s1 }
0x1ac8   : > { %v5771_v5 = vld [vmem:[%s11306_s28 + $0x18] sm:$0xff]  ;;  %v5770_v62 = vld [vmem:[%s11306_s28 + $0x10] sm:$0xff]  ;;  %v5769_v44 = vld [vmem:[%s11306_s28 + $0x8] sm:$0xff] }
0x1aca   : > { %5690 = vrot.lane.b32.xlu1 %v10832_v20, %s11305_s23 }
0x1ace   : > { %5662 = vrot.lane.b32.xlu1 %v10708_v45, %s11304_s1 }
0x1ad2   : > { %5694 = vrot.lane.b32.xlu1 %v10836_v48, %s11305_s23 }
0x1ad6   : > { %5666 = vrot.lane.b32.xlu1 %v10712_v31, %s11304_s1 }
0x1ada   : > { %5698 = vrot.lane.b32.xlu1 %v10840_v29, %s11305_s23 }
0x1ade   : > { %5670 = vrot.lane.b32.xlu1 %v10716_v49, %s11304_s1 }
0x1ae2   : > { %5702 = vrot.lane.b32.xlu1 %v10844_v41, %s11305_s23  ;;  %s11307_s23 = smov 24  }
0x1af7   : > { %v5460_v34 = vpop.xlane.xlu0 %5459 }
0x1af9   : > { %v5457_v47 = vpop.xlane.xlu1 %5456 }
0x1afa   : > { %9110 = vrcp.f32 %v5457_v47 }
0x1afb   : > { %9112 = vrcp.f32 %v5460_v34 }
0x1afd   : > { %v5463_v48 = vpop.xlane.xlu1 %5462 }
0x1afe   : > { %9114 = vrcp.f32 %v5463_v48 }
0x1b01   : > { %v5466_v40 = vpop.xlane.xlu0 %5465 }
0x1b02   : > { %v5469_v49 = vpop.xlane.xlu1 %5468  ;;  %9116 = vrcp.f32 %v5466_v40 }
0x1b03   : > { %9118 = vrcp.f32 %v5469_v49 }
0x1b05   : > { %v5472_v45 = vpop.xlane.xlu0 %5471 }
0x1b06   : > { %9120 = vrcp.f32 %v5472_v45 }
0x1b07   : > { %v9111_v2 = vpop.eup %9110 }
0x1b08   : > { %v5487_v20 = vmul.f32 %v9111_v2, %v10875_v63  ;;  %v9113_v29 = vpop.eup %9112 }
0x1b09   : > { %v5478_v15 = vpop.xlane.xlu0 %5477  ;;  %v5488_v32 = vmul.f32 %v9113_v29, %v10871_v38 }
0x1b0a   : > { %8592 = vmatprep.mubr.msk.f32.mxu0 %vm1798_vm2, %v5487_v20  ;;  %9122 = vrcp.f32 %v5478_v15 }
0x1b0b   : > { %v9115_v36 = vpop.eup %9114 }
0x1b0c   : > { %v5489_v26 = vmul.f32 %v9115_v36, %v10879_v27  ;;  %v5768_v27 = vld [vmem:[%s11306_s28] sm:$0xff] }
0x1b0d   : > { %v5498_v31 = vpop.permute.xlu0 %5497 }
0x1b0e   : > { %8588 = vmatprep.subr.mxu0 %v5498_v31 }
0x1b0f   : > { %8589 = vmatpush3.msra.mxu0 %v5498_v31  ;;  %v9117_v1 = vpop.eup %9116 }
0x1b10   : > { %v9119_v16 = vpop.eup %9118  ;;  %v5490_v35 = vmul.f32 %v9117_v1, %v10883_v52 }
0x1b11   : > { %v5491_v43 = vmul.f32 %v9119_v16, %v10885_v58  ;;  %v5657_v18 = vpop.permute.xlu0 %5656 }
0x1b12   : > { %v5744_v31 = vsel %vm1070_vm0, %v10554_v57, %v5657_v18 }
0x1b13   : > { %v9121_v19 = vpop.eup %9120 }
0x1b14   : > { %v5492_v61 = vmul.f32 %v9121_v19, %v10891_v56 }
0x1b15   : > { %v5689_v51 = vpop.permute.xlu0 %5688 }
0x1b16   : > { %v5752_v48 = vsel %vm3374_vm3, %v5744_v31, %v5689_v51 }
0x1b17   : > { %v9123_v38 = vpop.eup %9122 }
0x1b18   : > { %v5494_v63 = vmul.f32 %v9123_v38, %v10895_v25 }
0x1b19   : > { %v5661_v22 = vpop.permute.xlu0 %5660 }
0x1b1a   : > { %v5746_v1 = vsel %vm1070_vm0, %v10558_v53, %v5661_v22 }
0x1b1d   : > { %v5693_v50 = vpop.permute.xlu0 %5692 }
0x1b1e   : > { %v5754_v57 = vsel %vm3374_vm3, %v5746_v1, %v5693_v50 }
0x1b21   : > { %v5665_v42 = vpop.permute.xlu0 %5664 }
0x1b22   : > { %v5748_v53 = vsel %vm1070_vm0, %v10562_v0, %v5665_v42  ;;  %v6106_v42 = vld [vmem:[%s11310_s5 + $0x30] sm:$0xff] }
0x1b25   : > { %v5697_v34 = vpop.permute.xlu0 %5696 }
0x1b26   : > { %v5756_v38 = vsel %vm3374_vm3, %v5748_v53, %v5697_v34 }
0x1b29   : > { %v5669_v45 = vpop.permute.xlu0 %5668 }
0x1b2a   : > { %v5750_v0 = vsel %vm1070_vm0, %v10566_v11, %v5669_v45 }
0x1b2d   : > { %v5701_v20 = vpop.permute.xlu0 %5700 }
0x1b3a   : > { %v5475_v23 = vpop.xlane.xlu1 %5474 }
0x1b3b   : > { %9124 = vrcp.f32 %v5475_v23 }
0x1b3e   : > { %v5496_v41 = vpop.permute.xlu1 %5495 }
0x1b3f   : > { %8590 = vmatprep.subr.mxu0 %v5496_v41 }
0x1b40   : > { %8591 = vmatpush3.msra.mxu0 %v5496_v41 }
0x1b41   : > { %8593 = vmatmul.mubr.msk.f32.vlgmr.msra.gmra.mxu0 %vm1798_vm2, %v5488_v32  ;;  %8604 = vmatprep.subr.mxu0 %v5771_v5 }
0x1b42   : > { %8595 = vmatprep.mubr.msk.f32.mxu0 %vm1798_vm2, %v5489_v26  ;;  %8605 = vmatpush3.msra.mxu0 %v5771_v5  ;;  %v5659_v25 = vpop.permute.xlu1 %5658 }
0x1b43   : > { %8606 = vmatprep.subr.mxu0 %v5770_v62  ;;  %v5745_v49 = vsel %vm1070_vm0, %v10552_v30, %v5659_v25  ;;  %v7437_v25 = vld [vmem:[%s11309_s3] ss:$0 sm:$0xff]  ;;  %s11312_s3 = sld [smem:[#allocation23_spill]] }
0x1b44   : > { %8607 = vmatpush3.msra.mxu0 %v5770_v62 }
0x1b45   : > { %8596 = vmatmul.mubr.msk.f32.gmra.mxu0 %vm1798_vm2, %v5490_v35  ;;  %8608 = vmatprep.subr.mxu0 %v5769_v44 }
0x1b46   : > { %8598 = vmatprep.mubr.msk.f32.mxu0 %vm1798_vm2, %v5491_v43  ;;  %8609 = vmatpush3.msra.mxu0 %v5769_v44  ;;  %v5691_v60 = vpop.permute.xlu1 %5690 }
0x1b47   : > { %8610 = vmatprep.subr.mxu0 %v5768_v27  ;;  %v5753_v29 = vsel %vm3374_vm3, %v5745_v49, %v5691_v60 }
0x1b48   : > { %v9125_v9 = vpop.eup %9124  ;;  %8611 = vmatpush3.msra.mxu0 %v5768_v27 }
0x1b49   : > { %8599 = vmatmul.mubr.msk.f32.gmra.mxu0 %vm1798_vm2, %v5492_v61  ;;  %v5493_v39 = vmul.f32 %v9125_v9, %v9109_v17 }
0x1b4a   : > { %v5663_v13 = vpop.permute.xlu1 %5662 }
0x1b4b   : > { %8601 = vmatprep.mubr.msk.f32.mxu0 %vm1798_vm2, %v5493_v39  ;;  %v5747_v30 = vsel %vm1070_vm0, %v10556_v12, %v5663_v13 }
0x1b4d   : > { %8602 = vmatmul.mubr.msk.f32.gmra.mxu0 %vm1798_vm2, %v5494_v63 }
0x1b4e   : > { %v5695_v28 = vpop.permute.xlu1 %5694 }
0x1b4f   : > { %v5755_v16 = vsel %vm3374_vm3, %v5747_v30, %v5695_v28 }
0x1b52   : > { %v5667_v17 = vpop.permute.xlu1 %5666 }
0x1b53   : > { %v5749_v12 = vsel %vm1070_vm0, %v10560_v21, %v5667_v17  ;;  %v5758_v21 = vsel %vm3374_vm3, %v5750_v0, %v5701_v20  ;;  %v6107_v17 = vld [vmem:[%s11310_s5 + $0x38] sm:$0xff]  ;;  %v6104_v20 = vld [vmem:[%s11310_s5 + $0x20] sm:$0xff] }
0x1b54   : > { %8652 = vmatprep.subr.mxu0 %v6107_v17  ;;  %v6100_v0 = vld [vmem:[%s11310_s5] sm:$0xff] }
0x1b56   : > { %v5699_v47 = vpop.permute.xlu1 %5698 }
0x1b57   : > { %v5757_v9 = vsel %vm3374_vm3, %v5749_v12, %v5699_v47 }
0x1b5a   : > { %v5671_v40 = vpop.permute.xlu1 %5670 }
0x1b5b   : > { %v5751_v62 = vsel %vm1070_vm0, %v10564_v10, %v5671_v40  ;;  %v6105_v40 = vld [vmem:[%s11310_s5 + $0x28] sm:$0xff] }
0x1b5e   : > { %v5703_v2 = vpop.permute.xlu1 %5702 }
0x1b5f   : > { %v5759_v27 = vsel %vm3374_vm3, %v5751_v62, %v5703_v2 }
0x1c01   : > { %v8594_v8 = vpop.f32.mrf.mxu0 }
0x1c02   : > { %5722 = vrot.lane.b32.xlu1 %v8594_v8, %s11307_s23 }
0x1c03   : > { %v5609_v24 = vpop.f32.mrf.mxu0 }
0x1c04   : > { %5720 = vrot.lane.b32.xlu0 %v5609_v24, %s11307_s23 }
0x1c05   : > { %v8597_v52 = vpop.f32.mrf.mxu0 }
0x1c06   : > { %5726 = vrot.lane.b32.xlu1 %v8597_v52, %s11307_s23 }
0x1c07   : > { %v5619_v58 = vpop.f32.mrf.mxu0 }
0x1c08   : > { %5724 = vrot.lane.b32.xlu0 %v5619_v58, %s11307_s23 }
0x1c09   : > { %v8600_v55 = vpop.f32.mrf.mxu0 }
0x1c0a   : > { %5730 = vrot.lane.b32.xlu1 %v8600_v55, %s11307_s23 }
0x1c0b   : > { %v5629_v7 = vpop.f32.mrf.mxu0 }
0x1c0c   : > { %5728 = vrot.lane.b32.xlu0 %v5629_v7, %s11307_s23 }
0x1c0d   : > { %v8603_v56 = vpop.f32.mrf.mxu0 }
0x1c0e   : > { %5734 = vrot.lane.b32.xlu1 %v8603_v56, %s11307_s23 }
0x1c0f   : > { %v5639_v59 = vpop.f32.mrf.mxu0 }
0x1c10   : > { %5732 = vrot.lane.b32.xlu0 %v5639_v59, %s11307_s23  ;;  %s11308_s23 = sld [smem:[#allocation19_spill]] }
0x1c16   : > { %v5955_v11 = vld [vmem:[%s11308_s23 + $0x38] sm:$0xff]  ;;  %v5954_v52 = vld [vmem:[%s11308_s23 + $0x30] sm:$0xff]  ;;  %v5953_v58 = vld [vmem:[%s11308_s23 + $0x28] sm:$0xff] }
0x1c17   : > { %8624 = vmatprep.subr.mxu1 %v5955_v11  ;;  %v5952_v10 = vld [vmem:[%s11308_s23 + $0x20] sm:$0xff]  ;;  %v5951_v55 = vld [vmem:[%s11308_s23 + $0x18] sm:$0xff]  ;;  %v5950_v7 = vld [vmem:[%s11308_s23 + $0x10] sm:$0xff] }
0x1c18   : > { %8625 = vmatpush3.msra.mxu1 %v5955_v11  ;;  %v5949_v56 = vld [vmem:[%s11308_s23 + $0x8] sm:$0xff]  ;;  %v5948_v59 = vld [vmem:[%s11308_s23] sm:$0xff] }
0x1c19   : > { %8626 = vmatprep.subr.mxu1 %v5954_v52 }
0x1c1a   : > { %8627 = vmatpush3.msra.mxu1 %v5954_v52 }
0x1c1b   : > { %8628 = vmatprep.subr.mxu1 %v5953_v58 }
0x1c1c   : > { %8629 = vmatpush3.msra.mxu1 %v5953_v58 }
0x1c1d   : > { %8630 = vmatprep.subr.mxu1 %v5952_v10 }
0x1c1e   : > { %8631 = vmatpush3.msra.mxu1 %v5952_v10 }
0x1c1f   : > { %8632 = vmatprep.subr.mxu1 %v5951_v55 }
0x1c20   : > { %8633 = vmatpush3.msra.mxu1 %v5951_v55 }
0x1c21   : > { %8634 = vmatprep.subr.mxu1 %v5950_v7 }
0x1c22   : > { %8635 = vmatpush3.msra.mxu1 %v5950_v7 }
0x1c23   : > { %8636 = vmatprep.subr.mxu1 %v5949_v56 }
0x1c24   : > { %8637 = vmatpush3.msra.mxu1 %v5949_v56 }
0x1c25   : > { %8638 = vmatprep.subr.mxu1 %v5948_v59 }
0x1c26   : > { %8639 = vmatpush3.msra.mxu1 %v5948_v59 }
0x1c74   : > { %v5723_v15 = vpop.permute.xlu1 %5722 }
0x1c75   : > { %v5761_v41 = vsel %vm3383_vm4, %v5753_v29, %v5723_v15 }
0x1c76   : > { %v5721_v23 = vpop.permute.xlu0 %5720 }
0x1c77   : > { %v5760_v36 = vsel %vm3383_vm4, %v5752_v48, %v5721_v23 }
0x1c78   : > { %8612 = vmatprep.mubr.msk.f32.mxu0 %vm1219_vm1, %v5760_v36  ;;  %v5727_v32 = vpop.permute.xlu1 %5726 }
0x1c79   : > { %8613 = vmatmul.mubr.msk.f32.vlgmr.msra.gmra.mxu0 %vm1219_vm1, %v5761_v41  ;;  %v5763_v19 = vsel %vm3383_vm4, %v5755_v16, %v5727_v32 }
0x1c7a   : > { %v5725_v26 = vpop.permute.xlu0 %5724  ;;  %8653 = vmatpush3.msra.mxu0 %v6107_v17 }
0x1c7b   : > { %v5762_v35 = vsel %vm3383_vm4, %v5754_v57, %v5725_v26  ;;  %8654 = vmatprep.subr.mxu0 %v6106_v42 }
0x1c7c   : > { %8615 = vmatprep.mubr.msk.f32.mxu0 %vm1219_vm1, %v5762_v35  ;;  %v5731_v43 = vpop.permute.xlu1 %5730  ;;  %8655 = vmatpush3.msra.mxu0 %v6106_v42 }
0x1c7d   : > { %8616 = vmatmul.mubr.msk.f32.gmra.mxu0 %vm1219_vm1, %v5763_v19  ;;  %v5765_v63 = vsel %vm3383_vm4, %v5757_v9, %v5731_v43  ;;  %8656 = vmatprep.subr.mxu0 %v6105_v40  ;;  %v6103_v9 = vld [vmem:[%s11310_s5 + $0x18] sm:$0xff] }
0x1c7e   : > { %v5729_v61 = vpop.permute.xlu0 %5728  ;;  %8657 = vmatpush3.msra.mxu0 %v6105_v40  ;;  %v6253_v40 = vld [vmem:[%s11312_s3 + $0x8] sm:$0xff] }
0x1c7f   : > { %v5764_v39 = vsel %vm3383_vm4, %v5756_v38, %v5729_v61  ;;  %8658 = vmatprep.subr.mxu0 %v6104_v20 }
0x1c80   : > { %8618 = vmatprep.mubr.msk.f32.mxu0 %vm1219_vm1, %v5764_v39  ;;  %v5735_v5 = vpop.permute.xlu1 %5734  ;;  %8659 = vmatpush3.msra.mxu0 %v6104_v20  ;;  %v6102_v39 = vld [vmem:[%s11310_s5 + $0x10] sm:$0xff] }
0x1c81   : > { %8619 = vmatmul.mubr.msk.f32.gmra.mxu0 %vm1219_vm1, %v5765_v63  ;;  %v5767_v24 = vsel %vm3383_vm4, %v5759_v27, %v5735_v5  ;;  %8660 = vmatprep.subr.mxu0 %v6103_v9  ;;  %v6101_v63 = vld [vmem:[%s11310_s5 + $0x8] sm:$0xff]  ;;  %v6255_v5 = vld [vmem:[%s11312_s3 + $0x18] sm:$0xff]  ;;  %s11315_s5 = sld [smem:[#allocation25_spill]] }
0x1c82   : > { %v5733_v44 = vpop.permute.xlu0 %5732  ;;  %8661 = vmatpush3.msra.mxu0 %v6103_v9  ;;  %8680 = vmatprep.subr.mxu1 %v6255_v5 }
0x1c83   : > { %v5766_v8 = vsel %vm3383_vm4, %v5758_v21, %v5733_v44  ;;  %8662 = vmatprep.subr.mxu0 %v6102_v39  ;;  %v6254_v21 = vld [vmem:[%s11312_s3 + $0x10] sm:$0xff] }
0x1c84   : > { %8621 = vmatprep.mubr.msk.f32.mxu0 %vm1219_vm1, %v5766_v8  ;;  %8663 = vmatpush3.msra.mxu0 %v6102_v39 }
0x1c85   : > { %8622 = vmatmul.mubr.msk.f32.gmra.mxu0 %vm1219_vm1, %v5767_v24  ;;  %8664 = vmatprep.subr.mxu0 %v6101_v63 }
0x1c86   : > { %8665 = vmatpush3.msra.mxu0 %v6101_v63 }
0x1c87   : > { %8666 = vmatprep.subr.mxu0 %v6100_v0  ;;  %v6403_v20 = vld [vmem:[%s11315_s5 + $0x18] sm:$0xff] }
0x1c88   : > { %8667 = vmatpush3.msra.mxu0 %v6100_v0 }
0x1c89   : > { %8700 = vmatprep.subr.mxu0 %v6403_v20 }
0x1d39   : > { %v8614_v18 = vpop.f32.mrf.mxu0 }
0x1d3a   : > { %v5875_v60 = vadd.f32 %v8614_v18, %v7437_v25 }
0x1d3b   : > { %v5869_v51 = vpop.f32.mrf.mxu0 }
0x1d3c   : > { %v5870_v13 = vadd.f32 %v7437_v25, %v5869_v51  ;;  %5918 = vrot.lane.b32.xlu1 %v5875_v60, %s11311_s6 }
0x1d3d   : > { %v8617_v22 = vpop.f32.mrf.mxu0 }
0x1d3e   : > { %v5885_v28 = vadd.f32 %v8617_v22, %v7437_v25  ;;  %5916 = vrot.lane.b32.xlu0 %v5870_v13, %s11311_s6 }
0x1d3f   : > { %v5879_v50 = vpop.f32.mrf.mxu0 }
0x1d40   : > { %v5880_v47 = vadd.f32 %v7437_v25, %v5879_v50  ;;  %5922 = vrot.lane.b32.xlu1 %v5885_v28, %s11311_s6 }
0x1d41   : > { %v8620_v34 = vpop.f32.mrf.mxu0 }
0x1d42   : > { %v5895_v45 = vadd.f32 %v8620_v34, %v7437_v25  ;;  %5920 = vrot.lane.b32.xlu0 %v5880_v47, %s11311_s6 }
0x1d43   : > { %v5889_v2 = vpop.f32.mrf.mxu0 }
0x1d44   : > { %v5890_v15 = vadd.f32 %v7437_v25, %v5889_v2  ;;  %5926 = vrot.lane.b32.xlu1 %v5895_v45, %s11311_s6  ;;  %v6252_v45 = vld [vmem:[%s11312_s3] sm:$0xff]  ;;  %s11318_s3 = sld [smem:[#allocation24_spill]] }
0x1d45   : > { %v8623_v31 = vpop.f32.mrf.mxu0 }
0x1d46   : > { %v5905_v48 = vadd.f32 %v8623_v31, %v7437_v25  ;;  %5924 = vrot.lane.b32.xlu0 %v5890_v15, %s11311_s6  ;;  %v6402_v15 = vld [vmem:[%s11315_s5 + $0x10] sm:$0xff]  ;;  %v7455_v31 = vld [vmem:[%s11316_s8] ss:$0 sm:$0xff]  ;;  %s11317_s8 = sld [smem:[#allocation29_spill]] }
0x1d47   : > { %v5899_v49 = vpop.f32.mrf.mxu0 }
0x1d48   : > { %v5900_v23 = vadd.f32 %v7437_v25, %v5899_v49  ;;  %5930 = vrot.lane.b32.xlu1 %v5905_v48, %s11311_s6 }
0x1d4a   : > { %5928 = vrot.lane.b32.xlu0 %v5900_v23, %s11311_s6  ;;  %s11313_s6 = sld [smem:[#allocation20_spill]] }
0x1d50   : > { %v7446_v62 = vld [vmem:[%s11313_s6] ss:$0 sm:$0xff]  ;;  %s11314_s6 = sld [smem:[#allocation27_spill]] }
0x1d56   : > { %v6587_v2 = vld [vmem:[%s11314_s6 + $0x18] sm:$0xff] }
0x1dae   : > { %v5919_v29 = vpop.permute.xlu1 %5918 }
0x1daf   : > { %v5941_v32 = vsel %vm1219_vm1, %v10291_v54, %v5919_v29 }
0x1db0   : > { %v5917_v36 = vpop.permute.xlu0 %5916 }
0x1db1   : > { %v5940_v41 = vsel %vm1219_vm1, %v10288_v33, %v5917_v36 }
0x1db2   : > { %8640 = vmatprep.mubr.msk.f32.mxu1 %vm1798_vm2, %v5940_v41  ;;  %v5923_v1 = vpop.permute.xlu1 %5922 }
0x1db3   : > { %8641 = vmatmul.mubr.msk.f32.vlgmr.msra.gmra.mxu1 %vm1798_vm2, %v5941_v32  ;;  %v5943_v26 = vsel %vm1219_vm1, %v10301_v3, %v5923_v1 }
0x1db4   : > { %v5921_v57 = vpop.permute.xlu0 %5920  ;;  %8681 = vmatpush3.msra.mxu1 %v6255_v5 }
0x1db5   : > { %v5942_v30 = vsel %vm1219_vm1, %v10298_v4, %v5921_v57  ;;  %8682 = vmatprep.subr.mxu1 %v6254_v21 }
0x1db6   : > { %8643 = vmatprep.mubr.msk.f32.mxu1 %vm1798_vm2, %v5942_v30  ;;  %v5927_v16 = vpop.permute.xlu1 %5926  ;;  %8683 = vmatpush3.msra.mxu1 %v6254_v21 }
0x1db7   : > { %8644 = vmatmul.mubr.msk.f32.gmra.mxu1 %vm1798_vm2, %v5943_v26  ;;  %v5945_v43 = vsel %vm1219_vm1, %v10311_v14, %v5927_v16  ;;  %8684 = vmatprep.subr.mxu1 %v6253_v40  ;;  %v6586_v26 = vld [vmem:[%s11314_s6 + $0x10] sm:$0xff] }
0x1db8   : > { %v5925_v35 = vpop.permute.xlu0 %5924  ;;  %8685 = vmatpush3.msra.mxu1 %v6253_v40 }
0x1db9   : > { %v5944_v19 = vsel %vm1219_vm1, %v10308_v37, %v5925_v35  ;;  %8686 = vmatprep.subr.mxu1 %v6252_v45 }
0x1dba   : > { %8646 = vmatprep.mubr.msk.f32.mxu1 %vm1798_vm2, %v5944_v19  ;;  %v5931_v53 = vpop.permute.xlu1 %5930  ;;  %8687 = vmatpush3.msra.mxu1 %v6252_v45  ;;  %v6585_v19 = vld [vmem:[%s11314_s6 + $0x8] sm:$0xff] }
0x1dbb   : > { %8647 = vmatmul.mubr.msk.f32.gmra.mxu1 %vm1798_vm2, %v5945_v43  ;;  %v5947_v61 = vsel %vm1219_vm1, %v10321_v46, %v5931_v53  ;;  %8720 = vmatprep.subr.mxu1 %v6587_v2 }
0x1dbc   : > { %v5929_v38 = vpop.permute.xlu0 %5928 }
0x1dbd   : > { %v5946_v12 = vsel %vm1219_vm1, %v10318_v6, %v5929_v38  ;;  %v6584_v38 = vld [vmem:[%s11314_s6] sm:$0xff] }
0x1dbe   : > { %8649 = vmatprep.mubr.msk.f32.mxu1 %vm1798_vm2, %v5946_v12 }
0x1dbf   : > { %8650 = vmatmul.mubr.msk.f32.gmra.mxu1 %vm1798_vm2, %v5947_v61 }
0x1e73   : > { %v8642_v44 = vpop.f32.mrf.mxu1 }
0x1e74   : > { %v6059_v27 = vadd.f32 %v8642_v44, %v7446_v62 }
0x1e75   : > { %v6053_v8 = vpop.f32.mrf.mxu1 }
0x1e76   : > { %v6054_v24 = vadd.f32 %v7446_v62, %v6053_v8  ;;  %v6093_v58 = vmax.f32 %v6059_v27, 0.0 }
0x1e77   : > { %v8645_v11 = vpop.f32.mrf.mxu1 }
0x1e78   : > { %v6092_v52 = vmax.f32 %v6054_v24, 0.0  ;;  %v6069_v10 = vadd.f32 %v8645_v11, %v7446_v62 }
0x1e79   : > { %v6063_v55 = vpop.f32.mrf.mxu1 }
0x1e7a   : > { %v6064_v7 = vadd.f32 %v7446_v62, %v6063_v55  ;;  %8668 = vmatprep.mubr.msk.f32.mxu0 %vm1798_vm2, %v6092_v52  ;;  %v6095_v25 = vmax.f32 %v6069_v10, 0.0  ;;  %v6710_v10 = vld [vmem:[%s11317_s8 + $0x10] sm:$0xff] }
0x1e7b   : > { %v8648_v56 = vpop.f32.mrf.mxu1  ;;  %8669 = vmatmul.mubr.msk.f32.vlgmr.msra.gmra.mxu0 %vm1798_vm2, %v6093_v58 }
0x1e7c   : > { %v6094_v59 = vmax.f32 %v6064_v7, 0.0  ;;  %v6079_v18 = vadd.f32 %v8648_v56, %v7446_v62  ;;  %8701 = vmatpush3.msra.mxu0 %v6403_v20  ;;  %v6709_v56 = vld [vmem:[%s11317_s8 + $0x8] sm:$0xff] }
0x1e7d   : > { %v6073_v60 = vpop.f32.mrf.mxu1  ;;  %8702 = vmatprep.subr.mxu0 %v6402_v15 }
0x1e7e   : > { %v6074_v51 = vadd.f32 %v7446_v62, %v6073_v60  ;;  %8671 = vmatprep.mubr.msk.f32.mxu0 %vm1798_vm2, %v6094_v59  ;;  %v6097_v28 = vmax.f32 %v6079_v18, 0.0  ;;  %8703 = vmatpush3.msra.mxu0 %v6402_v15 }
0x1e7f   : > { %v8651_v13 = vpop.f32.mrf.mxu1  ;;  %8672 = vmatmul.mubr.msk.f32.gmra.mxu0 %vm1798_vm2, %v6095_v25 }
0x1e80   : > { %v6096_v22 = vmax.f32 %v6074_v51, 0.0  ;;  %v6089_v50 = vadd.f32 %v8651_v13, %v7446_v62  ;;  %v6708_v51 = vld [vmem:[%s11317_s8] sm:$0xff] }
0x1e81   : > { %v6083_v17 = vpop.f32.mrf.mxu1 }
0x1e82   : > { %v6084_v42 = vadd.f32 %v7446_v62, %v6083_v17  ;;  %8674 = vmatprep.mubr.msk.f32.mxu0 %vm1798_vm2, %v6096_v22  ;;  %v6099_v34 = vmax.f32 %v6089_v50, 0.0 }
0x1e83   : > { %8675 = vmatmul.mubr.msk.f32.gmra.mxu0 %vm1798_vm2, %v6097_v28 }
0x1e84   : > { %v6098_v47 = vmax.f32 %v6084_v42, 0.0 }
0x1e86   : > { %8677 = vmatprep.mubr.msk.f32.mxu0 %vm1798_vm2, %v6098_v47 }
0x1e87   : > { %8678 = vmatmul.mubr.msk.f32.gmra.mxu0 %vm1798_vm2, %v6099_v34 }
0x1f3b   : > { %v8670_v48 = vpop.f32.mrf.mxu0 }
0x1f3c   : > { %v6211_v49 = vadd.f32 %v8670_v48, %v7455_v31 }
0x1f3d   : > { %v6205_v23 = vpop.f32.mrf.mxu0 }
0x1f3e   : > { %v6206_v29 = vadd.f32 %v7455_v31, %v6205_v23  ;;  %v6245_v32 = vadd.f32 %v6211_v49, %v10291_v54 }
0x1f3f   : > { %v8673_v36 = vpop.f32.mrf.mxu0 }
0x1f40   : > { %v6244_v41 = vadd.f32 %v6206_v29, %v10288_v33  ;;  %v6221_v1 = vadd.f32 %v8673_v36, %v7455_v31 }
0x1f41   : > { %v6215_v57 = vpop.f32.mrf.mxu0 }
0x1f42   : > { %v6216_v30 = vadd.f32 %v7455_v31, %v6215_v57  ;;  %8688 = vmatprep.mubr.msk.f32.mxu1 %vm1219_vm1, %v6244_v41  ;;  %v6247_v43 = vadd.f32 %v6221_v1, %v10301_v3 }
0x1f43   : > { %v8676_v16 = vpop.f32.mrf.mxu0  ;;  %8689 = vmatmul.mubr.msk.f32.vlgmr.msra.gmra.mxu1 %vm1219_vm1, %v6245_v32 }
0x1f44   : > { %v6246_v35 = vadd.f32 %v6216_v30, %v10298_v4  ;;  %8721 = vmatpush3.msra.mxu1 %v6587_v2  ;;  %v6231_v53 = vadd.f32 %v8676_v16, %v7455_v31 }
0x1f45   : > { %v6225_v33 = vpop.f32.mrf.mxu0  ;;  %8722 = vmatprep.subr.mxu1 %v6586_v26 }
0x1f46   : > { %v6226_v54 = vadd.f32 %v7455_v31, %v6225_v33  ;;  %8691 = vmatprep.mubr.msk.f32.mxu1 %vm1219_vm1, %v6246_v35  ;;  %8723 = vmatpush3.msra.mxu1 %v6586_v26  ;;  %v6249_v4 = vadd.f32 %v6231_v53, %v10311_v14  ;;  %v6400_v14 = vld [vmem:[%s11315_s5] sm:$0xff] }
0x1f47   : > { %v8679_v12 = vpop.f32.mrf.mxu0  ;;  %8692 = vmatmul.mubr.msk.f32.gmra.mxu1 %vm1219_vm1, %v6247_v43  ;;  %8724 = vmatprep.subr.mxu1 %v6585_v19 }
0x1f48   : > { %v6248_v61 = vadd.f32 %v6226_v54, %v10308_v37  ;;  %8725 = vmatpush3.msra.mxu1 %v6585_v19  ;;  %v6241_v9 = vadd.f32 %v8679_v12, %v7455_v31  ;;  %v6401_v37 = vld [vmem:[%s11315_s5 + $0x8] sm:$0xff]  ;;  %v6859_v12 = vld [vmem:[%s9402_s30 + $0x18] sm:$0xff]  ;;  %s11321_s5 = sld [smem:[#allocation30_spill]] }
0x1f49   : > { %v6235_v39 = vpop.f32.mrf.mxu0  ;;  %8726 = vmatprep.subr.mxu1 %v6584_v38  ;;  %8704 = vmatprep.subr.mxu0 %v6401_v37 }
0x1f4a   : > { %v6236_v3 = vadd.f32 %v7455_v31, %v6235_v39  ;;  %8694 = vmatprep.mubr.msk.f32.mxu1 %vm1219_vm1, %v6248_v61  ;;  %8727 = vmatpush3.msra.mxu1 %v6584_v38  ;;  %v6251_v0 = vadd.f32 %v6241_v9, %v10321_v46  ;;  %v7464_v46 = vld [vmem:[%s11318_s3] ss:$0 sm:$0xff]  ;;  %s11319_s3 = sld [smem:[#allocation28_spill]] }
0x1f4b   : > { %8695 = vmatmul.mubr.msk.f32.gmra.mxu1 %vm1219_vm1, %v6249_v4  ;;  %8705 = vmatpush3.msra.mxu0 %v6401_v37  ;;  %v6856_v9 = vld [vmem:[%s9402_s30] sm:$0xff] }
0x1f4c   : > { %v6250_v63 = vadd.f32 %v6236_v3, %v10318_v6  ;;  %8706 = vmatprep.subr.mxu0 %v6400_v14  ;;  %v6711_v6 = vld [vmem:[%s11317_s8 + $0x18] sm:$0xff]  ;;  %8760 = vmatprep.subr.mxu1 %v6859_v12 }
0x1f4d   : > { %8707 = vmatpush3.msra.mxu0 %v6400_v14 }
0x1f4e   : > { %8697 = vmatprep.mubr.msk.f32.mxu1 %vm1219_vm1, %v6250_v63  ;;  %8740 = vmatprep.subr.mxu0 %v6711_v6 }
0x1f4f   : > { %8698 = vmatmul.mubr.msk.f32.gmra.mxu1 %vm1219_vm1, %v6251_v0 }
0x1f50   : > { %8728 = vmatprep.mubr.msk.f32.mxu1 %vm1219_vm1, %v6244_v41  ;;  %v7482_v47 = vld [vmem:[%s11319_s3] ss:$0 sm:$0xff]  ;;  %s11320_s3 = sld [smem:[#allocation26_spill]] }
0x1f53   : > { %8729 = vmatmul.mubr.msk.f32.vlgmr.msra.gmra.mxu1 %vm1219_vm1, %v6245_v32 }
0x1f54   : > { %8731 = vmatprep.mubr.msk.f32.mxu1 %vm1219_vm1, %v6246_v35  ;;  %8761 = vmatpush3.msra.mxu1 %v6859_v12 }
0x1f56   : > { %v7473_v3 = vld [vmem:[%s11320_s3] ss:$0 sm:$0xff] }
0x1f57   : > { %8732 = vmatmul.mubr.msk.f32.gmra.mxu1 %vm1219_vm1, %v6247_v43 }
0x1f58   : > { %8734 = vmatprep.mubr.msk.f32.mxu1 %vm1219_vm1, %v6248_v61  ;;  %v6858_v61 = vld [vmem:[%s9402_s30 + $0x10] sm:$0xff] }
0x1f59   : > { %8762 = vmatprep.subr.mxu1 %v6858_v61 }
0x1f5a   : > { %8763 = vmatpush3.msra.mxu1 %v6858_v61 }
0x1f5b   : > { %8735 = vmatmul.mubr.msk.f32.gmra.mxu1 %vm1219_vm1, %v6249_v4  ;;  %v6857_v4 = vld [vmem:[%s9402_s30 + $0x8] sm:$0xff] }
0x1f5c   : > { %8737 = vmatprep.mubr.msk.f32.mxu1 %vm1219_vm1, %v6250_v63  ;;  %8764 = vmatprep.subr.mxu1 %v6857_v4 }
0x1f5d   : > { %8765 = vmatpush3.msra.mxu1 %v6857_v4 }
0x1f5e   : > { %8766 = vmatprep.subr.mxu1 %v6856_v9 }
0x1f5f   : > { %8738 = vmatmul.mubr.msk.f32.gmra.mxu1 %vm1219_vm1, %v6251_v0 }
0x1f60   : > { %8767 = vmatpush3.msra.mxu1 %v6856_v9 }
0x2003   : > { %v8690_v5 = vpop.f32.mrf.mxu1 }
0x2004   : > { %v6359_v21 = vadd.f32 %v8690_v5, %v7464_v46 }
0x2005   : > { %v6353_v62 = vpop.f32.mrf.mxu1 }
0x2006   : > { %v6354_v44 = vadd.f32 %v7464_v46, %v6353_v62  ;;  %v6393_v24 = vmax.f32 %v6359_v21, 0.0 }
0x2007   : > { %v8693_v27 = vpop.f32.mrf.mxu1 }
0x2008   : > { %v6392_v8 = vmax.f32 %v6354_v44, 0.0  ;;  %v6369_v11 = vadd.f32 %v8693_v27, %v7464_v46 }
0x2009   : > { %v6363_v52 = vpop.f32.mrf.mxu1 }
0x200a   : > { %v6364_v58 = vadd.f32 %v7464_v46, %v6363_v52  ;;  %8708 = vmatprep.mubr.msk.f32.mxu0 %vm1219_vm1, %v6392_v8  ;;  %v6395_v59 = vmax.f32 %v6369_v11, 0.0  ;;  %v7491_v52 = vld [vmem:[%s11321_s5] ss:$0 sm:$0xff]  ;;  %s1034_s5 = sand.u32 1, %s9178_s16  }
0x200b   : > { %v8696_v55 = vpop.f32.mrf.mxu1  ;;  %8709 = vmatmul.mubr.msk.f32.vlgmr.msra.gmra.mxu0 %vm1219_vm1, %v6393_v24  ;;  %s7168_s3 = sshll.u32 %s1034_s5, 5 }
0x200c   : > { %v6394_v7 = vmax.f32 %v6364_v58, 0.0  ;;  %8741 = vmatpush3.msra.mxu0 %v6711_v6  ;;  %v6379_v25 = vadd.f32 %v8696_v55, %v7464_v46  ;;  %s1036_s6 = scalar_lea.vmem [#allocation2], %s7168_s3  ;;  %s11146_s3 = scalar_lea.sflag [#allocation3], %s1034_s5 }
0x200d   : > { %v6373_v18 = vpop.f32.mrf.mxu1  ;;  %8742 = vmatprep.subr.mxu0 %v6710_v10  ;;  %s7040_s8 = sshll.u32 %s1036_s6, 4  ;;  %s11140_s8 = int_to_ptr.vmem [resolvable:$true] %s7040_s8 }
0x200e   : > { %v6374_v60 = vadd.f32 %v7464_v46, %v6373_v18  ;;  %8711 = vmatprep.mubr.msk.f32.mxu0 %vm1219_vm1, %v6394_v7  ;;  %8743 = vmatpush3.msra.mxu0 %v6710_v10  ;;  %v6397_v28 = vmax.f32 %v6379_v25, 0.0  ;;  %s9126_s14 = scalar_lea.vmem %s11140_s8, 512  ;;  %p9133_p0 = scmp.lt.s32.totalorder %s11140_s8, %s9131_s17 }
0x200f   : > { %v8699_v13 = vpop.f32.mrf.mxu1  ;;  %8712 = vmatmul.mubr.msk.f32.gmra.mxu0 %vm1219_vm1, %v6395_v59  ;;  %8744 = vmatprep.subr.mxu0 %v6709_v56  ;;  %p9127_p11 = scmp.ne.s32.totalorder %s11140_s8, %s9126_s14  ;;  %p9134_p1 = scmp.lt.s32.totalorder %s9132_s19, %s9126_s14 }
0x2010   : > { %v6396_v22 = vmax.f32 %v6374_v60, 0.0  ;;  %8745 = vmatpush3.msra.mxu0 %v6709_v56  ;;  %v6389_v50 = vadd.f32 %v8699_v13, %v7464_v46 }
0x2011   : > { %v6383_v17 = vpop.f32.mrf.mxu1  ;;  %8746 = vmatprep.subr.mxu0 %v6708_v51  ;;  %p9128_p12 = pnand %p9127_p11, %p9457_p5  ;;  %p9135_p2 = por %p9134_p1, %p9133_p0 }
0x2012   : > { %v6384_v42 = vadd.f32 %v7464_v46, %v6383_v17  ;;  %8714 = vmatprep.mubr.msk.f32.mxu0 %vm1219_vm1, %v6396_v22  ;;  %8747 = vmatpush3.msra.mxu0 %v6708_v51  ;;  %v6399_v45 = vmax.f32 %v6389_v50, 0.0 }
0x2013   : > { %8715 = vmatmul.mubr.msk.f32.gmra.mxu0 %vm1219_vm1, %v6397_v28  ;;  %v8730_v34 = vpop.f32.mrf.mxu1  ;;  %p9129_p13 = pneg %p9128_p12 }
0x2014   : > { %v6398_v40 = vmax.f32 %v6384_v42, 0.0  ;;  %v6667_v2 = vadd.f32 %v8730_v34, %v7482_v47 }
0x2015   : > { %v6661_v20 = vpop.f32.mrf.mxu1  ;;  %p9136_p3 = pnand %p9135_p2, %p9129_p13 }
0x2016   : > { %v6662_v15 = vadd.f32 %v7482_v47, %v6661_v20  ;;  %8717 = vmatprep.mubr.msk.f32.mxu0 %vm1219_vm1, %v6398_v40  ;;  %v6701_v49 = vmax.f32 %v6667_v2, 0.0 }
0x2017   : > { %8718 = vmatmul.mubr.msk.f32.gmra.mxu0 %vm1219_vm1, %v6399_v45  ;;  %v8733_v31 = vpop.f32.mrf.mxu1 }
0x2018   : > { %v6700_v48 = vmax.f32 %v6662_v15, 0.0  ;;  %v6677_v23 = vadd.f32 %v8733_v31, %v7482_v47 }
0x2019   : > { %v6671_v29 = vpop.f32.mrf.mxu1 }
0x201a   : > { %v6672_v36 = vadd.f32 %v7482_v47, %v6671_v29  ;;  %8748 = vmatprep.mubr.msk.f32.mxu0 %vm1219_vm1, %v6700_v48  ;;  %v6703_v1 = vmax.f32 %v6677_v23, 0.0 }
0x201b   : > { %v8736_v41 = vpop.f32.mrf.mxu1  ;;  %8749 = vmatmul.mubr.msk.f32.vlgmr.msra.gmra.mxu0 %vm1219_vm1, %v6701_v49 }
0x201c   : > { %v6702_v32 = vmax.f32 %v6672_v36, 0.0  ;;  %v6687_v57 = vadd.f32 %v8736_v41, %v7482_v47 }
0x201d   : > { %v6681_v30 = vpop.f32.mrf.mxu1 }
0x201e   : > { %v6682_v26 = vadd.f32 %v7482_v47, %v6681_v30  ;;  %8751 = vmatprep.mubr.msk.f32.mxu0 %vm1219_vm1, %v6702_v32  ;;  %v6705_v19 = vmax.f32 %v6687_v57, 0.0 }
0x201f   : > { %v8739_v16 = vpop.f32.mrf.mxu1  ;;  %8752 = vmatmul.mubr.msk.f32.gmra.mxu0 %vm1219_vm1, %v6703_v1 }
0x2020   : > { %v6704_v35 = vmax.f32 %v6682_v26, 0.0  ;;  %v6697_v43 = vadd.f32 %v8739_v16, %v7482_v47 }
0x2021   : > { %v6691_v53 = vpop.f32.mrf.mxu1 }
0x2022   : > { %v6692_v33 = vadd.f32 %v7482_v47, %v6691_v53  ;;  %8754 = vmatprep.mubr.msk.f32.mxu0 %vm1219_vm1, %v6704_v35  ;;  %v6707_v38 = vmax.f32 %v6697_v43, 0.0 }
0x2023   : > { %8755 = vmatmul.mubr.msk.f32.gmra.mxu0 %vm1219_vm1, %v6705_v19 }
0x2024   : > { %v6706_v54 = vmax.f32 %v6692_v33, 0.0 }
0x2026   : > { %8757 = vmatprep.mubr.msk.f32.mxu0 %vm1219_vm1, %v6706_v54 }
0x2027   : > { %8758 = vmatmul.mubr.msk.f32.gmra.mxu0 %vm1219_vm1, %v6707_v38 }
0x20cb   : > { %v8710_v39 = vpop.f32.mrf.mxu0 }
0x20cc   : > { %v6507_v14 = vadd.f32 %v8710_v39, %v7473_v3 }
0x20cd   : > { %v6501_v63 = vpop.f32.mrf.mxu0 }
0x20ce   : > { %v6502_v0 = vadd.f32 %v7473_v3, %v6501_v63  ;;  %v6541_v21 = vmax.f32 %v6507_v14, 0.0 }
0x20cf   : > { %v8713_v37 = vpop.f32.mrf.mxu0 }
0x20d0   : > { %v6540_v6 = vmax.f32 %v6502_v0, 0.0  ;;  %v6517_v8 = vadd.f32 %v8713_v37, %v7473_v3 }
0x20d1   : > { %v6511_v46 = vpop.f32.mrf.mxu0 }
0x20d2   : > { %6548 = vxpose.xlu0.b32.start [1/8] (short) (narrow) %v6540_v6, 32  ;;  %v6512_v62 = vadd.f32 %v7473_v3, %v6511_v46  ;;  %v6543_v10 = vmax.f32 %v6517_v8, 0.0 }
0x20d3   : > { %v8716_v5 = vpop.f32.mrf.mxu0 }
0x20d4   : > { %v6542_v24 = vmax.f32 %v6512_v62, 0.0  ;;  %v6527_v18 = vadd.f32 %v8716_v5, %v7473_v3 }
0x20d5   : > { %v6521_v44 = vpop.f32.mrf.mxu0 }
0x20d6   : > { %6549 = vxpose.xlu0.b32.cont [2/8] (short) (narrow) %v6541_v21, 32  ;;  %v6522_v55 = vadd.f32 %v7473_v3, %v6521_v44  ;;  %v6545_v42 = vmax.f32 %v6527_v18, 0.0 }
0x20d7   : > { %v8719_v27 = vpop.f32.mrf.mxu0 }
0x20d8   : > { %v6544_v60 = vmax.f32 %v6522_v55, 0.0  ;;  %v6537_v31 = vadd.f32 %v8719_v27, %v7473_v3 }
0x20d9   : > { %v6531_v11 = vpop.f32.mrf.mxu0 }
0x20da   : > { %6550 = vxpose.xlu0.b32.cont [3/8] (short) (narrow) %v6542_v24, 32  ;;  %v6532_v47 = vadd.f32 %v7473_v3, %v6531_v11  ;;  %v6547_v32 = vmax.f32 %v6537_v31, 0.0 }
0x20db   : > { %v8750_v58 = vpop.f32.mrf.mxu0 }
0x20dc   : > { %v6815_v7 = vadd.f32 %v8750_v58, %v7491_v52  ;;  %v6546_v48 = vmax.f32 %v6532_v47, 0.0 }
0x20dd   : > { %v6809_v56 = vpop.f32.mrf.mxu0 }
0x20de   : > { %v6810_v59 = vadd.f32 %v7491_v52, %v6809_v56  ;;  %6551 = vxpose.xlu0.b32.cont [4/8] (short) (narrow) %v6543_v10, 32  ;;  %v6849_v13 = vmax.f32 %v6815_v7, 0.0 }
0x20df   : > { %v8753_v25 = vpop.f32.mrf.mxu0 }
0x20e0   : > { %v6848_v51 = vmax.f32 %v6810_v59, 0.0  ;;  %v6825_v22 = vadd.f32 %v8753_v25, %v7491_v52 }
0x20e1   : > { %v6819_v28 = vpop.f32.mrf.mxu0 }
0x20e2   : > { %v6820_v50 = vadd.f32 %v7491_v52, %v6819_v28  ;;  %6552 = vxpose.xlu0.b32.cont [5/8] (short) (narrow) %v6544_v60, 32  ;;  %8768 = vmatprep.mubr.msk.f32.mxu1 %vm1219_vm1, %v6848_v51  ;;  %v6851_v40 = vmax.f32 %v6825_v22, 0.0 }
0x20e3   : > { %v8756_v17 = vpop.f32.mrf.mxu0  ;;  %8769 = vmatmul.mubr.msk.f32.vlgmr.msra.gmra.mxu1 %vm1219_vm1, %v6849_v13 }
0x20e4   : > { %v6850_v34 = vmax.f32 %v6820_v50, 0.0  ;;  %v6835_v45 = vadd.f32 %v8756_v17, %v7491_v52 }
0x20e5   : > { %v6829_v2 = vpop.f32.mrf.mxu0 }
0x20e6   : > { %v6830_v20 = vadd.f32 %v7491_v52, %v6829_v2  ;;  %6553 = vxpose.xlu0.b32.cont [6/8] (short) (narrow) %v6545_v42, 32  ;;  %8771 = vmatprep.mubr.msk.f32.mxu1 %vm1219_vm1, %v6850_v34  ;;  %v6853_v23 = vmax.f32 %v6835_v45, 0.0 }
0x20e7   : > { %v8759_v15 = vpop.f32.mrf.mxu0  ;;  %8772 = vmatmul.mubr.msk.f32.gmra.mxu1 %vm1219_vm1, %v6851_v40 }
0x20e8   : > { %v6852_v49 = vmax.f32 %v6830_v20, 0.0  ;;  %v6845_v29 = vadd.f32 %v8759_v15, %v7491_v52 }
0x20e9   : > { %v6839_v36 = vpop.f32.mrf.mxu0 }
0x20ea   : > { %v6840_v41 = vadd.f32 %v7491_v52, %v6839_v36  ;;  %8774 = vmatprep.mubr.msk.f32.mxu1 %vm1219_vm1, %v6852_v49  ;;  %6554 = vxpose.xlu0.b32.cont [7/8] (short) (narrow) %v6546_v48, 32  ;;  %v6855_v57 = vmax.f32 %v6845_v29, 0.0 }
0x20eb   : > { %8775 = vmatmul.mubr.msk.f32.gmra.mxu1 %vm1219_vm1, %v6853_v23 }
0x20ec   : > { %v6854_v1 = vmax.f32 %v6840_v41, 0.0 }
0x20ee   : > { %8777 = vmatprep.mubr.msk.f32.mxu1 %vm1219_vm1, %v6854_v1  ;;  %6555 = vxpose.xlu0.b32.end [8/8] (short) (narrow) %v6547_v32, 32 }
0x20ef   : > { %8778 = vmatmul.mubr.msk.f32.gmra.mxu1 %vm1219_vm1, %v6855_v57 }
0x214e   : > { %v6564_v30 = vpop.trf.xlu0 }
0x214f   : > { %6580 = vst.msk [vmem:[%s1036_s6] sm:$0xff] %vm1798_vm2, %v6564_v30 }
0x2152   : > { %v6565_v26 = vpop.trf.xlu0 }
0x2153   : > { %6581 = vst.msk [vmem:[%s1036_s6 + $0x8] sm:$0xff] %vm1798_vm2, %v6565_v26 }
0x2156   : > { %v6566_v16 = vpop.trf.xlu0 }
0x2157   : > { %6582 = vst.msk [vmem:[%s1036_s6 + $0x10] sm:$0xff] %vm1798_vm2, %v6566_v16 }
0x215a   : > { %v6567_v35 = vpop.trf.xlu0 }
0x215b   : > { %6583 = vst.msk [vmem:[%s1036_s6 + $0x18] sm:$0xff] %vm1798_vm2, %v6567_v35 }
0x215c   : > { %9139 = shalt.err (!%p9136_p3)
}
0x215d   : > { %s9140_s9 = scalar_lea.hbm %s11143_s13, 512  ;;  %s9144_s6 = scalar_lea.hbm %s9412_s4, 1024 }
0x215e   : > { %p9141_p4 = scmp.ne.s32.totalorder %s11143_s13, %s9140_s9  ;;  %p9145_p9 = scmp.lt.s32.totalorder %s11143_s13, %s9412_s4 }
0x215f   : > { %p9146_p10 = scmp.lt.s32.totalorder %s9144_s6, %s9140_s9 }
0x2160   : > { %p9142_p7 = pnand %p9141_p4, %p9457_p5 }
0x2161   : > { %p9147_p11 = por %p9146_p10, %p9145_p9 }
0x2162   : > { %p9143_p8 = pneg %p9142_p7 }
0x2164   : > { %p9148_p12 = pnand %p9147_p11, %p9143_p8 }
0x2166   : > { %9151 = shalt.err (!%p9148_p12)
}
0x2167   : > { %s9238_s17 = smov 128   ;;  %v7500_v19 = vld [vmem:[%s9407_s27] ss:$0 sm:$0xff]  ;;  %s11322_s14 = sshll.u32 %s9470_s11, 6  ;;  %vm7012_vm5 = vcmask 15360  }
0x2168   : > { %8780 = dma.vmem_to_hbm [thread:$0]  (%p9457_p5), %s11140_s8, 512, %s11143_s13, %s11146_s3, %s9238_s17, %s9238_s17, %s11304_s1  }
0x2169   : > { %s11170_s19 = scalar_lea.vmem %s9417_s12, %s11322_s14 }
0x21a3   : > { %v8770_v43 = vpop.f32.mrf.mxu1 }
0x21a4   : > { %v6963_v53 = vadd.f32 %v8770_v43, %v7500_v19 }
0x21a5   : > { %v6957_v33 = vpop.f32.mrf.mxu1 }
0x21a6   : > { %v7510_v54 = vclamps-f32 %v6963_v53, 1.0  ;;  %v6958_v38 = vadd.f32 %v7500_v19, %v6957_v33 }
0x21a7   : > { %v8773_v12 = vpop.f32.mrf.mxu1 }
0x21a8   : > { %7014 = vst.msk [vmem:[%s11170_s19 + $0x8] sm:$0xff] %vm7012_vm5, %v7510_v54  ;;  %v7509_v61 = vclamps-f32 %v6958_v38, 1.0  ;;  %v6973_v4 = vadd.f32 %v8773_v12, %v7500_v19 }
0x21a9   : > { %v6967_v9 = vpop.f32.mrf.mxu1 }
0x21aa   : > { %7013 = vst.msk [vmem:[%s11170_s19] sm:$0xff] %vm7012_vm5, %v7509_v61  ;;  %v7512_v39 = vclamps-f32 %v6973_v4, 1.0  ;;  %v6968_v3 = vadd.f32 %v7500_v19, %v6967_v9 }
0x21ab   : > { %v8776_v63 = vpop.f32.mrf.mxu1 }
0x21ac   : > { %7016 = vst.msk [vmem:[%s11170_s19 + $0x18] sm:$0xff] %vm7012_vm5, %v7512_v39  ;;  %v7511_v0 = vclamps-f32 %v6968_v3, 1.0  ;;  %v6983_v37 = vadd.f32 %v8776_v63, %v7500_v19 }
0x21ad   : > { %v6977_v14 = vpop.f32.mrf.mxu1 }
0x21ae   : > { %7015 = vst.msk [vmem:[%s11170_s19 + $0x10] sm:$0xff] %vm7012_vm5, %v7511_v0  ;;  %v7514_v6 = vclamps-f32 %v6983_v37, 1.0  ;;  %v6978_v46 = vadd.f32 %v7500_v19, %v6977_v14 }
0x21af   : > { %v8779_v5 = vpop.f32.mrf.mxu1 }
0x21b0   : > { %7018 = vst.msk [vmem:[%s11170_s19 + $0x28] sm:$0xff] %vm7012_vm5, %v7514_v6  ;;  %v7513_v21 = vclamps-f32 %v6978_v46, 1.0  ;;  %v6993_v62 = vadd.f32 %v8779_v5, %v7500_v19 }
0x21b1   : > { %v6987_v44 = vpop.f32.mrf.mxu1 }
0x21b2   : > { %7017 = vst.msk [vmem:[%s11170_s19 + $0x20] sm:$0xff] %vm7012_vm5, %v7513_v21  ;;  %v7516_v27 = vclamps-f32 %v6993_v62, 1.0  ;;  %v6988_v8 = vadd.f32 %v7500_v19, %v6987_v44 }
0x21b4   : > { %7020 = vst.msk [vmem:[%s11170_s19 + $0x38] sm:$0xff] %vm7012_vm5, %v7516_v27  ;;  %v7515_v24 = vclamps-f32 %v6988_v8, 1.0 }
0x21b6   : > { %7019 = vst.msk [vmem:[%s11170_s19 + $0x30] sm:$0xff] %vm7012_vm5, %v7515_v24 }
0x21b7 PF: > { %p8786_p5 = scmp.ge.s32.totalorder %s9186_s22, 2  ;;  %s7058_s13 = sand.u32 1, %s9174_s15  }
0x21b8   : > { %s7059_s7 = scalar_lea.sflag [#allocation3], %s7058_s13 }
0x21b9   : > { %p8783_p13 = pnand %p8786_p5, %p9461_p6 }
0x21bb   : > { %p8784_p0 = pneg %p8783_p13 }
0x21bd   : > { %9169 = dma.done.wait (%p8784_p0), %s7059_s7, 512  }
0x21be   : > { %9171 = vsyncadd (%p8784_p0), %s7059_s7, 4294966784  ;;  %p80_p1 = scmp.ge.s32.totalorder %s9444_s26, 4   ;;  %s11323_s15 = smov %s9178_s16 }
0x21bf   : > { %s11324_s16 = smov %s9182_s18  ;;  %s11325_s18 = smov %s9455_s2 }
0x21c0   : > { %s11326_s22 = smov %s9444_s26  ;;  %82 = sbr.rel (!%p80_p1) target bundleno = 65 (0x41), region = 233 }
0x21c5   :  { %7072 = vsyncpa [#allocation3], 1 }
0x21c6   :  { %7074 = vsyncpa [#allocation3 + $0x1], 1 }

</bundles_post_ra>
